<compile_context>
chip_gen: v7x
topology: tpu7x:2x2x1
jax: 0.10.0
libtpu: 0.0.40
codegen_flags: <defaults>
</compile_context>

<pallas_src>
import math

import jax
import jax.numpy as jnp
from jax.experimental import pallas as pl
from jax.experimental.pallas import tpu as pltpu


LRELU_SLOPE = 0.2
BN_EPS = 0.8
HIDDEN_DIMS = (128, 256, 512, 1024)


def _lrelu(y):
    return jnp.where(y > 0.0, y, LRELU_SLOPE * y)


# --------------------------------------------------------------------------
# Fully fused generator kernel.
#   grid = (CHW // tn,)  -- column tiles of the final Linear layer.
#   The 4-layer hidden trunk runs once (grid step 0); its output lives in a
#   VMEM scratch that persists across grid iterations.
# --------------------------------------------------------------------------
def _generator_kernel(z_ref,
                      w1_ref, b1_ref,
                      w2_ref, b2_ref, g2_ref, be2_ref,
                      w3_ref, b3_ref, g3_ref, be3_ref,
                      w4_ref, b4_ref, g4_ref, be4_ref,
                      w5_ref, b5_ref,
                      o_ref,
                      h_scratch):
    j = pl.program_id(0)

    def bn_lrelu_layer(x_bf16, w_ref, b_ref, g_ref, be_ref):
        y = jnp.dot(x_bf16, w_ref[...], preferred_element_type=jnp.float32)
        y = y + b_ref[...]
        # Single-pass BatchNorm1d (training-mode batch stats, biased variance).
        mean = jnp.mean(y, axis=0, keepdims=True)
        mean_sq = jnp.mean(y * y, axis=0, keepdims=True)
        var = jnp.maximum(mean_sq - mean * mean, 0.0)
        y = (y - mean) * jax.lax.rsqrt(var + BN_EPS)
        y = g_ref[...] * y + be_ref[...]
        return _lrelu(y)

    # Hidden trunk: compute once; scratch persists across the column grid.
    @pl.when(j == 0)
    def _():
        x = z_ref[...].astype(jnp.bfloat16)
        h = jnp.dot(x, w1_ref[...], preferred_element_type=jnp.float32)
        h = _lrelu(h + b1_ref[...])
        h = bn_lrelu_layer(h.astype(jnp.bfloat16), w2_ref, b2_ref, g2_ref, be2_ref)
        h = bn_lrelu_layer(h.astype(jnp.bfloat16), w3_ref, b3_ref, g3_ref, be3_ref)
        h = bn_lrelu_layer(h.astype(jnp.bfloat16), w4_ref, b4_ref, g4_ref, be4_ref)
        h_scratch[...] = h

    # Final Linear (1024 -> C*H*W), column tile j, + Tanh.
    h4 = h_scratch[...].astype(jnp.bfloat16)
    y = jnp.dot(h4, w5_ref[...], preferred_element_type=jnp.float32) + b5_ref[...]
    o_ref[...] = jnp.tanh(y)


def _pick_col_tile(chw):
    """Largest 128-multiple tile that divides CHW; else a single full block."""
    for tn in (1024, 512, 256, 128):
        if chw % tn == 0:
            return tn
    return chw


# --------------------------------------------------------------------------
# Parameter construction (deterministic, PyTorch-Linear-style uniform init).
# Weights are stored in bf16; biases / BN affine params in f32.
# --------------------------------------------------------------------------
def init_generator_params(key, latent_dim, img_shape):
    c, h, w = img_shape
    dims = [latent_dim, *HIDDEN_DIMS, c * h * w]
    normalized = [False, True, True, True, False]
    params = []
    for i, norm in enumerate(normalized):
        fan_in, fan_out = dims[i], dims[i + 1]
        key, kw, kb = jax.random.split(key, 3)
        bound = 1.0 / math.sqrt(fan_in)
        W = jax.random.uniform(kw, (fan_in, fan_out), jnp.float32, -bound, bound)
        b = jax.random.uniform(kb, (1, fan_out), jnp.float32, -bound, bound)
        W = W.astype(jnp.bfloat16)  # bf16 weight storage; accumulation stays f32
        if norm:
            gamma = jnp.ones((1, fan_out), jnp.float32)
            beta = jnp.zeros((1, fan_out), jnp.float32)
            params.append((W, b, gamma, beta))
        else:
            params.append((W, b))
    return params


def generator_forward(z, params, img_shape):
    batch, latent = z.shape
    c, h, w = img_shape
    chw = c * h * w
    (w1, b1), (w2, b2, g2, be2), (w3, b3, g3, be3), (w4, b4, g4, be4), (w5, b5) = params

    tn = _pick_col_tile(chw)
    grid = (chw // tn,)

    def full(arr):
        # Whole array resident in VMEM; constant block index -> no re-DMA
        # across grid iterations.
        return pl.BlockSpec(arr.shape, lambda j: (0, 0))

    in_specs = [
        full(z),
        full(w1), full(b1),
        full(w2), full(b2), full(g2), full(be2),
        full(w3), full(b3), full(g3), full(be3),
        full(w4), full(b4), full(g4), full(be4),
        pl.BlockSpec((HIDDEN_DIMS[-1], tn), lambda j: (0, j)),   # W5 column tile
        pl.BlockSpec((1, tn), lambda j: (0, j)),                 # b5 column tile
    ]
    out_spec = pl.BlockSpec((batch, tn), lambda j: (0, j))

    flops = 2 * batch * (latent * 128 + 128 * 256 + 256 * 512
                         + 512 * 1024 + 1024 * chw)
    bytes_accessed = (
        z.size * z.dtype.itemsize
        + sum(int(a.size) * a.dtype.itemsize for layer in params for a in layer)
        + batch * chw * 4
    )
    transcendentals = batch * chw + (256 + 512 + 1024)   # tanh + BN rsqrt

    out = pl.pallas_call(
        _generator_kernel,
        grid=grid,
        in_specs=in_specs,
        out_specs=out_spec,
        out_shape=jax.ShapeDtypeStruct((batch, chw), jnp.float32),
        scratch_shapes=[pltpu.VMEM((batch, HIDDEN_DIMS[-1]), jnp.float32)],
        compiler_params=pltpu.CompilerParams(
            # "arbitrary": the hidden-trunk result is written to scratch at
            # j == 0 and consumed by every later column tile, so the column
            # axis must iterate sequentially on one core.
            dimension_semantics=("arbitrary",),
        ),
        cost_estimate=pl.CostEstimate(
            flops=flops,
            transcendentals=transcendentals,
            bytes_accessed=bytes_accessed,
        ),
    )(z, w1, b1, w2, b2, g2, be2, w3, b3, g3, be3, w4, b4, g4, be4, w5, b5)

    return out.reshape(batch, c, h, w)   # NCHW, same as img.view(B, *img_shape)


if __name__ == "__main__":
    # Small, deterministic example consistent with the module's forward.
    latent_dim = 32
    channels, img_size = 1, 16
    img_shape = (channels, img_size, img_size)   # prod = 256
    batch = 8

    key = jax.random.PRNGKey(0)
    key_p, key_z = jax.random.split(key)
    params = init_generator_params(key_p, latent_dim, img_shape)
    z = jax.random.normal(key_z, (batch, latent_dim), jnp.float32)

    img = generator_forward(z, params, img_shape)
    img = jax.block_until_ready(img)
    assert img.shape == (batch, channels, img_size, img_size), img.shape
    assert bool(jnp.all(jnp.isfinite(img)))
    print("KERNEL_OK")
</pallas_src>

<mosaic_0001>
module attributes {stable_mosaic.version = 11 : i64} {
  func.func @_generator_kernel(%arg0: i32, %arg1: memref<8x32xf32, #tpu.memory_space<vmem>>, %arg2: memref<32x128xbf16, #tpu.memory_space<vmem>>, %arg3: memref<1x128xf32, #tpu.memory_space<vmem>>, %arg4: memref<128x256xbf16, #tpu.memory_space<vmem>>, %arg5: memref<1x256xf32, #tpu.memory_space<vmem>>, %arg6: memref<1x256xf32, #tpu.memory_space<vmem>>, %arg7: memref<1x256xf32, #tpu.memory_space<vmem>>, %arg8: memref<256x512xbf16, #tpu.memory_space<vmem>>, %arg9: memref<1x512xf32, #tpu.memory_space<vmem>>, %arg10: memref<1x512xf32, #tpu.memory_space<vmem>>, %arg11: memref<1x512xf32, #tpu.memory_space<vmem>>, %arg12: memref<512x1024xbf16, #tpu.memory_space<vmem>>, %arg13: memref<1x1024xf32, #tpu.memory_space<vmem>>, %arg14: memref<1x1024xf32, #tpu.memory_space<vmem>>, %arg15: memref<1x1024xf32, #tpu.memory_space<vmem>>, %arg16: memref<1024x256xbf16, #tpu.memory_space<vmem>>, %arg17: memref<1x256xf32, #tpu.memory_space<vmem>>, %arg18: memref<8x256xf32, #tpu.memory_space<vmem>>, %arg19: memref<8x1024xf32, #tpu.memory_space<vmem>>) attributes {dimension_semantics = [#tpu.dimension_semantics<arbitrary>], iteration_bounds = array<i64: 1>, scalar_prefetch = 0 : i64, scratch_operands = 1 : i64, tpu.core_type = #tpu.core_type<tc>, window_params = [{pipeline_mode = #tpu.pipeline_mode<synchronous>, transform_indices = @transform_0, window_bounds = array<i64: 8, 32>}, {pipeline_mode = #tpu.pipeline_mode<synchronous>, transform_indices = @transform_1, window_bounds = array<i64: 32, 128>}, {pipeline_mode = #tpu.pipeline_mode<synchronous>, transform_indices = @transform_2, window_bounds = array<i64: 1, 128>}, {pipeline_mode = #tpu.pipeline_mode<synchronous>, transform_indices = @transform_3, window_bounds = array<i64: 128, 256>}, {pipeline_mode = #tpu.pipeline_mode<synchronous>, transform_indices = @transform_4, window_bounds = array<i64: 1, 256>}, {pipeline_mode = #tpu.pipeline_mode<synchronous>, transform_indices = @transform_5, window_bounds = array<i64: 1, 256>}, {pipeline_mode = #tpu.pipeline_mode<synchronous>, transform_indices = @transform_6, window_bounds = array<i64: 1, 256>}, {pipeline_mode = #tpu.pipeline_mode<synchronous>, transform_indices = @transform_7, window_bounds = array<i64: 256, 512>}, {pipeline_mode = #tpu.pipeline_mode<synchronous>, transform_indices = @transform_8, window_bounds = array<i64: 1, 512>}, {pipeline_mode = #tpu.pipeline_mode<synchronous>, transform_indices = @transform_9, window_bounds = array<i64: 1, 512>}, {pipeline_mode = #tpu.pipeline_mode<synchronous>, transform_indices = @transform_10, window_bounds = array<i64: 1, 512>}, {pipeline_mode = #tpu.pipeline_mode<synchronous>, transform_indices = @transform_11, window_bounds = array<i64: 512, 1024>}, {pipeline_mode = #tpu.pipeline_mode<synchronous>, transform_indices = @transform_12, window_bounds = array<i64: 1, 1024>}, {pipeline_mode = #tpu.pipeline_mode<synchronous>, transform_indices = @transform_13, window_bounds = array<i64: 1, 1024>}, {pipeline_mode = #tpu.pipeline_mode<synchronous>, transform_indices = @transform_14, window_bounds = array<i64: 1, 1024>}, {transform_indices = @transform_15, window_bounds = array<i64: 1024, 256>}, {transform_indices = @transform_16, window_bounds = array<i64: 1, 256>}, {transform_indices = @transform_17, window_bounds = array<i64: 8, 256>}]} {
    %c0_i32 = arith.constant 0 : i32
    %0 = arith.cmpi eq, %arg0, %c0_i32 : i32
    %1 = arith.extui %0 : i1 to i32
    %c0_i32_0 = arith.constant 0 : i32
    %2 = arith.cmpi ne, %1, %c0_i32_0 : i32
    scf.if %2 {
      %c0_8 = arith.constant 0 : index
      %c0_9 = arith.constant 0 : index
      %12 = vector.load %arg1[%c0_8, %c0_9] : memref<8x32xf32, #tpu.memory_space<vmem>>, vector<8x32xf32>
      %13 = arith.truncf %12 : vector<8x32xf32> to vector<8x32xbf16>
      %c0_10 = arith.constant 0 : index
      %c0_11 = arith.constant 0 : index
      %14 = vector.load %arg2[%c0_10, %c0_11] : memref<32x128xbf16, #tpu.memory_space<vmem>>, vector<32x128xbf16>
      %cst_12 = arith.constant dense<0.000000e+00> : vector<8x128xf32>
      %15 = tpu.matmul %13, %14, %cst_12 {dimension_numbers = #tpu.dot_dimension_numbers<[1], [0], [0], [1], [0, 0, 1, 1], [], []>} : vector<8x32xbf16>, vector<32x128xbf16>, vector<8x128xf32> -> vector<8x128xf32>
      %c0_13 = arith.constant 0 : index
      %c0_14 = arith.constant 0 : index
      %16 = vector.load %arg3[%c0_13, %c0_14] : memref<1x128xf32, #tpu.memory_space<vmem>>, vector<1x128xf32>
      %17 = vector.broadcast %16 : vector<1x128xf32> to vector<8x128xf32>
      %18 = arith.addf %15, %17 : vector<8x128xf32>
      %cst_15 = arith.constant 0.000000e+00 : f32
      %19 = vector.broadcast %cst_15 : f32 to vector<8x128xf32>
      %20 = arith.cmpf ogt, %18, %19 : vector<8x128xf32>
      %cst_16 = arith.constant 2.000000e-01 : f32
      %21 = vector.broadcast %cst_16 : f32 to vector<8x128xf32>
      %22 = arith.mulf %21, %18 : vector<8x128xf32>
      %23 = arith.select %20, %18, %22 : vector<8x128xi1>, vector<8x128xf32>
      %24 = arith.truncf %23 : vector<8x128xf32> to vector<8x128xbf16>
      %c0_17 = arith.constant 0 : index
      %c0_18 = arith.constant 0 : index
      %25 = vector.load %arg4[%c0_17, %c0_18] : memref<128x256xbf16, #tpu.memory_space<vmem>>, vector<128x256xbf16>
      %cst_19 = arith.constant dense<0.000000e+00> : vector<8x256xf32>
      %26 = tpu.matmul %24, %25, %cst_19 {dimension_numbers = #tpu.dot_dimension_numbers<[1], [0], [0], [1], [0, 0, 1, 1], [], []>} : vector<8x128xbf16>, vector<128x256xbf16>, vector<8x256xf32> -> vector<8x256xf32>
      %c0_20 = arith.constant 0 : index
      %c0_21 = arith.constant 0 : index
      %27 = vector.load %arg5[%c0_20, %c0_21] : memref<1x256xf32, #tpu.memory_space<vmem>>, vector<1x256xf32>
      %28 = vector.broadcast %27 : vector<1x256xf32> to vector<8x256xf32>
      %29 = arith.addf %26, %28 : vector<8x256xf32>
      %cst_22 = arith.constant dense<0.000000e+00> : vector<256xf32>
      %30 = vector.multi_reduction <add>, %29, %cst_22 [0] : vector<8x256xf32> to vector<256xf32>
      %31 = vector.shape_cast %30 : vector<256xf32> to vector<1x256xf32>
      %cst_23 = arith.constant 8.000000e+00 : f32
      %32 = vector.broadcast %cst_23 : f32 to vector<1x256xf32>
      %33 = arith.divf %31, %32 : vector<1x256xf32>
      %34 = arith.mulf %29, %29 : vector<8x256xf32>
      %cst_24 = arith.constant dense<0.000000e+00> : vector<256xf32>
      %35 = vector.multi_reduction <add>, %34, %cst_24 [0] : vector<8x256xf32> to vector<256xf32>
      %36 = vector.shape_cast %35 : vector<256xf32> to vector<1x256xf32>
      %cst_25 = arith.constant 8.000000e+00 : f32
      %37 = vector.broadcast %cst_25 : f32 to vector<1x256xf32>
      %38 = arith.divf %36, %37 : vector<1x256xf32>
      %39 = arith.mulf %33, %33 : vector<1x256xf32>
      %40 = arith.subf %38, %39 : vector<1x256xf32>
      %cst_26 = arith.constant 0.000000e+00 : f32
      %41 = vector.broadcast %cst_26 : f32 to vector<1x256xf32>
      %42 = arith.maximumf %40, %41 : vector<1x256xf32>
      %43 = vector.broadcast %33 : vector<1x256xf32> to vector<8x256xf32>
      %44 = arith.subf %29, %43 : vector<8x256xf32>
      %cst_27 = arith.constant 8.000000e-01 : f32
      %45 = vector.broadcast %cst_27 : f32 to vector<1x256xf32>
      %46 = arith.addf %42, %45 : vector<1x256xf32>
      %47 = math.rsqrt %46 : vector<1x256xf32>
      %48 = vector.broadcast %47 : vector<1x256xf32> to vector<8x256xf32>
      %49 = arith.mulf %44, %48 : vector<8x256xf32>
      %c0_28 = arith.constant 0 : index
      %c0_29 = arith.constant 0 : index
      %50 = vector.load %arg6[%c0_28, %c0_29] : memref<1x256xf32, #tpu.memory_space<vmem>>, vector<1x256xf32>
      %51 = vector.broadcast %50 : vector<1x256xf32> to vector<8x256xf32>
      %52 = arith.mulf %51, %49 : vector<8x256xf32>
      %c0_30 = arith.constant 0 : index
      %c0_31 = arith.constant 0 : index
      %53 = vector.load %arg7[%c0_30, %c0_31] : memref<1x256xf32, #tpu.memory_space<vmem>>, vector<1x256xf32>
      %54 = vector.broadcast %53 : vector<1x256xf32> to vector<8x256xf32>
      %55 = arith.addf %52, %54 : vector<8x256xf32>
      %cst_32 = arith.constant 0.000000e+00 : f32
      %56 = vector.broadcast %cst_32 : f32 to vector<8x256xf32>
      %57 = arith.cmpf ogt, %55, %56 : vector<8x256xf32>
      %cst_33 = arith.constant 2.000000e-01 : f32
      %58 = vector.broadcast %cst_33 : f32 to vector<8x256xf32>
      %59 = arith.mulf %58, %55 : vector<8x256xf32>
      %60 = arith.select %57, %55, %59 : vector<8x256xi1>, vector<8x256xf32>
      %61 = arith.truncf %60 : vector<8x256xf32> to vector<8x256xbf16>
      %c0_34 = arith.constant 0 : index
      %c0_35 = arith.constant 0 : index
      %62 = vector.load %arg8[%c0_34, %c0_35] : memref<256x512xbf16, #tpu.memory_space<vmem>>, vector<256x512xbf16>
      %cst_36 = arith.constant dense<0.000000e+00> : vector<8x512xf32>
      %63 = tpu.matmul %61, %62, %cst_36 {dimension_numbers = #tpu.dot_dimension_numbers<[1], [0], [0], [1], [0, 0, 1, 1], [], []>} : vector<8x256xbf16>, vector<256x512xbf16>, vector<8x512xf32> -> vector<8x512xf32>
      %c0_37 = arith.constant 0 : index
      %c0_38 = arith.constant 0 : index
      %64 = vector.load %arg9[%c0_37, %c0_38] : memref<1x512xf32, #tpu.memory_space<vmem>>, vector<1x512xf32>
      %65 = vector.broadcast %64 : vector<1x512xf32> to vector<8x512xf32>
      %66 = arith.addf %63, %65 : vector<8x512xf32>
      %cst_39 = arith.constant dense<0.000000e+00> : vector<512xf32>
      %67 = vector.multi_reduction <add>, %66, %cst_39 [0] : vector<8x512xf32> to vector<512xf32>
      %68 = vector.shape_cast %67 : vector<512xf32> to vector<1x512xf32>
      %cst_40 = arith.constant 8.000000e+00 : f32
      %69 = vector.broadcast %cst_40 : f32 to vector<1x512xf32>
      %70 = arith.divf %68, %69 : vector<1x512xf32>
      %71 = arith.mulf %66, %66 : vector<8x512xf32>
      %cst_41 = arith.constant dense<0.000000e+00> : vector<512xf32>
      %72 = vector.multi_reduction <add>, %71, %cst_41 [0] : vector<8x512xf32> to vector<512xf32>
      %73 = vector.shape_cast %72 : vector<512xf32> to vector<1x512xf32>
      %cst_42 = arith.constant 8.000000e+00 : f32
      %74 = vector.broadcast %cst_42 : f32 to vector<1x512xf32>
      %75 = arith.divf %73, %74 : vector<1x512xf32>
      %76 = arith.mulf %70, %70 : vector<1x512xf32>
      %77 = arith.subf %75, %76 : vector<1x512xf32>
      %cst_43 = arith.constant 0.000000e+00 : f32
      %78 = vector.broadcast %cst_43 : f32 to vector<1x512xf32>
      %79 = arith.maximumf %77, %78 : vector<1x512xf32>
      %80 = vector.broadcast %70 : vector<1x512xf32> to vector<8x512xf32>
      %81 = arith.subf %66, %80 : vector<8x512xf32>
      %cst_44 = arith.constant 8.000000e-01 : f32
      %82 = vector.broadcast %cst_44 : f32 to vector<1x512xf32>
      %83 = arith.addf %79, %82 : vector<1x512xf32>
      %84 = math.rsqrt %83 : vector<1x512xf32>
      %85 = vector.broadcast %84 : vector<1x512xf32> to vector<8x512xf32>
      %86 = arith.mulf %81, %85 : vector<8x512xf32>
      %c0_45 = arith.constant 0 : index
      %c0_46 = arith.constant 0 : index
      %87 = vector.load %arg10[%c0_45, %c0_46] : memref<1x512xf32, #tpu.memory_space<vmem>>, vector<1x512xf32>
      %88 = vector.broadcast %87 : vector<1x512xf32> to vector<8x512xf32>
      %89 = arith.mulf %88, %86 : vector<8x512xf32>
      %c0_47 = arith.constant 0 : index
      %c0_48 = arith.constant 0 : index
      %90 = vector.load %arg11[%c0_47, %c0_48] : memref<1x512xf32, #tpu.memory_space<vmem>>, vector<1x512xf32>
      %91 = vector.broadcast %90 : vector<1x512xf32> to vector<8x512xf32>
      %92 = arith.addf %89, %91 : vector<8x512xf32>
      %cst_49 = arith.constant 0.000000e+00 : f32
      %93 = vector.broadcast %cst_49 : f32 to vector<8x512xf32>
      %94 = arith.cmpf ogt, %92, %93 : vector<8x512xf32>
      %cst_50 = arith.constant 2.000000e-01 : f32
      %95 = vector.broadcast %cst_50 : f32 to vector<8x512xf32>
      %96 = arith.mulf %95, %92 : vector<8x512xf32>
      %97 = arith.select %94, %92, %96 : vector<8x512xi1>, vector<8x512xf32>
      %98 = arith.truncf %97 : vector<8x512xf32> to vector<8x512xbf16>
      %c0_51 = arith.constant 0 : index
      %c0_52 = arith.constant 0 : index
      %99 = vector.load %arg12[%c0_51, %c0_52] : memref<512x1024xbf16, #tpu.memory_space<vmem>>, vector<512x1024xbf16>
      %cst_53 = arith.constant dense<0.000000e+00> : vector<8x1024xf32>
      %100 = tpu.matmul %98, %99, %cst_53 {dimension_numbers = #tpu.dot_dimension_numbers<[1], [0], [0], [1], [0, 0, 1, 1], [], []>} : vector<8x512xbf16>, vector<512x1024xbf16>, vector<8x1024xf32> -> vector<8x1024xf32>
      %c0_54 = arith.constant 0 : index
      %c0_55 = arith.constant 0 : index
      %101 = vector.load %arg13[%c0_54, %c0_55] : memref<1x1024xf32, #tpu.memory_space<vmem>>, vector<1x1024xf32>
      %102 = vector.broadcast %101 : vector<1x1024xf32> to vector<8x1024xf32>
      %103 = arith.addf %100, %102 : vector<8x1024xf32>
      %cst_56 = arith.constant dense<0.000000e+00> : vector<1024xf32>
      %104 = vector.multi_reduction <add>, %103, %cst_56 [0] : vector<8x1024xf32> to vector<1024xf32>
      %105 = vector.shape_cast %104 : vector<1024xf32> to vector<1x1024xf32>
      %cst_57 = arith.constant 8.000000e+00 : f32
      %106 = vector.broadcast %cst_57 : f32 to vector<1x1024xf32>
      %107 = arith.divf %105, %106 : vector<1x1024xf32>
      %108 = arith.mulf %103, %103 : vector<8x1024xf32>
      %cst_58 = arith.constant dense<0.000000e+00> : vector<1024xf32>
      %109 = vector.multi_reduction <add>, %108, %cst_58 [0] : vector<8x1024xf32> to vector<1024xf32>
      %110 = vector.shape_cast %109 : vector<1024xf32> to vector<1x1024xf32>
      %cst_59 = arith.constant 8.000000e+00 : f32
      %111 = vector.broadcast %cst_59 : f32 to vector<1x1024xf32>
      %112 = arith.divf %110, %111 : vector<1x1024xf32>
      %113 = arith.mulf %107, %107 : vector<1x1024xf32>
      %114 = arith.subf %112, %113 : vector<1x1024xf32>
      %cst_60 = arith.constant 0.000000e+00 : f32
      %115 = vector.broadcast %cst_60 : f32 to vector<1x1024xf32>
      %116 = arith.maximumf %114, %115 : vector<1x1024xf32>
      %117 = vector.broadcast %107 : vector<1x1024xf32> to vector<8x1024xf32>
      %118 = arith.subf %103, %117 : vector<8x1024xf32>
      %cst_61 = arith.constant 8.000000e-01 : f32
      %119 = vector.broadcast %cst_61 : f32 to vector<1x1024xf32>
      %120 = arith.addf %116, %119 : vector<1x1024xf32>
      %121 = math.rsqrt %120 : vector<1x1024xf32>
      %122 = vector.broadcast %121 : vector<1x1024xf32> to vector<8x1024xf32>
      %123 = arith.mulf %118, %122 : vector<8x1024xf32>
      %c0_62 = arith.constant 0 : index
      %c0_63 = arith.constant 0 : index
      %124 = vector.load %arg14[%c0_62, %c0_63] : memref<1x1024xf32, #tpu.memory_space<vmem>>, vector<1x1024xf32>
      %125 = vector.broadcast %124 : vector<1x1024xf32> to vector<8x1024xf32>
      %126 = arith.mulf %125, %123 : vector<8x1024xf32>
      %c0_64 = arith.constant 0 : index
      %c0_65 = arith.constant 0 : index
      %127 = vector.load %arg15[%c0_64, %c0_65] : memref<1x1024xf32, #tpu.memory_space<vmem>>, vector<1x1024xf32>
      %128 = vector.broadcast %127 : vector<1x1024xf32> to vector<8x1024xf32>
      %129 = arith.addf %126, %128 : vector<8x1024xf32>
      %cst_66 = arith.constant 0.000000e+00 : f32
      %130 = vector.broadcast %cst_66 : f32 to vector<8x1024xf32>
      %131 = arith.cmpf ogt, %129, %130 : vector<8x1024xf32>
      %cst_67 = arith.constant 2.000000e-01 : f32
      %132 = vector.broadcast %cst_67 : f32 to vector<8x1024xf32>
      %133 = arith.mulf %132, %129 : vector<8x1024xf32>
      %134 = arith.select %131, %129, %133 : vector<8x1024xi1>, vector<8x1024xf32>
      %c0_68 = arith.constant 0 : index
      %c0_69 = arith.constant 0 : index
      %135 = vector.load %arg19[%c0_68, %c0_69] : memref<8x1024xf32, #tpu.memory_space<vmem>>, vector<8x1024xf32>
      tpu.vector_store %arg19[%c0_68, %c0_69], %134 {strides = array<i32>} : memref<8x1024xf32, #tpu.memory_space<vmem>>, vector<8x1024xf32>,
    } else {
    }
    %c0 = arith.constant 0 : index
    %c0_1 = arith.constant 0 : index
    %3 = vector.load %arg19[%c0, %c0_1] : memref<8x1024xf32, #tpu.memory_space<vmem>>, vector<8x1024xf32>
    %4 = arith.truncf %3 : vector<8x1024xf32> to vector<8x1024xbf16>
    %c0_2 = arith.constant 0 : index
    %c0_3 = arith.constant 0 : index
    %5 = vector.load %arg16[%c0_2, %c0_3] : memref<1024x256xbf16, #tpu.memory_space<vmem>>, vector<1024x256xbf16>
    %cst = arith.constant dense<0.000000e+00> : vector<8x256xf32>
    %6 = tpu.matmul %4, %5, %cst {dimension_numbers = #tpu.dot_dimension_numbers<[1], [0], [0], [1], [0, 0, 1, 1], [], []>} : vector<8x1024xbf16>, vector<1024x256xbf16>, vector<8x256xf32> -> vector<8x256xf32>
    %c0_4 = arith.constant 0 : index
    %c0_5 = arith.constant 0 : index
    %7 = vector.load %arg17[%c0_4, %c0_5] : memref<1x256xf32, #tpu.memory_space<vmem>>, vector<1x256xf32>
    %8 = vector.broadcast %7 : vector<1x256xf32> to vector<8x256xf32>
    %9 = arith.addf %6, %8 : vector<8x256xf32>
    %10 = math.tanh %9 : vector<8x256xf32>
    %c0_6 = arith.constant 0 : index
    %c0_7 = arith.constant 0 : index
    %11 = vector.load %arg18[%c0_6, %c0_7] : memref<8x256xf32, #tpu.memory_space<vmem>>, vector<8x256xf32>
    tpu.vector_store %arg18[%c0_6, %c0_7], %10 {strides = array<i32>} : memref<8x256xf32, #tpu.memory_space<vmem>>, vector<8x256xf32>,
    return
  }
  func.func @transform_0(%arg0: i32) -> (i32, i32) {
    %c0_i32 = arith.constant 0 : i32
    %c0_i32_0 = arith.constant 0 : i32
    %c0_i32_1 = arith.constant 0 : i32
    return %c0_i32, %c0_i32_0 : i32, i32
  }
  func.func @transform_1(%arg0: i32) -> (i32, i32) {
    %c0_i32 = arith.constant 0 : i32
    %c0_i32_0 = arith.constant 0 : i32
    %c0_i32_1 = arith.constant 0 : i32
    return %c0_i32, %c0_i32_0 : i32, i32
  }
  func.func @transform_2(%arg0: i32) -> (i32, i32) {
    %c0_i32 = arith.constant 0 : i32
    %c0_i32_0 = arith.constant 0 : i32
    %c0_i32_1 = arith.constant 0 : i32
    return %c0_i32, %c0_i32_0 : i32, i32
  }
  func.func @transform_3(%arg0: i32) -> (i32, i32) {
    %c0_i32 = arith.constant 0 : i32
    %c0_i32_0 = arith.constant 0 : i32
    %c0_i32_1 = arith.constant 0 : i32
    return %c0_i32, %c0_i32_0 : i32, i32
  }
  func.func @transform_4(%arg0: i32) -> (i32, i32) {
    %c0_i32 = arith.constant 0 : i32
    %c0_i32_0 = arith.constant 0 : i32
    %c0_i32_1 = arith.constant 0 : i32
    return %c0_i32, %c0_i32_0 : i32, i32
  }
  func.func @transform_5(%arg0: i32) -> (i32, i32) {
    %c0_i32 = arith.constant 0 : i32
    %c0_i32_0 = arith.constant 0 : i32
    %c0_i32_1 = arith.constant 0 : i32
    return %c0_i32, %c0_i32_0 : i32, i32
  }
  func.func @transform_6(%arg0: i32) -> (i32, i32) {
    %c0_i32 = arith.constant 0 : i32
    %c0_i32_0 = arith.constant 0 : i32
    %c0_i32_1 = arith.constant 0 : i32
    return %c0_i32, %c0_i32_0 : i32, i32
  }
  func.func @transform_7(%arg0: i32) -> (i32, i32) {
    %c0_i32 = arith.constant 0 : i32
    %c0_i32_0 = arith.constant 0 : i32
    %c0_i32_1 = arith.constant 0 : i32
    return %c0_i32, %c0_i32_0 : i32, i32
  }
  func.func @transform_8(%arg0: i32) -> (i32, i32) {
    %c0_i32 = arith.constant 0 : i32
    %c0_i32_0 = arith.constant 0 : i32
    %c0_i32_1 = arith.constant 0 : i32
    return %c0_i32, %c0_i32_0 : i32, i32
  }
  func.func @transform_9(%arg0: i32) -> (i32, i32) {
    %c0_i32 = arith.constant 0 : i32
    %c0_i32_0 = arith.constant 0 : i32
    %c0_i32_1 = arith.constant 0 : i32
    return %c0_i32, %c0_i32_0 : i32, i32
  }
  func.func @transform_10(%arg0: i32) -> (i32, i32) {
    %c0_i32 = arith.constant 0 : i32
    %c0_i32_0 = arith.constant 0 : i32
    %c0_i32_1 = arith.constant 0 : i32
    return %c0_i32, %c0_i32_0 : i32, i32
  }
  func.func @transform_11(%arg0: i32) -> (i32, i32) {
    %c0_i32 = arith.constant 0 : i32
    %c0_i32_0 = arith.constant 0 : i32
    %c0_i32_1 = arith.constant 0 : i32
    return %c0_i32, %c0_i32_0 : i32, i32
  }
  func.func @transform_12(%arg0: i32) -> (i32, i32) {
    %c0_i32 = arith.constant 0 : i32
    %c0_i32_0 = arith.constant 0 : i32
    %c0_i32_1 = arith.constant 0 : i32
    return %c0_i32, %c0_i32_0 : i32, i32
  }
  func.func @transform_13(%arg0: i32) -> (i32, i32) {
    %c0_i32 = arith.constant 0 : i32
    %c0_i32_0 = arith.constant 0 : i32
    %c0_i32_1 = arith.constant 0 : i32
    return %c0_i32, %c0_i32_0 : i32, i32
  }
  func.func @transform_14(%arg0: i32) -> (i32, i32) {
    %c0_i32 = arith.constant 0 : i32
    %c0_i32_0 = arith.constant 0 : i32
    %c0_i32_1 = arith.constant 0 : i32
    return %c0_i32, %c0_i32_0 : i32, i32
  }
  func.func @transform_15(%arg0: i32) -> (i32, i32) {
    %c0_i32 = arith.constant 0 : i32
    %c0_i32_0 = arith.constant 0 : i32
    return %c0_i32, %arg0 : i32, i32
  }
  func.func @transform_16(%arg0: i32) -> (i32, i32) {
    %c0_i32 = arith.constant 0 : i32
    %c0_i32_0 = arith.constant 0 : i32
    return %c0_i32, %arg0 : i32, i32
  }
  func.func @transform_17(%arg0: i32) -> (i32, i32) {
    %c0_i32 = arith.constant 0 : i32
    %c0_i32_0 = arith.constant 0 : i32
    return %c0_i32, %arg0 : i32, i32
  }
}

</mosaic_0001>

<bundles_post_ra>
// kernel: tpu_custom_call.1
= control target key start
LH: loop header
LB: loop body
LE: loop exit
PB: predicated region body
PF: predicated region fallthrough
CT: control target
= control target key end

     0   :  { %s5939_s0 = inlined_call_operand.hbm [shape: f32[8,32], index: 0, kind: input, shape index: {}]   ;;  %s5940_s1 = inlined_call_operand.hbm [shape: bf16[32,128], index: 1, kind: input, shape index: {}]   ;;  %s5941_s2 = inlined_call_operand.vmem [shape: f32[1,128], index: 2, kind: input, shape index: {}]   ;;  %s5942_s3 = inlined_call_operand.hbm [shape: bf16[128,256], index: 3, kind: input, shape index: {}]   ;;  %s5943_s4 = inlined_call_operand.hbm [shape: f32[1,256], index: 4, kind: input, shape index: {}]   ;;  %s5944_s5 = inlined_call_operand.hbm [shape: f32[1,256], index: 5, kind: input, shape index: {}]   ;;  %s5945_s6 = inlined_call_operand.hbm [shape: f32[1,256], index: 6, kind: input, shape index: {}]   ;;  %s5946_s7 = inlined_call_operand.hbm [shape: bf16[256,512], index: 7, kind: input, shape index: {}]   ;;  %s5947_s8 = inlined_call_operand.vmem [shape: f32[1,512], index: 8, kind: input, shape index: {}]   ;;  %s5948_s9 = inlined_call_operand.vmem [shape: f32[1,512], index: 9, kind: input, shape index: {}]   ;;  %s5949_s10 = inlined_call_operand.vmem [shape: f32[1,512], index: 10, kind: input, shape index: {}]   ;;  %s5950_s11 = inlined_call_operand.hbm [shape: bf16[512,1024], index: 11, kind: input, shape index: {}]   ;;  %s5951_s12 = inlined_call_operand.vmem [shape: f32[1,1024], index: 12, kind: input, shape index: {}]   ;;  %s5952_s13 = inlined_call_operand.vmem [shape: f32[1,1024], index: 13, kind: input, shape index: {}]   ;;  %s5953_s14 = inlined_call_operand.vmem [shape: f32[1,1024], index: 14, kind: input, shape index: {}]   ;;  %s5954_s15 = inlined_call_operand.hbm [shape: bf16[1024,256], index: 15, kind: input, shape index: {}]   ;;  %s5955_s16 = inlined_call_operand.vmem [shape: f32[1,256], index: 16, kind: input, shape index: {}]   ;;  %s5956_s17 = inlined_call_operand.hbm [shape: f32[8,256], index: 17, kind: output, shape index: {}]  }
   0x1   :  { %5960 = sst [smem:[#allocation25_spill]] %s5939_s0 }
   0x2   :  { %5961 = sst [smem:[#allocation26_spill]] %s5940_s1 }
   0x3   :  { %5962 = sst [smem:[#allocation27_spill]] %s5955_s16 }
   0x4   :  { %5963 = sst [smem:[#allocation28_spill]] %s5956_s17 }
   0x5   :  { %22 = vsyncpa [#allocation4], 0 }
   0x6   :  { %23 = vsyncpa [#allocation7], 0 }
   0x7   :  { %24 = vsyncpa [#allocation10], 0 }
   0x8   :  { %25 = vsyncpa [#allocation13], 0 }
   0x9   :  { %26 = vsyncpa [#allocation16], 0 }
   0xa   :  { %27 = vsyncpa [#allocation5], 0  ;;  %s5434_s24 = smov [#allocation6]   ;;  %s5964_s28 = sld [smem:[#allocation26_spill]] }
   0xb   :  { %s43_s25 = sshll.u32 %s5434_s24, 4  ;;  %s44_s25 = int_to_ptr.vmem [resolvable:$true] %s43_s25 }
  0x10   :  { %s5202_s29 = scalar_lea.hbm %s5964_s28, 256 }
  0x11   :  { %p5203_p0 = scmp.ne.s32.totalorder %s5964_s28, %s5202_s29  ;;  %p5206_p1 = scmp.lt.u32.totalorder %s5202_s29, %s5964_s28 }
  0x13   :  { %p5208_p2 = pnand %p5206_p1, %p5203_p0 }
  0x15   :  { %5211 = shalt.err (!%p5208_p2)
}
  0x16   :  { %s5212_s1 = scalar_lea.vmem %s44_s25, 256  ;;  %p5217_p4 = scmp.lt.s32.totalorder %s44_s25, %s44_s25 }
  0x17   :  { %p5213_p3 = scmp.ne.s32.totalorder %s44_s25, %s5212_s1  ;;  %p5218_p5 = scmp.lt.s32.totalorder %s5212_s1, %s5212_s1 }
  0x19   :  { %p5219_p6 = por %p5218_p5, %p5217_p4 }
  0x1b   :  { %p5220_p7 = pnand %p5219_p6, %p5213_p3 }
  0x1d   :  { %5223 = shalt.err (!%p5220_p7)
}
  0x1e   :  { %s5435_s20 = smov 64   ;;  %s5436_s21 = smov 4  }
  0x1f   :  { %49 = dma.hbm_to_vmem [thread:$0]  %s5964_s28, 256, %s44_s25, [#allocation7], %s5435_s20, %s5435_s20, %s5436_s21  }
  0x20   :  { %s5437_s24 = smov [#allocation9]   ;;  %s5438_s27 = smov [#allocation12]  }
  0x21   :  { %s70_s26 = sshll.u32 %s5437_s24, 4  ;;  %s90_s29 = sshll.u32 %s5438_s27, 4  ;;  %s71_s26 = int_to_ptr.vmem [resolvable:$true] %s70_s26  ;;  %s91_s29 = int_to_ptr.vmem [resolvable:$true] %s90_s29 }
  0x22   :  { %s5224_s18 = scalar_lea.hbm %s5943_s4, 32 }
  0x23   :  { %p5225_p8 = scmp.ne.s32.totalorder %s5943_s4, %s5224_s18  ;;  %p5228_p9 = scmp.lt.u32.totalorder %s5224_s18, %s5943_s4 }
  0x25   :  { %p5230_p10 = pnand %p5228_p9, %p5225_p8 }
  0x27   :  { %5233 = shalt.err (!%p5230_p10)
}
  0x28   :  { %s5234_s25 = scalar_lea.vmem %s71_s26, 32  ;;  %p5239_p12 = scmp.lt.s32.totalorder %s71_s26, %s71_s26 }
  0x29   :  { %p5235_p11 = scmp.ne.s32.totalorder %s71_s26, %s5234_s25  ;;  %p5240_p13 = scmp.lt.s32.totalorder %s5234_s25, %s5234_s25 }
  0x2b   :  { %p5241_p0 = por %p5240_p13, %p5239_p12 }
  0x2d   :  { %p5242_p1 = pnand %p5241_p0, %p5235_p11 }
  0x2f   :  { %5245 = shalt.err (!%p5242_p1)
}
  0x30   :  { %73 = dma.hbm_to_vmem [thread:$0]  %s5943_s4, 32, %s71_s26, [#allocation10]  }
  0x31   :  { %s5246_s23 = scalar_lea.hbm %s5945_s6, 32 }
  0x32   :  { %p5247_p2 = scmp.ne.s32.totalorder %s5945_s6, %s5246_s23  ;;  %p5250_p3 = scmp.lt.u32.totalorder %s5246_s23, %s5945_s6 }
  0x34   :  { %p5252_p4 = pnand %p5250_p3, %p5247_p2 }
  0x36   :  { %5255 = shalt.err (!%p5252_p4)
}
  0x37   :  { %s5256_s0 = scalar_lea.vmem %s91_s29, 32  ;;  %p5261_p6 = scmp.lt.s32.totalorder %s91_s29, %s91_s29 }
  0x38   :  { %p5257_p5 = scmp.ne.s32.totalorder %s91_s29, %s5256_s0  ;;  %p5262_p7 = scmp.lt.s32.totalorder %s5256_s0, %s5256_s0 }
  0x3a   :  { %p5263_p8 = por %p5262_p7, %p5261_p6 }
  0x3c   :  { %p5264_p9 = pnand %p5263_p8, %p5257_p5 }
  0x3e   :  { %5267 = shalt.err (!%p5264_p9)
}
  0x3f   :  { %93 = dma.hbm_to_vmem [thread:$0]  %s5945_s6, 32, %s91_s29, [#allocation13]  }
  0x40   :  { %s5439_s30 = smov [#allocation15]   ;;  %s5268_s25 = scalar_lea.hbm %s5950_s11, 32768 }
  0x41   :  { %s117_s18 = sshll.u32 %s5439_s30, 4  ;;  %p5269_p10 = scmp.ne.s32.totalorder %s5950_s11, %s5268_s25  ;;  %s118_s18 = int_to_ptr.vmem [resolvable:$true] %s117_s18 }
  0x42   :  { %p5272_p11 = scmp.lt.u32.totalorder %s5268_s25, %s5950_s11 }
  0x44   :  { %p5274_p12 = pnand %p5272_p11, %p5269_p10 }
  0x46   :  { %5277 = shalt.err (!%p5274_p12)
}
  0x47   :  { %s5278_s23 = scalar_lea.vmem %s118_s18, 32768  ;;  %p5283_p0 = scmp.lt.s32.totalorder %s118_s18, %s118_s18 }
  0x48   :  { %p5279_p13 = scmp.ne.s32.totalorder %s118_s18, %s5278_s23  ;;  %p5284_p1 = scmp.lt.s32.totalorder %s5278_s23, %s5278_s23 }
  0x4a   :  { %p5285_p2 = por %p5284_p1, %p5283_p0 }
  0x4c   :  { %p5286_p3 = pnand %p5285_p2, %p5279_p13 }
  0x4e   :  { %5289 = shalt.err (!%p5286_p3)
}
  0x4f   :  { %s5440_s6 = smov 512   ;;  %s5441_s29 = smov 32  }
  0x50   :  { %123 = dma.hbm_to_vmem [thread:$0]  %s5950_s11, 32768, %s118_s18, [#allocation16], %s5440_s6, %s5440_s6, %s5441_s29  }
  0x51   :  { %s5442_s24 = smov [#allocation3]   ;;  %s5443_s0 = smov [#allocation8]  }
  0x52   :  { %s34_s27 = sshll.u32 %s5442_s24, 4  ;;  %s57_s4 = sshll.u32 %s5443_s0, 4  ;;  %s35_s27 = int_to_ptr.vmem [resolvable:$true] %s34_s27  ;;  %s5593_s4 = int_to_ptr.vmem [resolvable:$true] %s57_s4 }
  0x53   :  { %s5965_s19 = sld [smem:[#allocation25_spill]] }
  0x59   :  { %s5290_s1 = scalar_lea.hbm %s5965_s19, 128 }
  0x5a   :  { %p5291_p4 = scmp.ne.s32.totalorder %s5965_s19, %s5290_s1  ;;  %p5294_p5 = scmp.lt.u32.totalorder %s5290_s1, %s5965_s19 }
  0x5c   :  { %p5296_p6 = pnand %p5294_p5, %p5291_p4 }
  0x5e   :  { %5299 = shalt.err (!%p5296_p6)
}
  0x5f   :  { %s5300_s11 = scalar_lea.vmem %s35_s27, 128  ;;  %p5305_p8 = scmp.lt.s32.totalorder %s35_s27, %s35_s27 }
  0x60   :  { %p5301_p7 = scmp.ne.s32.totalorder %s35_s27, %s5300_s11  ;;  %p5306_p9 = scmp.lt.s32.totalorder %s5300_s11, %s5300_s11 }
  0x62   :  { %p5307_p10 = por %p5306_p9, %p5305_p8 }
  0x64   :  { %p5308_p11 = pnand %p5307_p10, %p5301_p7 }
  0x66   :  { %5311 = shalt.err (!%p5308_p11)
}
  0x67   :  { %37 = dma.hbm_to_vmem [thread:$0]  %s5965_s19, 128, %s35_s27, [#allocation4]  }
  0x68   :  { %s5312_s29 = scalar_lea.hbm %s5942_s3, 2048 }
  0x69   :  { %p5313_p12 = scmp.ne.s32.totalorder %s5942_s3, %s5312_s29  ;;  %p5316_p13 = scmp.lt.u32.totalorder %s5312_s29, %s5942_s3 }
  0x6b   :  { %p5318_p0 = pnand %p5316_p13, %p5313_p12 }
  0x6d   :  { %5321 = shalt.err (!%p5318_p0)
}
  0x6e   :  { %s5322_s26 = scalar_lea.vmem %s5593_s4, 2048  ;;  %p5327_p2 = scmp.lt.s32.totalorder %s5593_s4, %s5593_s4 }
  0x6f   :  { %p5323_p1 = scmp.ne.s32.totalorder %s5593_s4, %s5322_s26  ;;  %p5328_p3 = scmp.lt.s32.totalorder %s5322_s26, %s5322_s26 }
  0x71   :  { %p5329_p4 = por %p5328_p3, %p5327_p2 }
  0x73   :  { %p5330_p5 = pnand %p5329_p4, %p5323_p1 }
  0x75   :  { %5333 = shalt.err (!%p5330_p5)
}
  0x76   :  { %s5444_s27 = smov 128   ;;  %s5445_s30 = smov 8  }
  0x77   :  { %63 = dma.hbm_to_vmem [thread:$0]  %s5942_s3, 2048, %s5593_s4, [#allocation7], %s5444_s27, %s5444_s27, %s5445_s30  }
  0x78   :  { %s5446_s25 = smov [#allocation11]   ;;  %s5447_s20 = smov [#allocation14]  }
  0x79   :  { %s80_s28 = sshll.u32 %s5446_s25, 4  ;;  %s99_s21 = sshll.u32 %s5447_s20, 4  ;;  %s81_s28 = int_to_ptr.vmem [resolvable:$true] %s80_s28  ;;  %s5627_s21 = int_to_ptr.vmem [resolvable:$true] %s99_s21 }
  0x7a   :  { %s5334_s22 = scalar_lea.hbm %s5944_s5, 32 }
  0x7b   :  { %p5335_p6 = scmp.ne.s32.totalorder %s5944_s5, %s5334_s22  ;;  %p5338_p7 = scmp.lt.u32.totalorder %s5334_s22, %s5944_s5 }
  0x7d   :  { %p5340_p8 = pnand %p5338_p7, %p5335_p6 }
  0x7f   :  { %5343 = shalt.err (!%p5340_p8)
}
  0x80   :  { %s5344_s3 = scalar_lea.vmem %s81_s28, 32  ;;  %p5349_p10 = scmp.lt.s32.totalorder %s81_s28, %s81_s28 }
  0x81   :  { %p5345_p9 = scmp.ne.s32.totalorder %s81_s28, %s5344_s3  ;;  %p5350_p11 = scmp.lt.s32.totalorder %s5344_s3, %s5344_s3 }
  0x83   :  { %p5351_p12 = por %p5350_p11, %p5349_p10 }
  0x85   :  { %p5352_p13 = pnand %p5351_p12, %p5345_p9 }
  0x87   :  { %5355 = shalt.err (!%p5352_p13)
}
  0x88   :  { %83 = dma.hbm_to_vmem [thread:$0]  %s5944_s5, 32, %s81_s28, [#allocation10]  }
  0x89   :  { %s5356_s26 = scalar_lea.hbm %s5946_s7, 8192 }
  0x8a   :  { %p5357_p0 = scmp.ne.s32.totalorder %s5946_s7, %s5356_s26  ;;  %p5360_p1 = scmp.lt.u32.totalorder %s5356_s26, %s5946_s7 }
  0x8c   :  { %p5362_p2 = pnand %p5360_p1, %p5357_p0 }
  0x8e   :  { %5365 = shalt.err (!%p5362_p2)
}
  0x8f   :  { %s5366_s11 = scalar_lea.vmem %s5627_s21, 8192  ;;  %p5371_p4 = scmp.lt.s32.totalorder %s5627_s21, %s5627_s21 }
  0x90   :  { %p5367_p3 = scmp.ne.s32.totalorder %s5627_s21, %s5366_s11  ;;  %p5372_p5 = scmp.lt.s32.totalorder %s5366_s11, %s5366_s11 }
  0x92   :  { %p5373_p6 = por %p5372_p5, %p5371_p4 }
  0x94   :  { %p5374_p7 = pnand %p5373_p6, %p5367_p3 }
  0x96   :  { %5377 = shalt.err (!%p5374_p7)
}
  0x97   :  { %s5448_s5 = smov 256   ;;  %s5449_s28 = smov 16  }
  0x98   :  { %105 = dma.hbm_to_vmem [thread:$0]  %s5946_s7, 8192, %s5627_s21, [#allocation13], %s5448_s5, %s5448_s5, %s5449_s28  }
  0x99   :  { %s5450_s23 = smov [#allocation17]   ;;  %s5378_s3 = scalar_lea.hbm %s5954_s15, 16384 }
  0x9a   :  { %s135_s6 = sshll.u32 %s5450_s23, 4  ;;  %p5379_p8 = scmp.ne.s32.totalorder %s5954_s15, %s5378_s3  ;;  %s136_s6 = int_to_ptr.vmem [resolvable:$true] %s135_s6 }
  0x9b   :  { %p5382_p9 = scmp.lt.u32.totalorder %s5378_s3, %s5954_s15 }
  0x9d   :  { %p5384_p10 = pnand %p5382_p9, %p5379_p8 }
  0x9f   :  { %5387 = shalt.err (!%p5384_p10)
}
  0xa0   :  { %s5388_s26 = scalar_lea.vmem %s136_s6, 16384  ;;  %p5393_p12 = scmp.lt.s32.totalorder %s136_s6, %s136_s6 }
  0xa1   :  { %p5389_p11 = scmp.ne.s32.totalorder %s136_s6, %s5388_s26  ;;  %p5394_p13 = scmp.lt.s32.totalorder %s5388_s26, %s5388_s26 }
  0xa3   :  { %p5395_p0 = por %p5394_p13, %p5393_p12 }
  0xa5   :  { %p5396_p1 = pnand %p5395_p0, %p5389_p11 }
  0xa7   :  { %5399 = shalt.err (!%p5396_p1)
}
  0xa8   :  { %141 = dma.hbm_to_vmem [thread:$0]  %s5954_s15, 16384, %s136_s6, [#allocation16], %s5444_s27, %s5444_s27, %s5445_s30  }
  0xa9   :  { %5422 = dma.done.wait [#allocation4], 128  }
  0xaa   :  { %5423 = vsyncadd [#allocation4], 4294967168 }
  0xab   :  { %5424 = dma.done.wait [#allocation7], 2304  }
  0xac   :  { %5425 = vsyncadd [#allocation7], 4294964992 }
  0xad   :  { %5426 = dma.done.wait [#allocation10], 64  }
  0xae   :  { %5427 = vsyncadd [#allocation10], 4294967232 }
  0xaf   :  { %5428 = dma.done.wait [#allocation13], 8224  }
  0xb0   :  { %5429 = vsyncadd [#allocation13], 4294959072 }
  0xb1   :  { %5430 = dma.done.wait [#allocation16], 49152  }
  0xb2   :  { %5431 = vsyncadd [#allocation16], 4294918144  ;;  %v5451_v0 = vmov 0.0   ;;  %vm5452_vm0 = vmmov 0   ;;  %v4856_v1 = vld [vmem:[#allocation6] sm:$0xff]   ;;  %v4857_v2 = vld [vmem:[#allocation6 + $0x8] sm:$0xff]  }
  0xb3   :  { %4791 = vmatprep.subr.bf16.mxu0 %v5451_v0  ;;  %4795 = vmatprep.mubr.msk.bf16.mxu0 %vm5452_vm0, %v5451_v0  ;;  %v176_v3 = vld [vmem:[#allocation3] sm:$0xff]  ;;  %v4861_v6 = vld [vmem:[#allocation8 + $0x14] ss:$8 sps:$4 sm:$0xff]   ;;  %vm201_vm1 = vcmask 261120   ;;  %v4863_v8 = vld [vmem:[#allocation8 + $0x10] ss:$8 sps:$4 sm:$0xff]  }
  0xb4   :  { %4792 = vmatpush3.bf16.msra.mxu0 %v4856_v1  ;;  %v4858_v4 = vld [vmem:[#allocation8 + $0x4] ss:$8 sps:$4 sm:$0xff]   ;;  %v4860_v5 = vld [vmem:[#allocation8] ss:$8 sps:$4 sm:$0xff]   ;;  %v177_v7 = vpack.c.bf16 %v176_v3, %v176_v3  ;;  %v4867_v11 = vld [vmem:[#allocation8 + $0x34] ss:$8 sps:$4 sm:$0xff]  }
  0xb5   :  { %4793 = vmatprep.subr.bf16.mxu0 %v5451_v0  ;;  %357 = vmatprep.subr.bf16.mxu1 %v4858_v4  ;;  %v4864_v9 = vld [vmem:[#allocation8 + $0x24] ss:$8 sps:$4 sm:$0xff]   ;;  %v4866_v10 = vld [vmem:[#allocation8 + $0x20] ss:$8 sps:$4 sm:$0xff]   ;;  %v4869_v12 = vld [vmem:[#allocation8 + $0x30] ss:$8 sps:$4 sm:$0xff]   ;;  %v267_v0 = vlaneseq }
  0xb6   :  { %358 = vmatpush1.bf16.msra.mxu1 %v4860_v5  ;;  %v4870_v13 = vld [vmem:[#allocation8 + $0x44] ss:$8 sps:$4 sm:$0xff]   ;;  %v4872_v14 = vld [vmem:[#allocation8 + $0x40] ss:$8 sps:$4 sm:$0xff]   ;;  %v4873_v15 = vld [vmem:[#allocation8 + $0x54] ss:$8 sps:$4 sm:$0xff]  }
  0xb7   :  { %359 = vmatprep.subr.bf16.mxu1 %v4861_v6  ;;  %v4875_v16 = vld [vmem:[#allocation8 + $0x50] ss:$8 sps:$4 sm:$0xff]   ;;  %v4876_v17 = vld [vmem:[#allocation8 + $0x64] ss:$8 sps:$4 sm:$0xff]   ;;  %v4878_v18 = vld [vmem:[#allocation8 + $0x60] ss:$8 sps:$4 sm:$0xff]  }
  0xb8   :  { %4794 = vmatpush3.bf16.msra.mxu0 %v4857_v2  ;;  %v4879_v19 = vld [vmem:[#allocation8 + $0x74] ss:$8 sps:$4 sm:$0xff]   ;;  %v4881_v20 = vld [vmem:[#allocation8 + $0x70] ss:$8 sps:$4 sm:$0xff]   ;;  %v5453_v21 = vmov 0   ;;  %v5676_v1 = vshrl.u32 %v267_v0, 7 }
  0xb9   :  { %389 = vmatprep.mubr.bf16.mxu1 %v5453_v21  ;;  %v4884_v22 = vld [vmem:[#allocation14 + $0x4] ss:$16 sps:$4 sm:$0xff]   ;;  %v4320_v23 = vld [vmem:[%s5941_s2] ss:$0 sm:$0xff]  ;;  %v4932_v63 = vld [vmem:[#allocation14 + $0xc] ss:$16 sps:$4 sm:$0xff]  }
  0xba   :  { %360 = vmatpush1.bf16.msra.mxu1 %v4863_v8  ;;  %v4882_v31 = vld [vmem:[#allocation14] ss:$16 sps:$4 sm:$0xff]   ;;  %v4887_v33 = vld [vmem:[#allocation14 + $0x24] ss:$16 sps:$4 sm:$0xff]   ;;  %v5679_v2 = vsub.s32 0, %v5676_v1  ;;  %v5682_v4 = vsub.s32 1, %v5676_v1 }
  0xbb   :  { %4796 = vmatmul.mubr.msk.bf16.vlgmr.msra.gmra.mrb[0].mxu0 %vm201_vm1, %v177_v7  ;;  %361 = vmatprep.subr.bf16.mxu1 %v4864_v9  ;;  %v4885_v34 = vld [vmem:[#allocation14 + $0x20] ss:$16 sps:$4 sm:$0xff]   ;;  %v4890_v35 = vld [vmem:[#allocation14 + $0x44] ss:$16 sps:$4 sm:$0xff]   ;;  %v265_v3 = vld [vmem:[#allocation9] sm:$0x3] }
  0xbc   :  { %v4888_v36 = vld [vmem:[#allocation14 + $0x40] ss:$16 sps:$4 sm:$0xff]   ;;  %v4893_v37 = vld [vmem:[#allocation14 + $0x64] ss:$16 sps:$4 sm:$0xff]   ;;  %v270_v5 = vrot.slane %v265_v3, %v5679_v2  ;;  %v274_v6 = vrot.slane %v265_v3, %v5682_v4  ;;  %s5966_s28 = sld [smem:[#allocation27_spill]]  ;;  %s5454_s18 = smov [#allocation18]  }
  0xbd   :  { %v4891_v38 = vld [vmem:[#allocation14 + $0x60] ss:$16 sps:$4 sm:$0xff]   ;;  %v4896_v39 = vld [vmem:[#allocation14 + $0x84] ss:$16 sps:$4 sm:$0xff]   ;;  %s4307_s22 = sshll.u32 %s5454_s18, 4  ;;  %s4308_s22 = int_to_ptr.vmem [resolvable:$true] %s4307_s22 }
  0xbe   :  { %362 = vmatpush1.bf16.msra.mxu1 %v4866_v10  ;;  %v4894_v40 = vld [vmem:[#allocation14 + $0x80] ss:$16 sps:$4 sm:$0xff]   ;;  %v4899_v41 = vld [vmem:[#allocation14 + $0xa4] ss:$16 sps:$4 sm:$0xff]   ;;  %s5400_s23 = scalar_lea.vmem %s4308_s22, 256  ;;  %p5405_p3 = scmp.lt.s32.totalorder %s4308_s22, %s4308_s22 }
  0xbf   :  { %363 = vmatprep.subr.bf16.mxu1 %v4867_v11  ;;  %v4897_v42 = vld [vmem:[#allocation14 + $0xa0] ss:$16 sps:$4 sm:$0xff]   ;;  %v4902_v43 = vld [vmem:[#allocation14 + $0xc4] ss:$16 sps:$4 sm:$0xff]   ;;  %p5401_p2 = scmp.ne.s32.totalorder %s4308_s22, %s5400_s23  ;;  %p5406_p4 = scmp.lt.s32.totalorder %s5400_s23, %s5400_s23 }
  0xc0   :  { %v4900_v44 = vld [vmem:[#allocation14 + $0xc0] ss:$16 sps:$4 sm:$0xff]   ;;  %v4905_v45 = vld [vmem:[#allocation14 + $0xe4] ss:$16 sps:$4 sm:$0xff]  }
  0xc1   :  { %v4903_v46 = vld [vmem:[#allocation14 + $0xe0] ss:$16 sps:$4 sm:$0xff]   ;;  %v4908_v47 = vld [vmem:[#allocation14 + $0x104] ss:$16 sps:$4 sm:$0xff]   ;;  %p5407_p5 = por %p5406_p4, %p5405_p3 }
  0xc2   :  { %364 = vmatpush1.bf16.msra.mxu1 %v4869_v12  ;;  %v4906_v48 = vld [vmem:[#allocation14 + $0x100] ss:$16 sps:$4 sm:$0xff]   ;;  %v4911_v49 = vld [vmem:[#allocation14 + $0x124] ss:$16 sps:$4 sm:$0xff]  }
  0xc3   :  { %365 = vmatprep.subr.bf16.mxu1 %v4870_v13  ;;  %v4909_v50 = vld [vmem:[#allocation14 + $0x120] ss:$16 sps:$4 sm:$0xff]   ;;  %v4914_v51 = vld [vmem:[#allocation14 + $0x144] ss:$16 sps:$4 sm:$0xff]   ;;  %p5408_p6 = pnand %p5407_p5, %p5401_p2 }
  0xc4   :  { %v4912_v52 = vld [vmem:[#allocation14 + $0x140] ss:$16 sps:$4 sm:$0xff]   ;;  %v4917_v53 = vld [vmem:[#allocation14 + $0x164] ss:$16 sps:$4 sm:$0xff]  }
  0xc5   :  { %v4915_v54 = vld [vmem:[#allocation14 + $0x160] ss:$16 sps:$4 sm:$0xff]   ;;  %v4920_v55 = vld [vmem:[#allocation14 + $0x184] ss:$16 sps:$4 sm:$0xff]  }
  0xc6   :  { %366 = vmatpush1.bf16.msra.mxu1 %v4872_v14  ;;  %v4918_v56 = vld [vmem:[#allocation14 + $0x180] ss:$16 sps:$4 sm:$0xff]   ;;  %v4923_v57 = vld [vmem:[#allocation14 + $0x1a4] ss:$16 sps:$4 sm:$0xff]  }
  0xc7   :  { %367 = vmatprep.subr.bf16.mxu1 %v4873_v15  ;;  %v4921_v58 = vld [vmem:[#allocation14 + $0x1a0] ss:$16 sps:$4 sm:$0xff]   ;;  %v4926_v60 = vld [vmem:[#allocation14 + $0x1c4] ss:$16 sps:$4 sm:$0xff]  }
  0xc8   :  { %v4924_v59 = vld [vmem:[#allocation14 + $0x1c0] ss:$16 sps:$4 sm:$0xff]   ;;  %v4929_v61 = vld [vmem:[#allocation14 + $0x1e4] ss:$16 sps:$4 sm:$0xff]  }
  0xc9   :  { %v4927_v62 = vld [vmem:[#allocation14 + $0x1e0] ss:$16 sps:$4 sm:$0xff]  }
  0xca   :  { %368 = vmatpush1.bf16.msra.mxu1 %v4875_v16 }
  0xcb   :  { %369 = vmatprep.subr.bf16.mxu1 %v4876_v17 }
  0xce   :  { %370 = vmatpush1.bf16.msra.mxu1 %v4878_v18 }
  0xcf   :  { %371 = vmatprep.subr.bf16.mxu1 %v4879_v19 }
  0xd2   :  { %372 = vmatpush1.bf16.msra.mxu1 %v4881_v20 }
  0xd3   :  { %885 = vmatprep.subr.bf16.mxu1 %v4884_v22 }
 0x18e   :  { %v239_v24 = vpop.f32.mrb[0].mxu0 }
 0x18f   :  { %v240_v25 = vadd.f32 %v4320_v23, %v239_v24  ;;  %v4797_v26 = vpop.f32.mrb[1].mxu0 }
 0x190   :  { %v242_v27 = vpop.f32.mrb[2].mxu0 }
 0x191   :  { %vm245_vm2 = vcmp.gt.f32.partialorder %v240_v25, 0.0  ;;  %v246_v28 = vmul.f32 0.2, %v240_v25  ;;  %v4798_v29 = vpop.f32.mrb[3].mxu0 }
 0x193   :  { %v247_v30 = vsel %vm245_vm2, %v240_v25, %v246_v28 }
 0x194   :  { %v248_v32 = vpack.c.bf16 %v247_v30, %v247_v30 }
 0x196   :  { %390 = vmatmul.mubr.bf16.vlgmr.msra.gmra.mrb[0].mxu1 %v248_v32 }
 0x197   :  { %886 = vmatpush1.bf16.msra.mxu1 %v4882_v31 }
 0x198   :  { %887 = vmatprep.subr.bf16.mxu1 %v4887_v33 }
 0x19b   :  { %888 = vmatpush1.bf16.msra.mxu1 %v4885_v34 }
 0x19c   :  { %889 = vmatprep.subr.bf16.mxu1 %v4890_v35 }
 0x19f   :  { %890 = vmatpush1.bf16.msra.mxu1 %v4888_v36 }
 0x1a0   :  { %891 = vmatprep.subr.bf16.mxu1 %v4893_v37 }
 0x1a3   :  { %892 = vmatpush1.bf16.msra.mxu1 %v4891_v38 }
 0x1a4   :  { %893 = vmatprep.subr.bf16.mxu1 %v4896_v39 }
 0x1a7   :  { %894 = vmatpush1.bf16.msra.mxu1 %v4894_v40 }
 0x1a8   :  { %895 = vmatprep.subr.bf16.mxu1 %v4899_v41 }
 0x1ab   :  { %896 = vmatpush1.bf16.msra.mxu1 %v4897_v42 }
 0x1ac   :  { %897 = vmatprep.subr.bf16.mxu1 %v4902_v43 }
 0x1af   :  { %898 = vmatpush1.bf16.msra.mxu1 %v4900_v44 }
 0x1b0   :  { %899 = vmatprep.subr.bf16.mxu1 %v4905_v45 }
 0x1b3   :  { %900 = vmatpush1.bf16.msra.mxu1 %v4903_v46 }
 0x1b4   :  { %901 = vmatprep.subr.bf16.mxu1 %v4908_v47 }
 0x1b7   :  { %902 = vmatpush1.bf16.msra.mxu1 %v4906_v48 }
 0x1b8   :  { %903 = vmatprep.subr.bf16.mxu1 %v4911_v49 }
 0x1bb   :  { %904 = vmatpush1.bf16.msra.mxu1 %v4909_v50 }
 0x1bc   :  { %905 = vmatprep.subr.bf16.mxu1 %v4914_v51  ;;  %v443_v51 = vld [vmem:[#allocation11] sm:$0x3] }
 0x1bf   :  { %906 = vmatpush1.bf16.msra.mxu1 %v4912_v52  ;;  %v457_v52 = vld [vmem:[#allocation12] sm:$0x3] }
 0x1c0   :  { %907 = vmatprep.subr.bf16.mxu1 %v4917_v53 }
 0x1c3   :  { %908 = vmatpush1.bf16.msra.mxu1 %v4915_v54  ;;  %v448_v54 = vrot.slane %v443_v51, %v5679_v2 }
 0x1c4   :  { %909 = vmatprep.subr.bf16.mxu1 %v4920_v55 }
 0x1c7   :  { %910 = vmatpush1.bf16.msra.mxu1 %v4918_v56 }
 0x1c8   :  { %911 = vmatprep.subr.bf16.mxu1 %v4923_v57  ;;  %v452_v57 = vrot.slane %v443_v51, %v5682_v4  ;;  %v1143_v51 = vld [vmem:[#allocation15 + $0xa0] sm:$0xff] }
 0x1cb   :  { %912 = vmatpush1.bf16.msra.mxu1 %v4921_v58 }
 0x1cc   :  { %913 = vmatprep.subr.bf16.mxu1 %v4926_v60  ;;  %v462_v60 = vrot.slane %v457_v52, %v5679_v2 }
 0x1cf   :  { %914 = vmatpush1.bf16.msra.mxu1 %v4924_v59 }
 0x1d0   :  { %915 = vmatprep.subr.bf16.mxu1 %v4929_v61 }
 0x1d3   :  { %916 = vmatpush1.bf16.msra.mxu1 %v4927_v62  ;;  %v466_v62 = vrot.slane %v457_v52, %v5682_v4 }
 0x1d4   :  { %926 = vmatprep.subr.bf16.mxu1 %v4932_v63 }
 0x269   :  { %v391_v7 = vpop.f32.mrb[0].mxu1 }
 0x26a   :  { %v392_v8 = vadd.f32 %v391_v7, %v270_v5  ;;  %v393_v9 = vpop.f32.mrb[1].mxu1 }
 0x26b   :  { %v394_v10 = vadd.f32 %v393_v9, %v274_v6  ;;  %v395_v11 = vpop.f32.mrb[2].mxu1 }
 0x26c   :  { %v398_v12 = vrot.slane %v392_v8, 4  ;;  %v413_v13 = vmul.f32 %v392_v8, %v392_v8  ;;  %v396_v14 = vpop.f32.mrb[3].mxu1  ;;  %v4930_v11 = vld [vmem:[#allocation14 + $0x8] ss:$16 sps:$4 sm:$0xff]  }
 0x26d   :  { %v404_v15 = vrot.slane %v394_v10, 4  ;;  %v414_v16 = vmul.f32 %v394_v10, %v394_v10  ;;  %v4933_v14 = vld [vmem:[#allocation14 + $0x28] ss:$16 sps:$4 sm:$0xff]  }
 0x26e   :  { %v399_v17 = vadd.f32 %v398_v12, %v392_v8  ;;  %v415_v18 = vrot.slane %v413_v13, 4 }
 0x26f   :  { %v405_v19 = vadd.f32 %v404_v15, %v394_v10  ;;  %v421_v20 = vrot.slane %v414_v16, 4  ;;  %v4938_v15 = vld [vmem:[#allocation14 + $0x4c] ss:$16 sps:$4 sm:$0xff]  }
 0x270   :  { %v400_v21 = vrot.slane %v399_v17, 2  ;;  %v416_v22 = vadd.f32 %v415_v18, %v413_v13  ;;  %v4935_v13 = vld [vmem:[#allocation14 + $0x2c] ss:$16 sps:$4 sm:$0xff]   ;;  %v4939_v18 = vld [vmem:[#allocation14 + $0x68] ss:$16 sps:$4 sm:$0xff]  }
 0x271   :  { %v406_v23 = vrot.slane %v405_v19, 2  ;;  %v422_v24 = vadd.f32 %v421_v20, %v414_v16  ;;  %v4936_v16 = vld [vmem:[#allocation14 + $0x48] ss:$16 sps:$4 sm:$0xff]  }
 0x272   :  { %v401_v25 = vadd.f32 %v400_v21, %v399_v17  ;;  %v417_v26 = vrot.slane %v416_v22, 2  ;;  %v4941_v17 = vld [vmem:[#allocation14 + $0x6c] ss:$16 sps:$4 sm:$0xff]   ;;  %v4942_v20 = vld [vmem:[#allocation14 + $0x88] ss:$16 sps:$4 sm:$0xff]  }
 0x273   :  { %v407_v27 = vadd.f32 %v406_v23, %v405_v19  ;;  %v423_v28 = vrot.slane %v422_v24, 2  ;;  %v4944_v19 = vld [vmem:[#allocation14 + $0x8c] ss:$16 sps:$4 sm:$0xff]  }
 0x274   :  { %v402_v29 = vrot.slane %v401_v25, 1  ;;  %v418_v30 = vadd.f32 %v417_v26, %v416_v22  ;;  %v4947_v21 = vld [vmem:[#allocation14 + $0xac] ss:$16 sps:$4 sm:$0xff]   ;;  %v4945_v22 = vld [vmem:[#allocation14 + $0xa8] ss:$16 sps:$4 sm:$0xff]  }
 0x275   :  { %v408_v31 = vrot.slane %v407_v27, 1  ;;  %v424_v32 = vadd.f32 %v423_v28, %v422_v24  ;;  %v4950_v23 = vld [vmem:[#allocation14 + $0xcc] ss:$16 sps:$4 sm:$0xff]   ;;  %v4948_v24 = vld [vmem:[#allocation14 + $0xc8] ss:$16 sps:$4 sm:$0xff]  }
 0x276   :  { %v403_v33 = vadd.f32 %v402_v29, %v401_v25  ;;  %v419_v34 = vrot.slane %v418_v30, 1  ;;  %v4953_v25 = vld [vmem:[#allocation14 + $0xec] ss:$16 sps:$4 sm:$0xff]   ;;  %v4951_v26 = vld [vmem:[#allocation14 + $0xe8] ss:$16 sps:$4 sm:$0xff]  }
 0x277   :  { %v409_v35 = vadd.f32 %v408_v31, %v407_v27  ;;  %v425_v36 = vrot.slane %v424_v32, 1  ;;  %v4956_v27 = vld [vmem:[#allocation14 + $0x10c] ss:$16 sps:$4 sm:$0xff]   ;;  %v4954_v28 = vld [vmem:[#allocation14 + $0x108] ss:$16 sps:$4 sm:$0xff]  }
 0x278   :  { %v411_v37 = vmul.f32 0.125, %v403_v33  ;;  %v420_v38 = vadd.f32 %v419_v34, %v418_v30  ;;  %v4959_v29 = vld [vmem:[#allocation14 + $0x12c] ss:$16 sps:$4 sm:$0xff]   ;;  %v4957_v30 = vld [vmem:[#allocation14 + $0x128] ss:$16 sps:$4 sm:$0xff]  }
 0x279   :  { %v412_v39 = vmul.f32 0.125, %v409_v35  ;;  %v426_v40 = vadd.f32 %v425_v36, %v424_v32  ;;  %v4962_v31 = vld [vmem:[#allocation14 + $0x14c] ss:$16 sps:$4 sm:$0xff]   ;;  %v4960_v32 = vld [vmem:[#allocation14 + $0x148] ss:$16 sps:$4 sm:$0xff]  }
 0x27a   :  { %v427_v41 = vmul.f32 0.125, %v420_v38  ;;  %v429_v42 = vmul.f32 %v411_v37, %v411_v37  ;;  %v435_v53 = vsub.f32 %v392_v8, %v411_v37  ;;  %v4965_v33 = vld [vmem:[#allocation14 + $0x16c] ss:$16 sps:$4 sm:$0xff]   ;;  %v4963_v34 = vld [vmem:[#allocation14 + $0x168] ss:$16 sps:$4 sm:$0xff]  }
 0x27b   :  { %v428_v43 = vmul.f32 0.125, %v426_v40  ;;  %v430_v44 = vmul.f32 %v412_v39, %v412_v39  ;;  %v436_v56 = vsub.f32 %v394_v10, %v412_v39  ;;  %v4968_v35 = vld [vmem:[#allocation14 + $0x18c] ss:$16 sps:$4 sm:$0xff]   ;;  %v4966_v36 = vld [vmem:[#allocation14 + $0x188] ss:$16 sps:$4 sm:$0xff]  }
 0x27c   :  { %v431_v45 = vsub.f32 %v427_v41, %v429_v42  ;;  %v4971_v37 = vld [vmem:[#allocation14 + $0x1ac] ss:$16 sps:$4 sm:$0xff]   ;;  %v4969_v38 = vld [vmem:[#allocation14 + $0x1a8] ss:$16 sps:$4 sm:$0xff]   ;;  %v1123_v42 = vld [vmem:[#allocation15] sm:$0xff] }
 0x27d   :  { %v432_v46 = vsub.f32 %v428_v43, %v430_v44  ;;  %v4974_v39 = vld [vmem:[#allocation14 + $0x1cc] ss:$16 sps:$4 sm:$0xff]   ;;  %v4972_v40 = vld [vmem:[#allocation14 + $0x1c8] ss:$16 sps:$4 sm:$0xff]   ;;  %v1127_v43 = vld [vmem:[#allocation15 + $0x20] sm:$0xff] }
 0x27e   :  { %v433_v47 = vmax.f32 %v431_v45, 0.0  ;;  %v4977_v41 = vld [vmem:[#allocation14 + $0x1ec] ss:$16 sps:$4 sm:$0xff]   ;;  %v4975_v44 = vld [vmem:[#allocation14 + $0x1e8] ss:$16 sps:$4 sm:$0xff]   ;;  %v4405_v45 = vcombine.high %v1123_v42, %v1127_v43 }
 0x27f   :  { %v434_v48 = vmax.f32 %v432_v46, 0.0  ;;  %v1131_v46 = vld [vmem:[#allocation15 + $0x40] sm:$0xff] }
 0x280   :  { %v437_v49 = vadd.f32 0.8, %v433_v47  ;;  %v1135_v47 = vld [vmem:[#allocation15 + $0x60] sm:$0xff] }
 0x281   :  { %v438_v50 = vadd.f32 0.8, %v434_v48  ;;  %v4404_v48 = vcombine.low %v1123_v42, %v1127_v43  ;;  %v4412_v52 = vcombine.low %v1131_v46, %v1135_v47  ;;  %v1243_v42 = vld [vmem:[#allocation15 + $0x3c0] sm:$0xff] }
 0x282   :  { %5170 = vrsqrt.f32 %v437_v49  ;;  %v4413_v49 = vcombine.high %v1131_v46, %v1135_v47  ;;  %v1247_v43 = vld [vmem:[#allocation15 + $0x3e0] sm:$0xff] }
 0x283   :  { %5172 = vrsqrt.f32 %v438_v50  ;;  %v1139_v50 = vld [vmem:[#allocation15 + $0x80] sm:$0xff] }
 0x284   :  { %v1255_v46 = vld [vmem:[#allocation15 + $0x420] sm:$0xff] }
 0x28c   :  { %v5171_v55 = vpop.eup %5170 }
 0x28d   :  { %v5173_v58 = vpop.eup %5172  ;;  %v441_v59 = vmul.f32 %v5171_v55, %v435_v53  ;;  %v4421_v53 = vcombine.high %v1139_v50, %v1143_v51  ;;  %v1151_v55 = vld [vmem:[#allocation15 + $0xe0] sm:$0xff] }
 0x28e   :  { %v442_v61 = vmul.f32 %v5173_v58, %v436_v56  ;;  %v4420_v56 = vcombine.low %v1139_v50, %v1143_v51  ;;  %v5694_v50 = vld [vmem:[#allocation15 + $0x8] sm:$0xff] }
 0x28f   :  { %v455_v63 = vmul.f32 %v448_v54, %v441_v59  ;;  %v1147_v54 = vld [vmem:[#allocation15 + $0xc0] sm:$0xff]  ;;  %v5696_v51 = vld [vmem:[#allocation15 + $0x28] sm:$0xff] }
 0x290   :  { %v456_v0 = vmul.f32 %v452_v57, %v442_v61  ;;  %v4429_v57 = vcombine.high %v1147_v54, %v1151_v55  ;;  %v4428_v58 = vcombine.low %v1147_v54, %v1151_v55  ;;  %v1155_v59 = vld [vmem:[#allocation15 + $0x100] sm:$0xff] }
 0x291   :  { %v469_v3 = vadd.f32 %v462_v60, %v455_v63  ;;  %v1159_v60 = vld [vmem:[#allocation15 + $0x120] sm:$0xff] }
 0x292   :  { %v470_v5 = vadd.f32 %v466_v62, %v456_v0  ;;  %v4437_v61 = vcombine.high %v1155_v59, %v1159_v60  ;;  %v4436_v62 = vcombine.low %v1155_v59, %v1159_v60  ;;  %v1163_v63 = vld [vmem:[#allocation15 + $0x140] sm:$0xff] }
 0x293   :  { %vm471_vm3 = vcmp.gt.f32.partialorder %v469_v3, 0.0  ;;  %v473_v6 = vmul.f32 0.2, %v469_v3  ;;  %v1167_v0 = vld [vmem:[#allocation15 + $0x160] sm:$0xff] }
 0x294   :  { %vm472_vm4 = vcmp.gt.f32.partialorder %v470_v5, 0.0  ;;  %v474_v7 = vmul.f32 0.2, %v470_v5  ;;  %v1259_v54 = vld [vmem:[#allocation15 + $0x440] sm:$0xff] }
 0x295   :  { %v475_v8 = vsel %vm471_vm3, %v469_v3, %v473_v6  ;;  %v4445_v3 = vcombine.high %v1163_v63, %v1167_v0  ;;  %v1171_v6 = vld [vmem:[#allocation15 + $0x180] sm:$0xff] }
 0x296   :  { %v476_v9 = vsel %vm472_vm4, %v470_v5, %v474_v7  ;;  %v5690_v12 = vpack.c.bf16 %v475_v8, %v475_v8  ;;  %v4444_v5 = vcombine.low %v1163_v63, %v1167_v0  ;;  %v1175_v7 = vld [vmem:[#allocation15 + $0x1a0] sm:$0xff] }
 0x297   :  { %v478_v10 = vpack.c.bf16 %v476_v9, %v476_v9  ;;  %v4453_v8 = vcombine.high %v1171_v6, %v1175_v7  ;;  %v4452_v9 = vcombine.low %v1171_v6, %v1175_v7  ;;  %v1263_v55 = vld [vmem:[#allocation15 + $0x460] sm:$0xff] }
 0x298   :  { %v1271_v59 = vld [vmem:[#allocation15 + $0x4a0] sm:$0xff] }
 0x299   :  { %917 = vmatprep.mubr.bf16.mxu1 %v478_v10  ;;  %v1279_v63 = vld [vmem:[#allocation15 + $0x4e0] sm:$0xff] }
 0x29a   :  { %918 = vmatmul.mubr.bf16.vlgmr.msra.gmra.mrb[4].mxu1 %v5690_v12  ;;  %v1287_v6 = vld [vmem:[#allocation15 + $0x520] sm:$0xff] }
 0x29b   :  { %927 = vmatpush1.bf16.msra.mxu1 %v4930_v11  ;;  %958 = vmatprep.mubr.bf16.mxu1 %v478_v10  ;;  %v1179_v10 = vld [vmem:[#allocation15 + $0x1c0] sm:$0xff] }
 0x29c   :  { %928 = vmatprep.subr.bf16.mxu1 %v4935_v13  ;;  %v1183_v11 = vld [vmem:[#allocation15 + $0x1e0] sm:$0xff] }
 0x29d   :  { %v4460_v13 = vcombine.low %v1179_v10, %v1183_v11 }
 0x29f   :  { %929 = vmatpush1.bf16.msra.mxu1 %v4933_v14  ;;  %v1187_v14 = vld [vmem:[#allocation15 + $0x200] sm:$0xff] }
 0x2a0   :  { %930 = vmatprep.subr.bf16.mxu1 %v4938_v15  ;;  %v1191_v15 = vld [vmem:[#allocation15 + $0x220] sm:$0xff] }
 0x2a3   :  { %931 = vmatpush1.bf16.msra.mxu1 %v4936_v16  ;;  %v4469_v16 = vcombine.high %v1187_v14, %v1191_v15 }
 0x2a4   :  { %932 = vmatprep.subr.bf16.mxu1 %v4941_v17  ;;  %v4468_v17 = vcombine.low %v1187_v14, %v1191_v15  ;;  %v1303_v14 = vld [vmem:[#allocation15 + $0x5a0] sm:$0xff] }
 0x2a7   :  { %933 = vmatpush1.bf16.msra.mxu1 %v4939_v18  ;;  %v1195_v18 = vld [vmem:[#allocation15 + $0x240] sm:$0xff] }
 0x2a8   :  { %934 = vmatprep.subr.bf16.mxu1 %v4944_v19  ;;  %v1199_v19 = vld [vmem:[#allocation15 + $0x260] sm:$0xff] }
 0x2ab   :  { %935 = vmatpush1.bf16.msra.mxu1 %v4942_v20  ;;  %v4477_v20 = vcombine.high %v1195_v18, %v1199_v19 }
 0x2ac   :  { %936 = vmatprep.subr.bf16.mxu1 %v4947_v21  ;;  %v4476_v21 = vcombine.low %v1195_v18, %v1199_v19  ;;  %v1311_v18 = vld [vmem:[#allocation15 + $0x5e0] sm:$0xff] }
 0x2af   :  { %937 = vmatpush1.bf16.msra.mxu1 %v4945_v22  ;;  %v1203_v22 = vld [vmem:[#allocation15 + $0x280] sm:$0xff] }
 0x2b0   :  { %938 = vmatprep.subr.bf16.mxu1 %v4950_v23  ;;  %v1207_v23 = vld [vmem:[#allocation15 + $0x2a0] sm:$0xff] }
 0x2b3   :  { %939 = vmatpush1.bf16.msra.mxu1 %v4948_v24  ;;  %v4485_v24 = vcombine.high %v1203_v22, %v1207_v23 }
 0x2b4   :  { %940 = vmatprep.subr.bf16.mxu1 %v4953_v25  ;;  %v4484_v25 = vcombine.low %v1203_v22, %v1207_v23  ;;  %v1319_v22 = vld [vmem:[#allocation15 + $0x620] sm:$0xff] }
 0x2b7   :  { %941 = vmatpush1.bf16.msra.mxu1 %v4951_v26  ;;  %v1211_v26 = vld [vmem:[#allocation15 + $0x2c0] sm:$0xff] }
 0x2b8   :  { %942 = vmatprep.subr.bf16.mxu1 %v4956_v27  ;;  %v1215_v27 = vld [vmem:[#allocation15 + $0x2e0] sm:$0xff] }
 0x2bb   :  { %943 = vmatpush1.bf16.msra.mxu1 %v4954_v28  ;;  %v4493_v28 = vcombine.high %v1211_v26, %v1215_v27 }
 0x2bc   :  { %944 = vmatprep.subr.bf16.mxu1 %v4959_v29  ;;  %v4492_v29 = vcombine.low %v1211_v26, %v1215_v27  ;;  %v1327_v26 = vld [vmem:[#allocation15 + $0x660] sm:$0xff] }
 0x2bf   :  { %945 = vmatpush1.bf16.msra.mxu1 %v4957_v30  ;;  %v1219_v30 = vld [vmem:[#allocation15 + $0x300] sm:$0xff] }
 0x2c0   :  { %946 = vmatprep.subr.bf16.mxu1 %v4962_v31  ;;  %v1223_v31 = vld [vmem:[#allocation15 + $0x320] sm:$0xff] }
 0x2c3   :  { %947 = vmatpush1.bf16.msra.mxu1 %v4960_v32  ;;  %v4501_v32 = vcombine.high %v1219_v30, %v1223_v31 }
 0x2c4   :  { %948 = vmatprep.subr.bf16.mxu1 %v4965_v33  ;;  %v4500_v33 = vcombine.low %v1219_v30, %v1223_v31  ;;  %v1335_v30 = vld [vmem:[#allocation15 + $0x6a0] sm:$0xff] }
 0x2c7   :  { %949 = vmatpush1.bf16.msra.mxu1 %v4963_v34  ;;  %v1227_v34 = vld [vmem:[#allocation15 + $0x340] sm:$0xff] }
 0x2c8   :  { %950 = vmatprep.subr.bf16.mxu1 %v4968_v35  ;;  %v1231_v35 = vld [vmem:[#allocation15 + $0x360] sm:$0xff] }
 0x2cb   :  { %951 = vmatpush1.bf16.msra.mxu1 %v4966_v36  ;;  %v4509_v36 = vcombine.high %v1227_v34, %v1231_v35 }
 0x2cc   :  { %952 = vmatprep.subr.bf16.mxu1 %v4971_v37  ;;  %v4508_v37 = vcombine.low %v1227_v34, %v1231_v35  ;;  %v1343_v34 = vld [vmem:[#allocation15 + $0x6e0] sm:$0xff] }
 0x2cf   :  { %953 = vmatpush1.bf16.msra.mxu1 %v4969_v38  ;;  %v1235_v38 = vld [vmem:[#allocation15 + $0x380] sm:$0xff] }
 0x2d0   :  { %954 = vmatprep.subr.bf16.mxu1 %v4974_v39  ;;  %v1239_v39 = vld [vmem:[#allocation15 + $0x3a0] sm:$0xff] }
 0x2d3   :  { %955 = vmatpush1.bf16.msra.mxu1 %v4972_v40  ;;  %v4516_v40 = vcombine.low %v1235_v38, %v1239_v39 }
 0x2d4   :  { %956 = vmatprep.subr.bf16.mxu1 %v4977_v41  ;;  %v4517_v41 = vcombine.high %v1235_v38, %v1239_v39  ;;  %v1351_v38 = vld [vmem:[#allocation15 + $0x720] sm:$0xff] }
 0x2d7   :  { %957 = vmatpush1.bf16.msra.mxu1 %v4975_v44  ;;  %v1251_v44 = vld [vmem:[#allocation15 + $0x400] sm:$0xff] }
 0x2d8   :  { %2701 = vmatprep.subr.bf16.mxu1 %v4405_v45  ;;  %v4525_v45 = vcombine.high %v1243_v42, %v1247_v43  ;;  %v4532_v47 = vcombine.low %v1251_v44, %v1255_v46 }
 0x2da   :  { %959 = vmatmul.mubr.bf16.vlgmr.msra.gmra.mrb[8].mxu1 %v5690_v12  ;;  %v4461_v12 = vcombine.high %v1179_v10, %v1183_v11  ;;  %v1295_v10 = vld [vmem:[#allocation15 + $0x560] sm:$0xff] }
 0x2db   :  { %2702 = vmatpush1.bf16.msra.mxu1 %v4404_v48  ;;  %v4533_v48 = vcombine.high %v1251_v44, %v1255_v46  ;;  %v1367_v46 = vld [vmem:[#allocation15 + $0x7a0] sm:$0xff] }
 0x2dc   :  { %2703 = vmatprep.subr.bf16.mxu1 %v4413_v49  ;;  %v4524_v49 = vcombine.low %v1243_v42, %v1247_v43  ;;  %v1359_v42 = vld [vmem:[#allocation15 + $0x760] sm:$0xff] }
 0x2dd   :  { %2742 = vmatprep.subr.bf16.mxu0 %v4533_v48 }
 0x2de   :  { %2743 = vmatpush1.bf16.msra.mxu0 %v4532_v47 }
 0x2df   :  { %2704 = vmatpush1.bf16.msra.mxu1 %v4412_v52  ;;  %v4407_v52 = vcombine.high %v5694_v50, %v5696_v51 }
 0x2e0   :  { %2705 = vmatprep.subr.bf16.mxu1 %v4421_v53  ;;  %v4406_v53 = vcombine.low %v5694_v50, %v5696_v51  ;;  %v5751_v50 = vsub.s32 3, %v5676_v1 }
 0x2e3   :  { %2706 = vmatpush1.bf16.msra.mxu1 %v4420_v56  ;;  %v4540_v56 = vcombine.low %v1259_v54, %v1263_v55 }
 0x2e4   :  { %2707 = vmatprep.subr.bf16.mxu1 %v4429_v57  ;;  %v4541_v57 = vcombine.high %v1259_v54, %v1263_v55 }
 0x2e6   :  { %2744 = vmatprep.subr.bf16.mxu0 %v4541_v57  ;;  %v5704_v57 = vld [vmem:[#allocation15 + $0x30] sm:$0xff] }
 0x2e7   :  { %2708 = vmatpush1.bf16.msra.mxu1 %v4428_v58  ;;  %2745 = vmatpush1.bf16.msra.mxu0 %v4540_v56  ;;  %v1267_v58 = vld [vmem:[#allocation15 + $0x480] sm:$0xff]  ;;  %v5702_v56 = vld [vmem:[#allocation15 + $0x10] sm:$0xff] }
 0x2e8   :  { %2709 = vmatprep.subr.bf16.mxu1 %v4437_v61  ;;  %v4548_v60 = vcombine.low %v1267_v58, %v1271_v59  ;;  %v4549_v61 = vcombine.high %v1267_v58, %v1271_v59  ;;  %v4409_v58 = vcombine.high %v5702_v56, %v5704_v57  ;;  %v4408_v59 = vcombine.low %v5702_v56, %v5704_v57 }
 0x2ea   :  { %2746 = vmatprep.subr.bf16.mxu0 %v4549_v61 }
 0x2eb   :  { %2710 = vmatpush1.bf16.msra.mxu1 %v4436_v62  ;;  %2747 = vmatpush1.bf16.msra.mxu0 %v4548_v60  ;;  %v1275_v62 = vld [vmem:[#allocation15 + $0x4c0] sm:$0xff] }
 0x2ec   :  { %2711 = vmatprep.subr.bf16.mxu1 %v4445_v3  ;;  %v4556_v0 = vcombine.low %v1275_v62, %v1279_v63  ;;  %v4557_v3 = vcombine.high %v1275_v62, %v1279_v63  ;;  %v5713_v60 = vld [vmem:[%s5947_s8] sm:$0xf] }
 0x2ed   :  { %v548_v61 = vrot.slane %v5713_v60, %v5679_v2  ;;  %v552_v62 = vrot.slane %v5713_v60, %v5682_v4 }
 0x2ee   :  { %2748 = vmatprep.subr.bf16.mxu0 %v4557_v3 }
 0x2ef   :  { %2712 = vmatpush1.bf16.msra.mxu1 %v4444_v5  ;;  %2749 = vmatpush1.bf16.msra.mxu0 %v4556_v0  ;;  %v1283_v5 = vld [vmem:[#allocation15 + $0x500] sm:$0xff] }
 0x2f0   :  { %2713 = vmatprep.subr.bf16.mxu1 %v4453_v8  ;;  %v4565_v7 = vcombine.high %v1283_v5, %v1287_v6  ;;  %v4564_v8 = vcombine.low %v1283_v5, %v1287_v6 }
 0x2f2   :  { %2750 = vmatprep.subr.bf16.mxu0 %v4565_v7 }
 0x2f3   :  { %2714 = vmatpush1.bf16.msra.mxu1 %v4452_v9  ;;  %2751 = vmatpush1.bf16.msra.mxu0 %v4564_v8  ;;  %v1291_v9 = vld [vmem:[#allocation15 + $0x540] sm:$0xff] }
 0x2f4   :  { %2715 = vmatprep.subr.bf16.mxu1 %v4461_v12  ;;  %v4573_v11 = vcombine.high %v1291_v9, %v1295_v10  ;;  %v4572_v12 = vcombine.low %v1291_v9, %v1295_v10 }
 0x2f6   :  { %2752 = vmatprep.subr.bf16.mxu0 %v4573_v11 }
 0x2f7   :  { %2716 = vmatpush1.bf16.msra.mxu1 %v4460_v13  ;;  %2753 = vmatpush1.bf16.msra.mxu0 %v4572_v12  ;;  %v1299_v13 = vld [vmem:[#allocation15 + $0x580] sm:$0xff] }
 0x2f8   :  { %2717 = vmatprep.subr.bf16.mxu1 %v4469_v16  ;;  %v4581_v15 = vcombine.high %v1299_v13, %v1303_v14  ;;  %v4580_v16 = vcombine.low %v1299_v13, %v1303_v14 }
 0x2fa   :  { %2754 = vmatprep.subr.bf16.mxu0 %v4581_v15 }
 0x2fb   :  { %2718 = vmatpush1.bf16.msra.mxu1 %v4468_v17  ;;  %2755 = vmatpush1.bf16.msra.mxu0 %v4580_v16  ;;  %v1307_v17 = vld [vmem:[#allocation15 + $0x5c0] sm:$0xff] }
 0x2fc   :  { %2719 = vmatprep.subr.bf16.mxu1 %v4477_v20  ;;  %v4589_v19 = vcombine.high %v1307_v17, %v1311_v18  ;;  %v4588_v20 = vcombine.low %v1307_v17, %v1311_v18 }
 0x2fe   :  { %2756 = vmatprep.subr.bf16.mxu0 %v4589_v19 }
 0x2ff   :  { %2720 = vmatpush1.bf16.msra.mxu1 %v4476_v21  ;;  %2757 = vmatpush1.bf16.msra.mxu0 %v4588_v20  ;;  %v1315_v21 = vld [vmem:[#allocation15 + $0x600] sm:$0xff] }
 0x300   :  { %2721 = vmatprep.subr.bf16.mxu1 %v4485_v24  ;;  %v4597_v23 = vcombine.high %v1315_v21, %v1319_v22  ;;  %v4596_v24 = vcombine.low %v1315_v21, %v1319_v22 }
 0x302   :  { %2758 = vmatprep.subr.bf16.mxu0 %v4597_v23 }
 0x303   :  { %2722 = vmatpush1.bf16.msra.mxu1 %v4484_v25  ;;  %2759 = vmatpush1.bf16.msra.mxu0 %v4596_v24  ;;  %v1323_v25 = vld [vmem:[#allocation15 + $0x640] sm:$0xff] }
 0x304   :  { %2723 = vmatprep.subr.bf16.mxu1 %v4493_v28  ;;  %v4605_v27 = vcombine.high %v1323_v25, %v1327_v26  ;;  %v4604_v28 = vcombine.low %v1323_v25, %v1327_v26 }
 0x306   :  { %2760 = vmatprep.subr.bf16.mxu0 %v4605_v27 }
 0x307   :  { %2724 = vmatpush1.bf16.msra.mxu1 %v4492_v29  ;;  %2761 = vmatpush1.bf16.msra.mxu0 %v4604_v28  ;;  %v1331_v29 = vld [vmem:[#allocation15 + $0x680] sm:$0xff] }
 0x308   :  { %2725 = vmatprep.subr.bf16.mxu1 %v4501_v32  ;;  %v4613_v31 = vcombine.high %v1331_v29, %v1335_v30  ;;  %v4612_v32 = vcombine.low %v1331_v29, %v1335_v30 }
 0x30a   :  { %2762 = vmatprep.subr.bf16.mxu0 %v4613_v31 }
 0x30b   :  { %2726 = vmatpush1.bf16.msra.mxu1 %v4500_v33  ;;  %2763 = vmatpush1.bf16.msra.mxu0 %v4612_v32  ;;  %v1339_v33 = vld [vmem:[#allocation15 + $0x6c0] sm:$0xff] }
 0x30c   :  { %2727 = vmatprep.subr.bf16.mxu1 %v4509_v36  ;;  %v4621_v35 = vcombine.high %v1339_v33, %v1343_v34  ;;  %v4620_v36 = vcombine.low %v1339_v33, %v1343_v34 }
 0x30e   :  { %2764 = vmatprep.subr.bf16.mxu0 %v4621_v35 }
 0x30f   :  { %2728 = vmatpush1.bf16.msra.mxu1 %v4508_v37  ;;  %2765 = vmatpush1.bf16.msra.mxu0 %v4620_v36  ;;  %v1347_v37 = vld [vmem:[#allocation15 + $0x700] sm:$0xff] }
 0x310   :  { %2729 = vmatprep.subr.bf16.mxu1 %v4517_v41  ;;  %v4629_v39 = vcombine.high %v1347_v37, %v1351_v38  ;;  %v1355_v41 = vld [vmem:[#allocation15 + $0x740] sm:$0xff] }
 0x311   :  { %v4637_v43 = vcombine.high %v1355_v41, %v1359_v42  ;;  %v4636_v44 = vcombine.low %v1355_v41, %v1359_v42 }
 0x312   :  { %2766 = vmatprep.subr.bf16.mxu0 %v4629_v39 }
 0x313   :  { %2730 = vmatpush1.bf16.msra.mxu1 %v4516_v40  ;;  %v4628_v40 = vcombine.low %v1347_v37, %v1351_v38 }
 0x314   :  { %2731 = vmatprep.subr.bf16.mxu1 %v4525_v45  ;;  %v1363_v45 = vld [vmem:[#allocation15 + $0x780] sm:$0xff] }
 0x315   :  { %2767 = vmatpush1.bf16.msra.mxu0 %v4628_v40  ;;  %v4645_v47 = vcombine.high %v1363_v45, %v1367_v46  ;;  %v4644_v48 = vcombine.low %v1363_v45, %v1367_v46  ;;  %v5722_v46 = vld [vmem:[%s5948_s9] sm:$0xf] }
 0x316   :  { %2768 = vmatprep.subr.bf16.mxu0 %v4637_v43 }
 0x317   :  { %2732 = vmatpush1.bf16.msra.mxu1 %v4524_v49  ;;  %v1371_v49 = vld [vmem:[#allocation15 + $0x7c0] sm:$0xff] }
 0x318   :  { %2783 = vmatprep.subr.bf16.mxu1 %v4407_v52  ;;  %v1375_v52 = vld [vmem:[#allocation15 + $0x7e0] sm:$0xff] }
 0x319   :  { %2769 = vmatpush1.bf16.msra.mxu0 %v4636_v44  ;;  %v4652_v54 = vcombine.low %v1371_v49, %v1375_v52  ;;  %v4653_v55 = vcombine.high %v1371_v49, %v1375_v52  ;;  %v1060_v49 = vrot.slane %v5722_v46, %v5679_v2 }
 0x31a   :  { %2770 = vmatprep.subr.bf16.mxu0 %v4645_v47  ;;  %v5727_v47 = vld [vmem:[%s5949_s10] sm:$0xf] }
 0x31d   :  { %2771 = vmatpush1.bf16.msra.mxu0 %v4644_v48 }
 0x31e   :  { %2772 = vmatprep.subr.bf16.mxu0 %v4653_v55  ;;  %v1064_v55 = vrot.slane %v5722_v46, %v5682_v4 }
 0x321   :  { %2773 = vmatpush1.bf16.msra.mxu0 %v4652_v54 }
 0x322   :  { %2865 = vmatprep.subr.bf16.mxu0 %v4409_v58 }
 0x36d   :  { %v919_v63 = vpop.f32.mrb[4].mxu1 }
 0x36e   :  { %v920_v0 = vadd.f32 %v919_v63, %v548_v61  ;;  %v921_v3 = vpop.f32.mrb[5].mxu1 }
 0x36f   :  { %v922_v5 = vadd.f32 %v921_v3, %v552_v62  ;;  %v923_v6 = vpop.f32.mrb[6].mxu1  ;;  %v1086_v62 = vrot.slane %v5727_v47, %v5679_v2  ;;  %v1090_v3 = vrot.slane %v5727_v47, %v5682_v4 }
 0x370   :  { %v967_v7 = vrot.slane %v920_v0, 4  ;;  %v995_v8 = vmul.f32 %v920_v0, %v920_v0  ;;  %v924_v9 = vpop.f32.mrb[7].mxu1 }
 0x371   :  { %v973_v10 = vrot.slane %v922_v5, 4  ;;  %v996_v11 = vmul.f32 %v922_v5, %v922_v5 }
 0x372   :  { %v968_v12 = vadd.f32 %v967_v7, %v920_v0  ;;  %v999_v13 = vrot.slane %v995_v8, 4 }
 0x373   :  { %v974_v14 = vadd.f32 %v973_v10, %v922_v5  ;;  %v1005_v15 = vrot.slane %v996_v11, 4 }
 0x374   :  { %v969_v16 = vrot.slane %v968_v12, 2  ;;  %v1000_v17 = vadd.f32 %v999_v13, %v995_v8 }
 0x375   :  { %v975_v18 = vrot.slane %v974_v14, 2  ;;  %v1006_v19 = vadd.f32 %v1005_v15, %v996_v11  ;;  %v1132_v11 = vld [vmem:[#allocation15 + $0x48] sm:$0xff] }
 0x376   :  { %v970_v20 = vadd.f32 %v969_v16, %v968_v12  ;;  %v1001_v21 = vrot.slane %v1000_v17, 2  ;;  %v1136_v12 = vld [vmem:[#allocation15 + $0x68] sm:$0xff] }
 0x377   :  { %v976_v22 = vadd.f32 %v975_v18, %v974_v14  ;;  %v1007_v23 = vrot.slane %v1006_v19, 2  ;;  %v4415_v16 = vcombine.high %v1132_v11, %v1136_v12  ;;  %v1144_v18 = vld [vmem:[#allocation15 + $0xa8] sm:$0xff] }
 0x378   :  { %v971_v24 = vrot.slane %v970_v20, 1  ;;  %v1002_v25 = vadd.f32 %v1001_v21, %v1000_v17  ;;  %v1140_v17 = vld [vmem:[#allocation15 + $0x88] sm:$0xff] }
 0x379   :  { %v977_v26 = vrot.slane %v976_v22, 1  ;;  %v1008_v27 = vadd.f32 %v1007_v23, %v1006_v19  ;;  %v4414_v19 = vcombine.low %v1132_v11, %v1136_v12  ;;  %v1148_v21 = vld [vmem:[#allocation15 + $0xc8] sm:$0xff]  ;;  %v4422_v23 = vcombine.low %v1140_v17, %v1144_v18 }
 0x37a   :  { %v972_v28 = vadd.f32 %v971_v24, %v970_v20  ;;  %v1003_v29 = vrot.slane %v1002_v25, 1  ;;  %v4423_v20 = vcombine.high %v1140_v17, %v1144_v18 }
 0x37b   :  { %v978_v30 = vadd.f32 %v977_v26, %v976_v22  ;;  %v1009_v31 = vrot.slane %v1008_v27, 1  ;;  %v1152_v22 = vld [vmem:[#allocation15 + $0xe8] sm:$0xff] }
 0x37c   :  { %v991_v32 = vmul.f32 0.125, %v972_v28  ;;  %v1004_v33 = vadd.f32 %v1003_v29, %v1002_v25  ;;  %v4431_v24 = vcombine.high %v1148_v21, %v1152_v22  ;;  %v1156_v25 = vld [vmem:[#allocation15 + $0x108] sm:$0xff]  ;;  %v4430_v28 = vcombine.low %v1148_v21, %v1152_v22 }
 0x37d   :  { %v992_v34 = vmul.f32 0.125, %v978_v30  ;;  %v1010_v35 = vadd.f32 %v1009_v31, %v1008_v27  ;;  %v1160_v26 = vld [vmem:[#allocation15 + $0x128] sm:$0xff]  ;;  %v5748_v27 = vsub.s32 2, %v5676_v1  ;;  %v560_v31 = vrot.slane %v5713_v60, %v5751_v50 }
 0x37e   :  { %v1023_v36 = vmul.f32 0.125, %v1004_v33  ;;  %v1027_v37 = vmul.f32 %v991_v32, %v991_v32  ;;  %v1039_v48 = vsub.f32 %v920_v0, %v991_v32  ;;  %v4439_v51 = vcombine.high %v1156_v25, %v1160_v26  ;;  %v1168_v29 = vld [vmem:[#allocation15 + $0x168] sm:$0xff] }
 0x37f   :  { %v1024_v38 = vmul.f32 0.125, %v1010_v35  ;;  %v1028_v39 = vmul.f32 %v992_v34, %v992_v34  ;;  %v1040_v54 = vsub.f32 %v922_v5, %v992_v34  ;;  %v556_v30 = vrot.slane %v5713_v60, %v5748_v27  ;;  %v1172_v35 = vld [vmem:[#allocation15 + $0x188] sm:$0xff] }
 0x380   :  { %v1031_v40 = vsub.f32 %v1023_v36, %v1027_v37  ;;  %v4438_v32 = vcombine.low %v1156_v25, %v1160_v26  ;;  %v1176_v36 = vld [vmem:[#allocation15 + $0x1a8] sm:$0xff] }
 0x381   :  { %v1032_v41 = vsub.f32 %v1024_v38, %v1028_v39  ;;  %v1196_v21 = vld [vmem:[#allocation15 + $0x248] sm:$0xff] }
 0x382   :  { %v1035_v42 = vmax.f32 %v1031_v40, 0.0  ;;  %v1200_v22 = vld [vmem:[#allocation15 + $0x268] sm:$0xff] }
 0x383   :  { %v1036_v43 = vmax.f32 %v1032_v41, 0.0 }
 0x384   :  { %v1043_v44 = vadd.f32 0.8, %v1035_v42 }
 0x385   :  { %v1044_v45 = vadd.f32 0.8, %v1036_v43 }
 0x386   :  { %5174 = vrsqrt.f32 %v1043_v44  ;;  %v4455_v44 = vcombine.high %v1172_v35, %v1176_v36 }
 0x387   :  { %5176 = vrsqrt.f32 %v1044_v45 }
 0x390   :  { %v5175_v52 = vpop.eup %5174 }
 0x391   :  { %v5177_v58 = vpop.eup %5176  ;;  %v1051_v61 = vmul.f32 %v5175_v52, %v1039_v48  ;;  %v1184_v52 = vld [vmem:[#allocation15 + $0x1e8] sm:$0xff] }
 0x392   :  { %v1052_v63 = vmul.f32 %v5177_v58, %v1040_v54 }
 0x393   :  { %v1077_v6 = vmul.f32 %v1060_v49, %v1051_v61  ;;  %v1180_v49 = vld [vmem:[#allocation15 + $0x1c8] sm:$0xff] }
 0x394   :  { %v1078_v7 = vmul.f32 %v1064_v55, %v1052_v63 }
 0x395   :  { %v1103_v0 = vadd.f32 %v1086_v62, %v1077_v6  ;;  %v4454_v62 = vcombine.low %v1172_v35, %v1176_v36  ;;  %v4463_v6 = vcombine.high %v1180_v49, %v1184_v52 }
 0x396   :  { %v1104_v8 = vadd.f32 %v1090_v3, %v1078_v7 }
 0x397   :  { %vm1107_vm5 = vcmp.gt.f32.partialorder %v1103_v0, 0.0  ;;  %v1111_v9 = vmul.f32 0.2, %v1103_v0 }
 0x398   :  { %vm1108_vm6 = vcmp.gt.f32.partialorder %v1104_v8, 0.0  ;;  %v1112_v5 = vmul.f32 0.2, %v1104_v8 }
 0x399   :  { %v1115_v10 = vsel %vm1107_vm5, %v1103_v0, %v1111_v9  ;;  %v1192_v9 = vld [vmem:[#allocation15 + $0x228] sm:$0xff] }
 0x39a   :  { %v1116_v13 = vsel %vm1108_vm6, %v1104_v8, %v1112_v5  ;;  %v5739_v15 = vpack.c.bf16 %v1115_v10, %v1115_v10  ;;  %v1188_v8 = vld [vmem:[#allocation15 + $0x208] sm:$0xff] }
 0x39b   :  { %v5737_v14 = vpack.c.bf16 %v1116_v13, %v1116_v13  ;;  %v4462_v13 = vcombine.low %v1180_v49, %v1184_v52  ;;  %v4471_v18 = vcombine.high %v1188_v8, %v1192_v9 }
 0x39d   :  { %2733 = vmatprep.mubr.bf16.mxu1 %v5737_v14 }
 0x39e   :  { %2734 = vmatmul.mubr.bf16.vlgmr.msra.gmra.mrb[12].mxu1 %v5739_v15 }
 0x39f   :  { %2784 = vmatpush1.bf16.msra.mxu1 %v4406_v53  ;;  %2815 = vmatprep.mubr.bf16.mxu1 %v5737_v14  ;;  %v1164_v53 = vld [vmem:[#allocation15 + $0x148] sm:$0xff] }
 0x3a0   :  { %2785 = vmatprep.subr.bf16.mxu1 %v4415_v16  ;;  %v4447_v33 = vcombine.high %v1164_v53, %v1168_v29  ;;  %v4446_v41 = vcombine.low %v1164_v53, %v1168_v29  ;;  %v4479_v29 = vcombine.high %v1196_v21, %v1200_v22 }
 0x3a3   :  { %2786 = vmatpush1.bf16.msra.mxu1 %v4414_v19 }
 0x3a4   :  { %2787 = vmatprep.subr.bf16.mxu1 %v4423_v20 }
 0x3a7   :  { %2788 = vmatpush1.bf16.msra.mxu1 %v4422_v23 }
 0x3a8   :  { %2789 = vmatprep.subr.bf16.mxu1 %v4431_v24 }
 0x3ab   :  { %2790 = vmatpush1.bf16.msra.mxu1 %v4430_v28  ;;  %v4470_v28 = vcombine.low %v1188_v8, %v1192_v9  ;;  %v1236_v8 = vld [vmem:[#allocation15 + $0x388] sm:$0xff] }
 0x3ac   :  { %2791 = vmatprep.subr.bf16.mxu1 %v4439_v51  ;;  %v1240_v9 = vld [vmem:[#allocation15 + $0x3a8] sm:$0xff] }
 0x3ad   :  { %v960_v34 = vpop.f32.mrb[8].mxu1 }
 0x3ae   :  { %v5757_v37 = vadd.f32 %v960_v34, %v556_v30  ;;  %v962_v38 = vpop.f32.mrb[9].mxu1 }
 0x3af   :  { %v5759_v39 = vadd.f32 %v962_v38, %v560_v31  ;;  %v964_v40 = vpop.f32.mrb[10].mxu1  ;;  %2792 = vmatpush1.bf16.msra.mxu1 %v4438_v32  ;;  %v1204_v32 = vld [vmem:[#allocation15 + $0x288] sm:$0xff] }
 0x3b0   :  { %v979_v42 = vrot.slane %v5757_v37, 4  ;;  %v997_v43 = vmul.f32 %v5757_v37, %v5757_v37  ;;  %v965_v60 = vpop.f32.mrb[11].mxu1  ;;  %2793 = vmatprep.subr.bf16.mxu1 %v4447_v33  ;;  %v1208_v33 = vld [vmem:[#allocation15 + $0x2a8] sm:$0xff]  ;;  %v4478_v40 = vcombine.low %v1196_v21, %v1200_v22 }
 0x3b1   :  { %v985_v45 = vrot.slane %v5759_v39, 4  ;;  %v998_v48 = vmul.f32 %v5759_v39, %v5759_v39  ;;  %v1212_v60 = vld [vmem:[#allocation15 + $0x2c8] sm:$0xff]  ;;  %v4486_v49 = vcombine.low %v1204_v32, %v1208_v33 }
 0x3b2   :  { %v980_v54 = vadd.f32 %v979_v42, %v5757_v37  ;;  %v1011_v55 = vrot.slane %v997_v43, 4  ;;  %v4487_v42 = vcombine.high %v1204_v32, %v1208_v33  ;;  %v1248_v21 = vld [vmem:[#allocation15 + $0x3e8] sm:$0xff] }
 0x3b3   :  { %v986_v58 = vadd.f32 %v985_v45, %v5759_v39  ;;  %v1017_v61 = vrot.slane %v998_v48, 4  ;;  %2794 = vmatpush1.bf16.msra.mxu1 %v4446_v41 }
 0x3b4   :  { %v981_v63 = vrot.slane %v980_v54, 2  ;;  %v1012_v3 = vadd.f32 %v1011_v55, %v997_v43  ;;  %2795 = vmatprep.subr.bf16.mxu1 %v4455_v44  ;;  %v1216_v44 = vld [vmem:[#allocation15 + $0x2e8] sm:$0xff] }
 0x3b5   :  { %v987_v7 = vrot.slane %v986_v58, 2  ;;  %v1018_v0 = vadd.f32 %v1017_v61, %v998_v48  ;;  %v1224_v61 = vld [vmem:[#allocation15 + $0x328] sm:$0xff] }
 0x3b6   :  { %v982_v5 = vadd.f32 %v981_v63, %v980_v54  ;;  %v1013_v10 = vrot.slane %v1012_v3, 2  ;;  %v4495_v54 = vcombine.high %v1212_v60, %v1216_v44 }
 0x3b7   :  { %v988_v11 = vadd.f32 %v987_v7, %v986_v58  ;;  %v1019_v12 = vrot.slane %v1018_v0, 2  ;;  %2796 = vmatpush1.bf16.msra.mxu1 %v4454_v62  ;;  %v1220_v58 = vld [vmem:[#allocation15 + $0x308] sm:$0xff]  ;;  %v4494_v62 = vcombine.low %v1212_v60, %v1216_v44 }
 0x3b8   :  { %v983_v16 = vrot.slane %v982_v5, 1  ;;  %v1014_v17 = vadd.f32 %v1013_v10, %v1012_v3  ;;  %2797 = vmatprep.subr.bf16.mxu1 %v4463_v6  ;;  %v4503_v63 = vcombine.high %v1220_v58, %v1224_v61  ;;  %v1228_v3 = vld [vmem:[#allocation15 + $0x348] sm:$0xff]  ;;  %v4502_v7 = vcombine.low %v1220_v58, %v1224_v61  ;;  %v1149_v61 = vld [vmem:[#allocation15 + $0xd0] sm:$0xff] }
 0x3b9   :  { %v989_v19 = vrot.slane %v988_v11, 1  ;;  %v1020_v20 = vadd.f32 %v1019_v12, %v1018_v0  ;;  %v1232_v6 = vld [vmem:[#allocation15 + $0x368] sm:$0xff]  ;;  %v1068_v10 = vrot.slane %v5722_v46, %v5748_v27 }
 0x3ba   :  { %v984_v23 = vadd.f32 %v983_v16, %v982_v5  ;;  %v1015_v24 = vrot.slane %v1014_v17, 1  ;;  %v4511_v0 = vcombine.high %v1228_v3, %v1232_v6  ;;  %v1072_v16 = vrot.slane %v5722_v46, %v5751_v50 }
 0x3bb   :  { %v990_v25 = vadd.f32 %v989_v19, %v988_v11  ;;  %v1021_v26 = vrot.slane %v1020_v20, 1  ;;  %2798 = vmatpush1.bf16.msra.mxu1 %v4462_v13  ;;  %v4510_v11 = vcombine.low %v1228_v3, %v1232_v6  ;;  %v1280_v3 = vld [vmem:[#allocation15 + $0x4e8] sm:$0xff] }
 0x3bc   :  { %v993_v51 = vmul.f32 0.125, %v984_v23  ;;  %v1016_v53 = vadd.f32 %v1015_v24, %v1014_v17  ;;  %2799 = vmatprep.subr.bf16.mxu1 %v4471_v18  ;;  %v4519_v17 = vcombine.high %v1236_v8, %v1240_v9  ;;  %v1098_v23 = vrot.slane %v5727_v47, %v5751_v50 }
 0x3bd   :  { %v994_v30 = vmul.f32 0.125, %v990_v25  ;;  %v1022_v31 = vadd.f32 %v1021_v26, %v1020_v20  ;;  %v1244_v20 = vld [vmem:[#allocation15 + $0x3c8] sm:$0xff]  ;;  %v4518_v25 = vcombine.low %v1236_v8, %v1240_v9 }
 0x3be   :  { %v1025_v34 = vmul.f32 0.125, %v1016_v53  ;;  %v1029_v35 = vmul.f32 %v993_v51, %v993_v51  ;;  %v1041_v5 = vsub.f32 %v5757_v37, %v993_v51  ;;  %v1094_v37 = vrot.slane %v5727_v47, %v5748_v27  ;;  %v1256_v51 = vld [vmem:[#allocation15 + $0x428] sm:$0xff]  ;;  %v1133_v47 = vld [vmem:[#allocation15 + $0x50] sm:$0xff] }
 0x3bf   :  { %v1026_v36 = vmul.f32 0.125, %v1022_v31  ;;  %v1030_v38 = vmul.f32 %v994_v30, %v994_v30  ;;  %2800 = vmatpush1.bf16.msra.mxu1 %v4470_v28  ;;  %v1042_v13 = vsub.f32 %v5759_v39, %v994_v30  ;;  %v4527_v26 = vcombine.high %v1244_v20, %v1248_v21  ;;  %v1252_v28 = vld [vmem:[#allocation15 + $0x408] sm:$0xff] }
 0x3c0   :  { %v1033_v41 = vsub.f32 %v1025_v34, %v1029_v35  ;;  %2801 = vmatprep.subr.bf16.mxu1 %v4479_v29  ;;  %v4526_v29 = vcombine.low %v1244_v20, %v1248_v21  ;;  %v4535_v32 = vcombine.high %v1252_v28, %v1256_v51  ;;  %v1137_v35 = vld [vmem:[#allocation15 + $0x70] sm:$0xff]  ;;  %v1284_v8 = vld [vmem:[#allocation15 + $0x508] sm:$0xff] }
 0x3c1   :  { %v1034_v43 = vsub.f32 %v1026_v36, %v1030_v38  ;;  %v1260_v36 = vld [vmem:[#allocation15 + $0x448] sm:$0xff]  ;;  %v4417_v60 = vcombine.high %v1133_v47, %v1137_v35 }
 0x3c2   :  { %v1037_v45 = vmax.f32 %v1033_v41, 0.0  ;;  %v1264_v38 = vld [vmem:[#allocation15 + $0x468] sm:$0xff]  ;;  %v4534_v41 = vcombine.low %v1252_v28, %v1256_v51  ;;  %v1181_v51 = vld [vmem:[#allocation15 + $0x1d0] sm:$0xff] }
 0x3c3   :  { %v1038_v48 = vmax.f32 %v1034_v43, 0.0  ;;  %2802 = vmatpush1.bf16.msra.mxu1 %v4478_v40  ;;  %v1141_v43 = vld [vmem:[#allocation15 + $0x90] sm:$0xff]  ;;  %v4543_v44 = vcombine.high %v1260_v36, %v1264_v38  ;;  %v1288_v9 = vld [vmem:[#allocation15 + $0x528] sm:$0xff] }
 0x3c4   :  { %v1045_v52 = vadd.f32 0.8, %v1037_v45  ;;  %2803 = vmatprep.subr.bf16.mxu1 %v4487_v42  ;;  %v1145_v45 = vld [vmem:[#allocation15 + $0xb0] sm:$0xff]  ;;  %v4566_v20 = vcombine.low %v1284_v8, %v1288_v9 }
 0x3c5   :  { %v1046_v55 = vadd.f32 0.8, %v1038_v48  ;;  %v1268_v48 = vld [vmem:[#allocation15 + $0x488] sm:$0xff]  ;;  %v4424_v6 = vcombine.low %v1141_v43, %v1145_v45 }
 0x3c6   :  { %5178 = vrsqrt.f32 %v1045_v52  ;;  %v4416_v52 = vcombine.low %v1133_v47, %v1137_v35  ;;  %v1193_v35 = vld [vmem:[#allocation15 + $0x230] sm:$0xff] }
 0x3c7   :  { %5180 = vrsqrt.f32 %v1046_v55  ;;  %2804 = vmatpush1.bf16.msra.mxu1 %v4486_v49  ;;  %v1272_v49 = vld [vmem:[#allocation15 + $0x4a8] sm:$0xff]  ;;  %v4425_v55 = vcombine.high %v1141_v43, %v1145_v45  ;;  %v1197_v45 = vld [vmem:[#allocation15 + $0x250] sm:$0xff] }
 0x3c8   :  { %2805 = vmatprep.subr.bf16.mxu1 %v4495_v54  ;;  %v4542_v54 = vcombine.low %v1260_v36, %v1264_v38  ;;  %v4551_v58 = vcombine.high %v1268_v48, %v1272_v49  ;;  %v4550_v56 = vcombine.low %v1268_v48, %v1272_v49  ;;  %v1316_v36 = vld [vmem:[#allocation15 + $0x608] sm:$0xff]  ;;  %v1201_v48 = vld [vmem:[#allocation15 + $0x270] sm:$0xff] }
 0x3c9   :  { %v1320_v38 = vld [vmem:[#allocation15 + $0x628] sm:$0xff] }
 0x3ca   :  { %v1324_v49 = vld [vmem:[#allocation15 + $0x648] sm:$0xff] }
 0x3cb   :  { %2806 = vmatpush1.bf16.msra.mxu1 %v4494_v62  ;;  %v1153_v62 = vld [vmem:[#allocation15 + $0xf0] sm:$0xff] }
 0x3cc   :  { %2807 = vmatprep.subr.bf16.mxu1 %v4503_v63  ;;  %v1276_v63 = vld [vmem:[#allocation15 + $0x4c8] sm:$0xff]  ;;  %v4433_v57 = vcombine.high %v1149_v61, %v1153_v62 }
 0x3cf   :  { %2808 = vmatpush1.bf16.msra.mxu1 %v4502_v7  ;;  %v1157_v7 = vld [vmem:[#allocation15 + $0x110] sm:$0xff] }
 0x3d0   :  { %v5179_v12 = vpop.eup %5178  ;;  %2809 = vmatprep.subr.bf16.mxu1 %v4511_v0  ;;  %v1161_v0 = vld [vmem:[#allocation15 + $0x130] sm:$0xff] }
 0x3d1   :  { %v5181_v18 = vpop.eup %5180  ;;  %v1053_v19 = vmul.f32 %v5179_v12, %v1041_v5  ;;  %v4432_v5 = vcombine.low %v1149_v61, %v1153_v62  ;;  %v4567_v12 = vcombine.high %v1284_v8, %v1288_v9  ;;  %v1205_v62 = vld [vmem:[#allocation15 + $0x290] sm:$0xff]  ;;  %v1340_v9 = vld [vmem:[#allocation15 + $0x6c8] sm:$0xff] }
 0x3d2   :  { %v1054_v22 = vmul.f32 %v5181_v18, %v1042_v13  ;;  %v1165_v13 = vld [vmem:[#allocation15 + $0x150] sm:$0xff]  ;;  %v1296_v18 = vld [vmem:[#allocation15 + $0x568] sm:$0xff] }
 0x3d3   :  { %v1079_v24 = vmul.f32 %v1068_v10, %v1053_v19  ;;  %2810 = vmatpush1.bf16.msra.mxu1 %v4510_v11  ;;  %v4558_v10 = vcombine.low %v1276_v63, %v1280_v3  ;;  %v4441_v11 = vcombine.high %v1157_v7, %v1161_v0  ;;  %v4440_v19 = vcombine.low %v1157_v7, %v1161_v0  ;;  %v1213_v0 = vld [vmem:[#allocation15 + $0x2d0] sm:$0xff] }
 0x3d4   :  { %v1080_v39 = vmul.f32 %v1072_v16, %v1054_v22  ;;  %2811 = vmatprep.subr.bf16.mxu1 %v4519_v17  ;;  %v1169_v16 = vld [vmem:[#allocation15 + $0x170] sm:$0xff]  ;;  %v1292_v17 = vld [vmem:[#allocation15 + $0x548] sm:$0xff] }
 0x3d5   :  { %v1105_v46 = vadd.f32 %v1094_v37, %v1079_v24  ;;  %v4449_v21 = vcombine.high %v1165_v13, %v1169_v16  ;;  %v4575_v37 = vcombine.high %v1292_v17, %v1296_v18  ;;  %v1173_v22 = vld [vmem:[#allocation15 + $0x190] sm:$0xff]  ;;  %v1300_v24 = vld [vmem:[#allocation15 + $0x588] sm:$0xff] }
 0x3d6   :  { %v1106_v53 = vadd.f32 %v1098_v23, %v1080_v39  ;;  %v1177_v23 = vld [vmem:[#allocation15 + $0x1b0] sm:$0xff]  ;;  %v4448_v39 = vcombine.low %v1165_v13, %v1169_v16 }
 0x3d7   :  { %2812 = vmatpush1.bf16.msra.mxu1 %v4518_v25  ;;  %vm1109_vm7 = vcmp.gt.f32.partialorder %v1105_v46, 0.0  ;;  %v1113_v30 = vmul.f32 0.2, %v1105_v46  ;;  %v1304_v25 = vld [vmem:[#allocation15 + $0x5a8] sm:$0xff]  ;;  %v1217_v8 = vld [vmem:[#allocation15 + $0x2f0] sm:$0xff] }
 0x3d8   :  { %2813 = vmatprep.subr.bf16.mxu1 %v4527_v26  ;;  %vm1110_vm8 = vcmp.gt.f32.partialorder %v1106_v53, 0.0  ;;  %v1114_v31 = vmul.f32 0.2, %v1106_v53  ;;  %v4574_v26 = vcombine.low %v1292_v17, %v1296_v18  ;;  %v4583_v28 = vcombine.high %v1300_v24, %v1304_v25  ;;  %v1221_v16 = vld [vmem:[#allocation15 + $0x310] sm:$0xff]  ;;  %v1348_v18 = vld [vmem:[#allocation15 + $0x708] sm:$0xff] }
 0x3d9   :  { %v1117_v33 = vsel %vm1109_vm7, %v1105_v46, %v1113_v30  ;;  %v4457_v46 = vcombine.high %v1173_v22, %v1177_v23  ;;  %v1312_v30 = vld [vmem:[#allocation15 + $0x5e8] sm:$0xff]  ;;  %v1225_v17 = vld [vmem:[#allocation15 + $0x330] sm:$0xff] }
 0x3da   :  { %v1118_v34 = vsel %vm1110_vm8, %v1106_v53, %v1114_v31  ;;  %v5781_v42 = vpack.c.bf16 %v1117_v33, %v1117_v33  ;;  %v1185_v53 = vld [vmem:[#allocation15 + $0x1f0] sm:$0xff]  ;;  %v4456_v31 = vcombine.low %v1173_v22, %v1177_v23 }
 0x3db   :  { %2814 = vmatpush1.bf16.msra.mxu1 %v4526_v29  ;;  %v5779_v40 = vpack.c.bf16 %v1118_v34, %v1118_v34  ;;  %v1308_v29 = vld [vmem:[#allocation15 + $0x5c8] sm:$0xff]  ;;  %v4465_v33 = vcombine.high %v1181_v51, %v1185_v53  ;;  %v1189_v34 = vld [vmem:[#allocation15 + $0x210] sm:$0xff] }
 0x3dc   :  { %2824 = vmatprep.subr.bf16.mxu1 %v4535_v32  ;;  %v4582_v32 = vcombine.low %v1300_v24, %v1304_v25  ;;  %v4591_v47 = vcombine.high %v1308_v29, %v1312_v30  ;;  %v4590_v43 = vcombine.low %v1308_v29, %v1312_v30  ;;  %v1229_v23 = vld [vmem:[#allocation15 + $0x350] sm:$0xff]  ;;  %v1356_v25 = vld [vmem:[#allocation15 + $0x748] sm:$0xff] }
 0x3dd   :  { %2774 = vmatprep.mubr.bf16.mxu0 %v5779_v40  ;;  %v1233_v24 = vld [vmem:[#allocation15 + $0x370] sm:$0xff]  ;;  %v1364_v30 = vld [vmem:[#allocation15 + $0x788] sm:$0xff] }
 0x3de   :  { %2775 = vmatmul.mubr.bf16.vlgmr.msra.gmra.mrb[4].mxu0 %v5781_v42  ;;  %2816 = vmatmul.mubr.bf16.vlgmr.msra.gmra.mrb[16].mxu1 %v5739_v15  ;;  %v1241_v29 = vld [vmem:[#allocation15 + $0x3b0] sm:$0xff] }
 0x3df   :  { %2866 = vmatpush1.bf16.msra.mxu0 %v4408_v59  ;;  %2825 = vmatpush1.bf16.msra.mxu1 %v4534_v41  ;;  %v4559_v59 = vcombine.high %v1276_v63, %v1280_v3  ;;  %v4464_v41 = vcombine.low %v1181_v51, %v1185_v53  ;;  %v1209_v63 = vld [vmem:[#allocation15 + $0x2b0] sm:$0xff]  ;;  %v1332_v3 = vld [vmem:[#allocation15 + $0x688] sm:$0xff] }
 0x3e0   :  { %2856 = vmatprep.mubr.bf16.mxu1 %v5779_v40  ;;  %2897 = vmatprep.mubr.bf16.mxu0 %v5737_v14  ;;  %v1237_v53 = vld [vmem:[#allocation15 + $0x390] sm:$0xff] }
 0x3e1   :  { %2867 = vmatprep.subr.bf16.mxu0 %v4417_v60  ;;  %2826 = vmatprep.subr.bf16.mxu1 %v4543_v44  ;;  %v4473_v60 = vcombine.high %v1189_v34, %v1193_v35  ;;  %v4599_v44 = vcombine.high %v1316_v36, %v1320_v38 }
 0x3e3   :  { %2868 = vmatpush1.bf16.msra.mxu0 %v4416_v52  ;;  %2827 = vmatpush1.bf16.msra.mxu1 %v4542_v54  ;;  %v1328_v52 = vld [vmem:[#allocation15 + $0x668] sm:$0xff]  ;;  %v4472_v54 = vcombine.low %v1189_v34, %v1193_v35  ;;  %v1245_v35 = vld [vmem:[#allocation15 + $0x3d0] sm:$0xff] }
 0x3e4   :  { %2869 = vmatprep.subr.bf16.mxu0 %v4425_v55  ;;  %2828 = vmatprep.subr.bf16.mxu1 %v4551_v58  ;;  %v4598_v55 = vcombine.low %v1316_v36, %v1320_v38  ;;  %v4481_v58 = vcombine.high %v1197_v45, %v1201_v48  ;;  %v4607_v61 = vcombine.high %v1324_v49, %v1328_v52  ;;  %v1249_v36 = vld [vmem:[#allocation15 + $0x3f0] sm:$0xff]  ;;  %v1372_v38 = vld [vmem:[#allocation15 + $0x7c8] sm:$0xff] }
 0x3e7   :  { %2870 = vmatpush1.bf16.msra.mxu0 %v4424_v6  ;;  %2829 = vmatpush1.bf16.msra.mxu1 %v4550_v56  ;;  %v1336_v6 = vld [vmem:[#allocation15 + $0x6a8] sm:$0xff]  ;;  %v4480_v56 = vcombine.low %v1197_v45, %v1201_v48  ;;  %v1253_v48 = vld [vmem:[#allocation15 + $0x410] sm:$0xff] }
 0x3e8   :  { %2871 = vmatprep.subr.bf16.mxu0 %v4433_v57  ;;  %2830 = vmatprep.subr.bf16.mxu1 %v4559_v59  ;;  %v4606_v57 = vcombine.low %v1324_v49, %v1328_v52  ;;  %v4489_v59 = vcombine.high %v1205_v62, %v1209_v63  ;;  %v4615_v7 = vcombine.high %v1332_v3, %v1336_v6  ;;  %v1257_v49 = vld [vmem:[#allocation15 + $0x430] sm:$0xff]  ;;  %v1126_v52 = vld [vmem:[#allocation15 + $0x18] sm:$0xff] }
 0x3eb   :  { %2872 = vmatpush1.bf16.msra.mxu0 %v4432_v5  ;;  %2831 = vmatpush1.bf16.msra.mxu1 %v4558_v10  ;;  %v1344_v5 = vld [vmem:[#allocation15 + $0x6e8] sm:$0xff]  ;;  %v4488_v10 = vcombine.low %v1205_v62, %v1209_v63  ;;  %v1261_v63 = vld [vmem:[#allocation15 + $0x450] sm:$0xff] }
 0x3ec   :  { %2873 = vmatprep.subr.bf16.mxu0 %v4441_v11  ;;  %2832 = vmatprep.subr.bf16.mxu1 %v4567_v12  ;;  %v4614_v11 = vcombine.low %v1332_v3, %v1336_v6  ;;  %v4497_v12 = vcombine.high %v1213_v0, %v1217_v8  ;;  %v4623_v13 = vcombine.high %v1340_v9, %v1344_v5  ;;  %v1265_v3 = vld [vmem:[#allocation15 + $0x470] sm:$0xff]  ;;  %v1134_v6 = vld [vmem:[#allocation15 + $0x58] sm:$0xff] }
 0x3ef   :  { %2874 = vmatpush1.bf16.msra.mxu0 %v4440_v19  ;;  %2833 = vmatpush1.bf16.msra.mxu1 %v4566_v20  ;;  %v1352_v19 = vld [vmem:[#allocation15 + $0x728] sm:$0xff]  ;;  %v4496_v20 = vcombine.low %v1213_v0, %v1217_v8  ;;  %v1269_v8 = vld [vmem:[#allocation15 + $0x490] sm:$0xff] }
 0x3f0   :  { %2875 = vmatprep.subr.bf16.mxu0 %v4449_v21  ;;  %2834 = vmatprep.subr.bf16.mxu1 %v4575_v37  ;;  %v4622_v21 = vcombine.low %v1340_v9, %v1344_v5  ;;  %v4505_v37 = vcombine.high %v1221_v16, %v1225_v17  ;;  %v4631_v22 = vcombine.high %v1348_v18, %v1352_v19  ;;  %v1273_v9 = vld [vmem:[#allocation15 + $0x4b0] sm:$0xff]  ;;  %v1142_v5 = vld [vmem:[#allocation15 + $0x98] sm:$0xff] }
 0x3f3   :  { %2876 = vmatpush1.bf16.msra.mxu0 %v4448_v39  ;;  %2835 = vmatpush1.bf16.msra.mxu1 %v4574_v26  ;;  %v1360_v39 = vld [vmem:[#allocation15 + $0x768] sm:$0xff]  ;;  %v4504_v26 = vcombine.low %v1221_v16, %v1225_v17  ;;  %v1277_v17 = vld [vmem:[#allocation15 + $0x4d0] sm:$0xff] }
 0x3f4   :  { %2877 = vmatprep.subr.bf16.mxu0 %v4457_v46  ;;  %2836 = vmatprep.subr.bf16.mxu1 %v4583_v28  ;;  %v4630_v46 = vcombine.low %v1348_v18, %v1352_v19  ;;  %v4513_v28 = vcombine.high %v1229_v23, %v1233_v24  ;;  %v4639_v51 = vcombine.high %v1356_v25, %v1360_v39  ;;  %v1281_v18 = vld [vmem:[#allocation15 + $0x4f0] sm:$0xff]  ;;  %v1150_v19 = vld [vmem:[#allocation15 + $0xd8] sm:$0xff] }
 0x3f7   :  { %2878 = vmatpush1.bf16.msra.mxu0 %v4456_v31  ;;  %2837 = vmatpush1.bf16.msra.mxu1 %v4582_v32  ;;  %v1368_v31 = vld [vmem:[#allocation15 + $0x7a8] sm:$0xff]  ;;  %v4512_v32 = vcombine.low %v1229_v23, %v1233_v24  ;;  %v1285_v24 = vld [vmem:[#allocation15 + $0x510] sm:$0xff] }
 0x3f8   :  { %2879 = vmatprep.subr.bf16.mxu0 %v4465_v33  ;;  %2838 = vmatprep.subr.bf16.mxu1 %v4591_v47  ;;  %v4638_v33 = vcombine.low %v1356_v25, %v1360_v39  ;;  %v4521_v47 = vcombine.high %v1237_v53, %v1241_v29  ;;  %v4647_v34 = vcombine.high %v1364_v30, %v1368_v31  ;;  %v1289_v25 = vld [vmem:[#allocation15 + $0x530] sm:$0xff]  ;;  %v1162_v39 = vld [vmem:[#allocation15 + $0x138] sm:$0xff] }
 0x3fb   :  { %2880 = vmatpush1.bf16.msra.mxu0 %v4464_v41  ;;  %2839 = vmatpush1.bf16.msra.mxu1 %v4590_v43  ;;  %v1376_v41 = vld [vmem:[#allocation15 + $0x7e8] sm:$0xff]  ;;  %v4520_v43 = vcombine.low %v1237_v53, %v1241_v29  ;;  %v1293_v53 = vld [vmem:[#allocation15 + $0x550] sm:$0xff] }
 0x3fc   :  { %2881 = vmatprep.subr.bf16.mxu0 %v4473_v60  ;;  %2840 = vmatprep.subr.bf16.mxu1 %v4599_v44  ;;  %v4646_v60 = vcombine.low %v1364_v30, %v1368_v31  ;;  %v4529_v44 = vcombine.high %v1245_v35, %v1249_v36  ;;  %v4655_v45 = vcombine.high %v1372_v38, %v1376_v41  ;;  %v1297_v29 = vld [vmem:[#allocation15 + $0x570] sm:$0xff]  ;;  %v1166_v30 = vld [vmem:[#allocation15 + $0x158] sm:$0xff] }
 0x3fd   :  { %v1170_v31 = vld [vmem:[#allocation15 + $0x178] sm:$0xff] }
 0x3ff   :  { %2882 = vmatpush1.bf16.msra.mxu0 %v4472_v54  ;;  %2841 = vmatpush1.bf16.msra.mxu1 %v4598_v55  ;;  %v1130_v54 = vld [vmem:[#allocation15 + $0x38] sm:$0xff]  ;;  %v4528_v55 = vcombine.low %v1245_v35, %v1249_v36  ;;  %v1301_v35 = vld [vmem:[#allocation15 + $0x590] sm:$0xff] }
 0x400   :  { %2883 = vmatprep.subr.bf16.mxu0 %v4481_v58  ;;  %2842 = vmatprep.subr.bf16.mxu1 %v4607_v61  ;;  %v4654_v58 = vcombine.low %v1372_v38, %v1376_v41  ;;  %v4537_v61 = vcombine.high %v1253_v48, %v1257_v49  ;;  %v4411_v62 = vcombine.high %v1126_v52, %v1130_v54  ;;  %v1305_v36 = vld [vmem:[#allocation15 + $0x5b0] sm:$0xff]  ;;  %v1174_v38 = vld [vmem:[#allocation15 + $0x198] sm:$0xff] }
 0x401   :  { %v1178_v41 = vld [vmem:[#allocation15 + $0x1b8] sm:$0xff] }
 0x403   :  { %2884 = vmatpush1.bf16.msra.mxu0 %v4480_v56  ;;  %2843 = vmatpush1.bf16.msra.mxu1 %v4606_v57  ;;  %v1138_v56 = vld [vmem:[#allocation15 + $0x78] sm:$0xff]  ;;  %v4536_v57 = vcombine.low %v1253_v48, %v1257_v49  ;;  %v1309_v48 = vld [vmem:[#allocation15 + $0x5d0] sm:$0xff] }
 0x404   :  { %2885 = vmatprep.subr.bf16.mxu0 %v4489_v59  ;;  %2844 = vmatprep.subr.bf16.mxu1 %v4615_v7  ;;  %v4410_v59 = vcombine.low %v1126_v52, %v1130_v54  ;;  %v4545_v7 = vcombine.high %v1261_v63, %v1265_v3  ;;  %v4419_v0 = vcombine.high %v1134_v6, %v1138_v56  ;;  %v1313_v49 = vld [vmem:[#allocation15 + $0x5f0] sm:$0xff]  ;;  %v1182_v52 = vld [vmem:[#allocation15 + $0x1d8] sm:$0xff] }
 0x405   :  { %v1186_v54 = vld [vmem:[#allocation15 + $0x1f8] sm:$0xff] }
 0x407   :  { %2886 = vmatpush1.bf16.msra.mxu0 %v4488_v10  ;;  %2845 = vmatpush1.bf16.msra.mxu1 %v4614_v11  ;;  %v1146_v10 = vld [vmem:[#allocation15 + $0xb8] sm:$0xff]  ;;  %v4544_v11 = vcombine.low %v1261_v63, %v1265_v3  ;;  %v1317_v63 = vld [vmem:[#allocation15 + $0x610] sm:$0xff] }
 0x408   :  { %2887 = vmatprep.subr.bf16.mxu0 %v4497_v12  ;;  %2846 = vmatprep.subr.bf16.mxu1 %v4623_v13  ;;  %v4418_v12 = vcombine.low %v1134_v6, %v1138_v56  ;;  %v4553_v13 = vcombine.high %v1269_v8, %v1273_v9  ;;  %v4427_v16 = vcombine.high %v1142_v5, %v1146_v10  ;;  %v1321_v3 = vld [vmem:[#allocation15 + $0x630] sm:$0xff]  ;;  %v1190_v6 = vld [vmem:[#allocation15 + $0x218] sm:$0xff] }
 0x409   :  { %v1194_v56 = vld [vmem:[#allocation15 + $0x238] sm:$0xff] }
 0x40b   :  { %2888 = vmatpush1.bf16.msra.mxu0 %v4496_v20  ;;  %2847 = vmatpush1.bf16.msra.mxu1 %v4622_v21  ;;  %v1154_v20 = vld [vmem:[#allocation15 + $0xf8] sm:$0xff]  ;;  %v4552_v21 = vcombine.low %v1269_v8, %v1273_v9  ;;  %v1325_v8 = vld [vmem:[#allocation15 + $0x650] sm:$0xff] }
 0x40c   :  { %2889 = vmatprep.subr.bf16.mxu0 %v4505_v37  ;;  %2848 = vmatprep.subr.bf16.mxu1 %v4631_v22  ;;  %v4426_v37 = vcombine.low %v1142_v5, %v1146_v10  ;;  %v4561_v22 = vcombine.high %v1277_v17, %v1281_v18  ;;  %v4435_v23 = vcombine.high %v1150_v19, %v1154_v20  ;;  %v1329_v9 = vld [vmem:[#allocation15 + $0x670] sm:$0xff]  ;;  %v1198_v5 = vld [vmem:[#allocation15 + $0x258] sm:$0xff] }
 0x40d   :  { %v1202_v10 = vld [vmem:[#allocation15 + $0x278] sm:$0xff] }
 0x40f   :  { %2890 = vmatpush1.bf16.msra.mxu0 %v4504_v26  ;;  %2849 = vmatpush1.bf16.msra.mxu1 %v4630_v46  ;;  %v4560_v26 = vcombine.low %v1277_v17, %v1281_v18  ;;  %v4434_v46 = vcombine.low %v1150_v19, %v1154_v20  ;;  %v1333_v17 = vld [vmem:[#allocation15 + $0x690] sm:$0xff]  ;;  %v1206_v19 = vld [vmem:[#allocation15 + $0x298] sm:$0xff] }
 0x410   :  { %2891 = vmatprep.subr.bf16.mxu0 %v4513_v28  ;;  %2850 = vmatprep.subr.bf16.mxu1 %v4639_v51  ;;  %v4569_v28 = vcombine.high %v1285_v24, %v1289_v25  ;;  %v1337_v18 = vld [vmem:[#allocation15 + $0x6b0] sm:$0xff]  ;;  %v1210_v20 = vld [vmem:[#allocation15 + $0x2b8] sm:$0xff] }
 0x413   :  { %2892 = vmatpush1.bf16.msra.mxu0 %v4512_v32  ;;  %2851 = vmatpush1.bf16.msra.mxu1 %v4638_v33  ;;  %v4568_v32 = vcombine.low %v1285_v24, %v1289_v25  ;;  %v1341_v24 = vld [vmem:[#allocation15 + $0x6d0] sm:$0xff] }
 0x414   :  { %2893 = vmatprep.subr.bf16.mxu0 %v4521_v47  ;;  %2852 = vmatprep.subr.bf16.mxu1 %v4647_v34  ;;  %v4577_v47 = vcombine.high %v1293_v53, %v1297_v29  ;;  %v4451_v34 = vcombine.high %v1166_v30, %v1170_v31  ;;  %v1345_v25 = vld [vmem:[#allocation15 + $0x6f0] sm:$0xff] }
 0x417   :  { %2894 = vmatpush1.bf16.msra.mxu0 %v4520_v43  ;;  %2853 = vmatpush1.bf16.msra.mxu1 %v4646_v60  ;;  %v4576_v43 = vcombine.low %v1293_v53, %v1297_v29  ;;  %v4450_v60 = vcombine.low %v1166_v30, %v1170_v31  ;;  %v1349_v53 = vld [vmem:[#allocation15 + $0x710] sm:$0xff]  ;;  %v1222_v30 = vld [vmem:[#allocation15 + $0x318] sm:$0xff] }
 0x418   :  { %2895 = vmatprep.subr.bf16.mxu0 %v4529_v44  ;;  %2854 = vmatprep.subr.bf16.mxu1 %v4655_v45  ;;  %v4585_v44 = vcombine.high %v1301_v35, %v1305_v36  ;;  %v4459_v45 = vcombine.high %v1174_v38, %v1178_v41  ;;  %v1353_v29 = vld [vmem:[#allocation15 + $0x730] sm:$0xff]  ;;  %v1226_v31 = vld [vmem:[#allocation15 + $0x338] sm:$0xff] }
 0x41b   :  { %2896 = vmatpush1.bf16.msra.mxu0 %v4528_v55  ;;  %2855 = vmatpush1.bf16.msra.mxu1 %v4654_v58  ;;  %v4584_v55 = vcombine.low %v1301_v35, %v1305_v36  ;;  %v4458_v58 = vcombine.low %v1174_v38, %v1178_v41  ;;  %v1357_v35 = vld [vmem:[#allocation15 + $0x750] sm:$0xff]  ;;  %v1230_v38 = vld [vmem:[#allocation15 + $0x358] sm:$0xff] }
 0x41c   :  { %2906 = vmatprep.subr.bf16.mxu0 %v4537_v61  ;;  %2947 = vmatprep.subr.bf16.mxu1 %v4411_v62  ;;  %v4593_v61 = vcombine.high %v1309_v48, %v1313_v49  ;;  %v4467_v62 = vcombine.high %v1182_v52, %v1186_v54  ;;  %v1361_v36 = vld [vmem:[#allocation15 + $0x770] sm:$0xff]  ;;  %v1234_v41 = vld [vmem:[#allocation15 + $0x378] sm:$0xff] }
 0x41e   :  { %2898 = vmatmul.mubr.bf16.vlgmr.msra.gmra.mrb[8].mxu0 %v5739_v15  ;;  %2857 = vmatmul.mubr.bf16.vlgmr.msra.gmra.mrb[16].mxu1 %v5781_v42 }
 0x41f   :  { %2907 = vmatpush1.bf16.msra.mxu0 %v4536_v57  ;;  %2938 = vmatprep.mubr.bf16.mxu0 %v5779_v40  ;;  %v4592_v57 = vcombine.low %v1309_v48, %v1313_v49  ;;  %v1365_v48 = vld [vmem:[#allocation15 + $0x790] sm:$0xff] }
 0x420   :  { %2948 = vmatpush1.bf16.msra.mxu1 %v4410_v59  ;;  %2979 = vmatprep.mubr.bf16.mxu1 %v5737_v14  ;;  %v1158_v14 = vld [vmem:[#allocation15 + $0x118] sm:$0xff]  ;;  %v4466_v59 = vcombine.low %v1182_v52, %v1186_v54  ;;  %v1369_v49 = vld [vmem:[#allocation15 + $0x7b0] sm:$0xff] }
 0x421   :  { %2908 = vmatprep.subr.bf16.mxu0 %v4545_v7  ;;  %2949 = vmatprep.subr.bf16.mxu1 %v4419_v0  ;;  %v4443_v51 = vcombine.high %v1158_v14, %v1162_v39  ;;  %v4442_v33 = vcombine.low %v1158_v14, %v1162_v39  ;;  %v4601_v7 = vcombine.high %v1317_v63, %v1321_v3  ;;  %v1214_v14 = vld [vmem:[#allocation15 + $0x2d8] sm:$0xff] }
 0x422   :  { %v4475_v0 = vcombine.high %v1190_v6, %v1194_v56  ;;  %v1218_v39 = vld [vmem:[#allocation15 + $0x2f8] sm:$0xff] }
 0x423   :  { %2909 = vmatpush1.bf16.msra.mxu0 %v4544_v11  ;;  %v4600_v11 = vcombine.low %v1317_v63, %v1321_v3  ;;  %v1238_v52 = vld [vmem:[#allocation15 + $0x398] sm:$0xff]  ;;  %v1373_v63 = vld [vmem:[#allocation15 + $0x7d0] sm:$0xff] }
 0x424   :  { %2950 = vmatpush1.bf16.msra.mxu1 %v4418_v12  ;;  %2910 = vmatprep.subr.bf16.mxu0 %v4553_v13  ;;  %v4474_v12 = vcombine.low %v1190_v6, %v1194_v56  ;;  %v4609_v13 = vcombine.high %v1325_v8, %v1329_v9  ;;  %v1242_v54 = vld [vmem:[#allocation15 + $0x3b8] sm:$0xff]  ;;  %v1377_v3 = vld [vmem:[#allocation15 + $0x7f0] sm:$0xff] }
 0x425   :  { %2951 = vmatprep.subr.bf16.mxu1 %v4427_v16  ;;  %v4483_v16 = vcombine.high %v1198_v5, %v1202_v10  ;;  %v1246_v6 = vld [vmem:[#allocation15 + $0x3d8] sm:$0xff] }
 0x426   :  { %v1250_v56 = vld [vmem:[#allocation15 + $0x3f8] sm:$0xff] }
 0x427   :  { %2911 = vmatpush1.bf16.msra.mxu0 %v4552_v21  ;;  %v4608_v21 = vcombine.low %v1325_v8, %v1329_v9  ;;  %v1254_v8 = vld [vmem:[#allocation15 + $0x418] sm:$0xff] }
 0x428   :  { %2952 = vmatpush1.bf16.msra.mxu1 %v4426_v37  ;;  %2912 = vmatprep.subr.bf16.mxu0 %v4561_v22  ;;  %v4482_v37 = vcombine.low %v1198_v5, %v1202_v10  ;;  %v4617_v22 = vcombine.high %v1333_v17, %v1337_v18  ;;  %v1258_v9 = vld [vmem:[#allocation15 + $0x438] sm:$0xff]  ;;  %v4656_v5 = vcombine.low %v1373_v63, %v1377_v3 }
 0x429   :  { %2953 = vmatprep.subr.bf16.mxu1 %v4435_v23  ;;  %v4491_v23 = vcombine.high %v1206_v19, %v1210_v20  ;;  %v4530_v10 = vcombine.low %v1246_v6, %v1250_v56 }
 0x42b   :  { %2913 = vmatpush1.bf16.msra.mxu0 %v4560_v26  ;;  %v4616_v26 = vcombine.low %v1333_v17, %v1337_v18  ;;  %v4978_v17 = vld [vmem:[#allocation17] ss:$8 sps:$4 sm:$0xff]   ;;  %v4538_v18 = vcombine.low %v1254_v8, %v1258_v9 }
 0x42c   :  { %2954 = vmatpush1.bf16.msra.mxu1 %v4434_v46  ;;  %2914 = vmatprep.subr.bf16.mxu0 %v4569_v28  ;;  %v4490_v46 = vcombine.low %v1206_v19, %v1210_v20  ;;  %v4625_v28 = vcombine.high %v1341_v24, %v1345_v25  ;;  %v4983_v20 = vld [vmem:[#allocation17 + $0x14] ss:$8 sps:$4 sm:$0xff]  }
 0x42d   :  { %2955 = vmatprep.subr.bf16.mxu1 %v4443_v51  ;;  %v4499_v51 = vcombine.high %v1214_v14, %v1218_v39 }
 0x42f   :  { %2915 = vmatpush1.bf16.msra.mxu0 %v4568_v32  ;;  %v4624_v32 = vcombine.low %v1341_v24, %v1345_v25  ;;  %v4986_v24 = vld [vmem:[#allocation17 + $0x24] ss:$8 sps:$4 sm:$0xff]  }
 0x430   :  { %2956 = vmatpush1.bf16.msra.mxu1 %v4442_v33  ;;  %2916 = vmatprep.subr.bf16.mxu0 %v4577_v47  ;;  %v4498_v33 = vcombine.low %v1214_v14, %v1218_v39  ;;  %v4633_v47 = vcombine.high %v1349_v53, %v1353_v29  ;;  %v1278_v14 = vld [vmem:[#allocation15 + $0x4d8] sm:$0xff] }
 0x431   :  { %2957 = vmatprep.subr.bf16.mxu1 %v4451_v34  ;;  %v4507_v34 = vcombine.high %v1222_v30, %v1226_v31  ;;  %v1282_v39 = vld [vmem:[#allocation15 + $0x4f8] sm:$0xff] }
 0x433   :  { %2917 = vmatpush1.bf16.msra.mxu0 %v4576_v43  ;;  %v4632_v43 = vcombine.low %v1349_v53, %v1353_v29  ;;  %v1290_v53 = vld [vmem:[#allocation15 + $0x538] sm:$0xff] }
 0x434   :  { %2958 = vmatpush1.bf16.msra.mxu1 %v4450_v60  ;;  %2918 = vmatprep.subr.bf16.mxu0 %v4585_v44  ;;  %v4506_v60 = vcombine.low %v1222_v30, %v1226_v31  ;;  %v4641_v44 = vcombine.high %v1357_v35, %v1361_v36  ;;  %v4987_v29 = vld [vmem:[#allocation17 + $0x30] ss:$8 sps:$4 sm:$0xff]   ;;  %v4992_v30 = vld [vmem:[#allocation17 + $0x44] ss:$8 sps:$4 sm:$0xff]  }
 0x435   :  { %2959 = vmatprep.subr.bf16.mxu1 %v4459_v45  ;;  %v4515_v45 = vcombine.high %v1230_v38, %v1234_v41 }
 0x437   :  { %2919 = vmatpush1.bf16.msra.mxu0 %v4584_v55  ;;  %v4640_v55 = vcombine.low %v1357_v35, %v1361_v36  ;;  %v4995_v35 = vld [vmem:[#allocation17 + $0x54] ss:$8 sps:$4 sm:$0xff]  }
 0x438   :  { %2960 = vmatpush1.bf16.msra.mxu1 %v4458_v58  ;;  %2920 = vmatprep.subr.bf16.mxu0 %v4593_v61  ;;  %v4514_v58 = vcombine.low %v1230_v38, %v1234_v41  ;;  %v4649_v61 = vcombine.high %v1365_v48, %v1369_v49  ;;  %v1302_v38 = vld [vmem:[#allocation15 + $0x598] sm:$0xff] }
 0x439   :  { %2961 = vmatprep.subr.bf16.mxu1 %v4467_v62  ;;  %v4523_v62 = vcombine.high %v1238_v52, %v1242_v54  ;;  %v1306_v41 = vld [vmem:[#allocation15 + $0x5b8] sm:$0xff] }
 0x43b   :  { %2921 = vmatpush1.bf16.msra.mxu0 %v4592_v57  ;;  %v4648_v57 = vcombine.low %v1365_v48, %v1369_v49  ;;  %v4587_v48 = vcombine.high %v1302_v38, %v1306_v41 }
 0x43c   :  { %2962 = vmatpush1.bf16.msra.mxu1 %v4466_v59  ;;  %2922 = vmatprep.subr.bf16.mxu0 %v4601_v7  ;;  %v4522_v59 = vcombine.low %v1238_v52, %v1242_v54  ;;  %v4657_v7 = vcombine.high %v1373_v63, %v1377_v3  ;;  %v1310_v52 = vld [vmem:[#allocation15 + $0x5d8] sm:$0xff] }
 0x43d   :  { %2963 = vmatprep.subr.bf16.mxu1 %v4475_v0  ;;  %v4531_v0 = vcombine.high %v1246_v6, %v1250_v56  ;;  %v1314_v54 = vld [vmem:[#allocation15 + $0x5f8] sm:$0xff] }
 0x43e   :  { %v5001_v63 = vld [vmem:[#allocation17 + $0x74] ss:$8 sps:$4 sm:$0xff]   ;;  %v4595_v3 = vcombine.high %v1310_v52, %v1314_v54 }
 0x43f   :  { %2923 = vmatpush1.bf16.msra.mxu0 %v4600_v11  ;;  %v4980_v11 = vld [vmem:[#allocation17 + $0x4] ss:$8 sps:$4 sm:$0xff]   ;;  %v1318_v6 = vld [vmem:[#allocation15 + $0x618] sm:$0xff] }
 0x440   :  { %2964 = vmatpush1.bf16.msra.mxu1 %v4474_v12  ;;  %2924 = vmatprep.subr.bf16.mxu0 %v4609_v13  ;;  %v4539_v12 = vcombine.high %v1254_v8, %v1258_v9  ;;  %v1262_v13 = vld [vmem:[#allocation15 + $0x458] sm:$0xff] }
 0x441   :  { %2965 = vmatprep.subr.bf16.mxu1 %v4483_v16  ;;  %v1266_v16 = vld [vmem:[#allocation15 + $0x478] sm:$0xff] }
 0x442   :  { %v4547_v19 = vcombine.high %v1262_v13, %v1266_v16  ;;  %v1322_v56 = vld [vmem:[#allocation15 + $0x638] sm:$0xff] }
 0x443   :  { %2925 = vmatpush1.bf16.msra.mxu0 %v4608_v21  ;;  %v1270_v21 = vld [vmem:[#allocation15 + $0x498] sm:$0xff] }
 0x444   :  { %2966 = vmatpush1.bf16.msra.mxu1 %v4482_v37  ;;  %2926 = vmatprep.subr.bf16.mxu0 %v4617_v22  ;;  %v1274_v37 = vld [vmem:[#allocation15 + $0x4b8] sm:$0xff] }
 0x445   :  { %2967 = vmatprep.subr.bf16.mxu1 %v4491_v23  ;;  %v4981_v22 = vld [vmem:[#allocation17 + $0x10] ss:$8 sps:$4 sm:$0xff]   ;;  %v4546_v23 = vcombine.low %v1262_v13, %v1266_v16  ;;  %v4555_v25 = vcombine.high %v1270_v21, %v1274_v37 }
 0x446   :  { %v1326_v8 = vld [vmem:[#allocation15 + $0x658] sm:$0xff] }
 0x447   :  { %2927 = vmatpush1.bf16.msra.mxu0 %v4616_v26  ;;  %v4984_v26 = vld [vmem:[#allocation17 + $0x20] ss:$8 sps:$4 sm:$0xff]   ;;  %v1330_v9 = vld [vmem:[#allocation15 + $0x678] sm:$0xff] }
 0x448   :  { %2968 = vmatpush1.bf16.msra.mxu1 %v4490_v46  ;;  %2928 = vmatprep.subr.bf16.mxu0 %v4625_v28  ;;  %v4554_v46 = vcombine.low %v1270_v21, %v1274_v37  ;;  %v4989_v28 = vld [vmem:[#allocation17 + $0x34] ss:$8 sps:$4 sm:$0xff]  }
 0x449   :  { %2969 = vmatprep.subr.bf16.mxu1 %v4499_v51  ;;  %v1286_v51 = vld [vmem:[#allocation15 + $0x518] sm:$0xff] }
 0x44a   :  { %v4571_v31 = vcombine.high %v1286_v51, %v1290_v53  ;;  %v1334_v13 = vld [vmem:[#allocation15 + $0x698] sm:$0xff] }
 0x44b   :  { %2929 = vmatpush1.bf16.msra.mxu0 %v4624_v32  ;;  %v1294_v32 = vld [vmem:[#allocation15 + $0x558] sm:$0xff] }
 0x44c   :  { %2970 = vmatpush1.bf16.msra.mxu1 %v4498_v33  ;;  %2930 = vmatprep.subr.bf16.mxu0 %v4633_v47  ;;  %v1298_v33 = vld [vmem:[#allocation15 + $0x578] sm:$0xff]  ;;  %v4990_v47 = vld [vmem:[#allocation17 + $0x40] ss:$8 sps:$4 sm:$0xff]  }
 0x44d   :  { %2971 = vmatprep.subr.bf16.mxu1 %v4507_v34  ;;  %v4570_v34 = vcombine.low %v1286_v51, %v1290_v53  ;;  %v4579_v36 = vcombine.high %v1294_v32, %v1298_v33  ;;  %v1338_v16 = vld [vmem:[#allocation15 + $0x6b8] sm:$0xff] }
 0x44e   :  { %v1342_v21 = vld [vmem:[#allocation15 + $0x6d8] sm:$0xff] }
 0x44f   :  { %2931 = vmatpush1.bf16.msra.mxu0 %v4632_v43  ;;  %v4993_v43 = vld [vmem:[#allocation17 + $0x50] ss:$8 sps:$4 sm:$0xff]  }
 0x450   :  { %2972 = vmatpush1.bf16.msra.mxu1 %v4506_v60  ;;  %2932 = vmatprep.subr.bf16.mxu0 %v4641_v44  ;;  %v4578_v60 = vcombine.low %v1294_v32, %v1298_v33  ;;  %v4998_v44 = vld [vmem:[#allocation17 + $0x64] ss:$8 sps:$4 sm:$0xff]   ;;  %v1346_v37 = vld [vmem:[#allocation15 + $0x6f8] sm:$0xff] }
 0x451   :  { %2973 = vmatprep.subr.bf16.mxu1 %v4515_v45  ;;  %v1358_v51 = vld [vmem:[#allocation15 + $0x758] sm:$0xff] }
 0x452   :  { %v1362_v53 = vld [vmem:[#allocation15 + $0x778] sm:$0xff] }
 0x453   :  { %2933 = vmatpush1.bf16.msra.mxu0 %v4640_v55  ;;  %v1366_v32 = vld [vmem:[#allocation15 + $0x798] sm:$0xff] }
 0x454   :  { %2974 = vmatpush1.bf16.msra.mxu1 %v4514_v58  ;;  %2934 = vmatprep.subr.bf16.mxu0 %v4649_v61  ;;  %v4996_v58 = vld [vmem:[#allocation17 + $0x60] ss:$8 sps:$4 sm:$0xff]   ;;  %v1370_v33 = vld [vmem:[#allocation15 + $0x7b8] sm:$0xff] }
 0x455   :  { %2975 = vmatprep.subr.bf16.mxu1 %v4523_v62  ;;  %v4586_v62 = vcombine.low %v1302_v38, %v1306_v41  ;;  %v1374_v38 = vld [vmem:[#allocation15 + $0x7d8] sm:$0xff] }
 0x456   :  { %v1378_v41 = vld [vmem:[#allocation15 + $0x7f8] sm:$0xff] }
 0x457   :  { %2935 = vmatpush1.bf16.msra.mxu0 %v4648_v57  ;;  %v4999_v57 = vld [vmem:[#allocation17 + $0x70] ss:$8 sps:$4 sm:$0xff]  }
 0x458   :  { %2976 = vmatpush1.bf16.msra.mxu1 %v4522_v59  ;;  %2936 = vmatprep.subr.bf16.mxu0 %v4657_v7  ;;  %v4594_v59 = vcombine.low %v1310_v52, %v1314_v54  ;;  %v5004_v7 = vld [vmem:[#allocation17 + $0x84] ss:$8 sps:$4 sm:$0xff]   ;;  %v5023_v52 = vld [vmem:[#allocation17 + $0xf0] ss:$8 sps:$4 sm:$0xff]   ;;  %v4658_v54 = vcombine.low %v1374_v38, %v1378_v41 }
 0x459   :  { %2977 = vmatprep.subr.bf16.mxu1 %v4531_v0  ;;  %v4603_v0 = vcombine.high %v1318_v6, %v1322_v56 }
 0x45b   :  { %2937 = vmatpush1.bf16.msra.mxu0 %v4656_v5  ;;  %v5002_v5 = vld [vmem:[#allocation17 + $0x80] ss:$8 sps:$4 sm:$0xff]  }
 0x45c   :  { %2978 = vmatpush1.bf16.msra.mxu1 %v4530_v10  ;;  %4133 = vmatprep.subr.bf16.mxu0 %v4980_v11  ;;  %v4602_v10 = vcombine.low %v1318_v6, %v1322_v56  ;;  %v5007_v11 = vld [vmem:[#allocation17 + $0x94] ss:$8 sps:$4 sm:$0xff]  }
 0x45d   :  { %2988 = vmatprep.subr.bf16.mxu1 %v4539_v12  ;;  %v4611_v12 = vcombine.high %v1326_v8, %v1330_v9 }
 0x45e   :  { %2939 = vmatmul.mubr.bf16.vlgmr.msra.gmra.mrb[8].mxu0 %v5781_v42 }
 0x45f   :  { %2980 = vmatmul.mubr.bf16.vlgmr.msra.gmra.mrb[20].mxu1 %v5739_v15  ;;  %4134 = vmatpush1.bf16.msra.mxu0 %v4978_v17  ;;  %v4563_v15 = vcombine.high %v1278_v14, %v1282_v39  ;;  %v5005_v17 = vld [vmem:[#allocation17 + $0x90] ss:$8 sps:$4 sm:$0xff]  }
 0x460   :  { %2989 = vmatpush1.bf16.msra.mxu1 %v4538_v18  ;;  %3020 = vmatprep.mubr.bf16.mxu1 %v5779_v40  ;;  %v4562_v40 = vcombine.low %v1278_v14, %v1282_v39  ;;  %v4610_v18 = vcombine.low %v1326_v8, %v1330_v9  ;;  %v1350_v14 = vld [vmem:[#allocation15 + $0x718] sm:$0xff] }
 0x461   :  { %2990 = vmatprep.subr.bf16.mxu1 %v4547_v19  ;;  %4135 = vmatprep.subr.bf16.mxu0 %v4983_v20  ;;  %v5010_v19 = vld [vmem:[#allocation17 + $0xa4] ss:$8 sps:$4 sm:$0xff]   ;;  %v4619_v20 = vcombine.high %v1334_v13, %v1338_v16  ;;  %v1354_v39 = vld [vmem:[#allocation15 + $0x738] sm:$0xff] }
 0x463   :  { %4136 = vmatpush1.bf16.msra.mxu0 %v4981_v22  ;;  %v5008_v22 = vld [vmem:[#allocation17 + $0xa0] ss:$8 sps:$4 sm:$0xff]  }
 0x464   :  { %2991 = vmatpush1.bf16.msra.mxu1 %v4546_v23  ;;  %4137 = vmatprep.subr.bf16.mxu0 %v4986_v24  ;;  %v4618_v23 = vcombine.low %v1334_v13, %v1338_v16  ;;  %v5013_v24 = vld [vmem:[#allocation17 + $0xb4] ss:$8 sps:$4 sm:$0xff]  }
 0x465   :  { %2992 = vmatprep.subr.bf16.mxu1 %v4555_v25  ;;  %v4627_v25 = vcombine.high %v1342_v21, %v1346_v37 }
 0x467   :  { %4138 = vmatpush1.bf16.msra.mxu0 %v4984_v26  ;;  %v5011_v26 = vld [vmem:[#allocation17 + $0xb0] ss:$8 sps:$4 sm:$0xff]  }
 0x468   :  { %2993 = vmatpush1.bf16.msra.mxu1 %v4554_v46  ;;  %4139 = vmatprep.subr.bf16.mxu0 %v4989_v28  ;;  %v4626_v46 = vcombine.low %v1342_v21, %v1346_v37  ;;  %v5016_v28 = vld [vmem:[#allocation17 + $0xc4] ss:$8 sps:$4 sm:$0xff]  }
 0x469   :  { %2994 = vmatprep.subr.bf16.mxu1 %v4563_v15  ;;  %v4635_v15 = vcombine.high %v1350_v14, %v1354_v39 }
 0x46b   :  { %4140 = vmatpush1.bf16.msra.mxu0 %v4987_v29  ;;  %v5014_v29 = vld [vmem:[#allocation17 + $0xc0] ss:$8 sps:$4 sm:$0xff]  }
 0x46c   :  { %2995 = vmatpush1.bf16.msra.mxu1 %v4562_v40  ;;  %4141 = vmatprep.subr.bf16.mxu0 %v4992_v30  ;;  %v4634_v40 = vcombine.low %v1350_v14, %v1354_v39  ;;  %v5019_v30 = vld [vmem:[#allocation17 + $0xd4] ss:$8 sps:$4 sm:$0xff]  }
 0x46d   :  { %2996 = vmatprep.subr.bf16.mxu1 %v4571_v31  ;;  %v4643_v31 = vcombine.high %v1358_v51, %v1362_v53 }
 0x46f   :  { %4142 = vmatpush1.bf16.msra.mxu0 %v4990_v47  ;;  %v5017_v47 = vld [vmem:[#allocation17 + $0xd0] ss:$8 sps:$4 sm:$0xff]  }
 0x470   :  { %2997 = vmatpush1.bf16.msra.mxu1 %v4570_v34  ;;  %4143 = vmatprep.subr.bf16.mxu0 %v4995_v35  ;;  %v4642_v34 = vcombine.low %v1358_v51, %v1362_v53  ;;  %v5022_v35 = vld [vmem:[#allocation17 + $0xe4] ss:$8 sps:$4 sm:$0xff]  }
 0x471   :  { %v5798_v45 = vpop.f32.mrb[12].mxu1  ;;  %2998 = vmatprep.subr.bf16.mxu1 %v4579_v36  ;;  %v4651_v36 = vcombine.high %v1366_v32, %v1370_v33 }
 0x472   :  { %v5800_v49 = vpop.f32.mrb[13].mxu1 }
 0x473   :  { %v2739_v55 = vpop.f32.mrb[14].mxu1  ;;  %4144 = vmatpush1.bf16.msra.mxu0 %v4993_v43  ;;  %v5020_v43 = vld [vmem:[#allocation17 + $0xe0] ss:$8 sps:$4 sm:$0xff]  }
 0x474   :  { %2999 = vmatpush1.bf16.msra.mxu1 %v4578_v60  ;;  %v2740_v61 = vpop.f32.mrb[15].mxu1  ;;  %4145 = vmatprep.subr.bf16.mxu0 %v4998_v44  ;;  %v4650_v60 = vcombine.low %v1366_v32, %v1370_v33  ;;  %v5025_v44 = vld [vmem:[#allocation17 + $0xf4] ss:$8 sps:$4 sm:$0xff]   ;;  %v5028_v55 = vld [vmem:[#allocation17 + $0x104] ss:$8 sps:$4 sm:$0xff]  }
 0x475   :  { %3000 = vmatprep.subr.bf16.mxu1 %v4587_v48  ;;  %v4659_v48 = vcombine.high %v1374_v38, %v1378_v41  ;;  %v5822_v38 = vld [vmem:[%s5953_s14] sm:$0xff] }
 0x477   :  { %4146 = vmatpush1.bf16.msra.mxu0 %v4996_v58  ;;  %v5806_v58 = vld [vmem:[%s5951_s12] sm:$0xff] }
 0x478   :  { %3001 = vmatpush1.bf16.msra.mxu1 %v4586_v62  ;;  %4147 = vmatprep.subr.bf16.mxu0 %v5001_v63  ;;  %v1384_v61 = vrot.slane %v5806_v58, %v5679_v2  ;;  %v1388_v62 = vrot.slane %v5806_v58, %v5682_v4 }
 0x479   :  { %3002 = vmatprep.subr.bf16.mxu1 %v4595_v3 }
 0x47a   :  { %v2736_v63 = vadd.f32 %v5798_v45, %v1384_v61  ;;  %v2738_v3 = vadd.f32 %v5800_v49, %v1388_v62  ;;  %v3264_v62 = vrot.slane %v5822_v38, %v5682_v4 }
 0x47b   :  { %4148 = vmatpush1.bf16.msra.mxu0 %v4999_v57 }
 0x47c   :  { %3003 = vmatpush1.bf16.msra.mxu1 %v4594_v59  ;;  %4149 = vmatprep.subr.bf16.mxu0 %v5004_v7 }
 0x47d   :  { %3004 = vmatprep.subr.bf16.mxu1 %v4603_v0 }
 0x47f   :  { %4150 = vmatpush1.bf16.msra.mxu0 %v5002_v5 }
 0x480   :  { %3005 = vmatpush1.bf16.msra.mxu1 %v4602_v10  ;;  %4151 = vmatprep.subr.bf16.mxu0 %v5007_v11 }
 0x481   :  { %3006 = vmatprep.subr.bf16.mxu1 %v4611_v12 }
 0x483   :  { %4152 = vmatpush1.bf16.msra.mxu0 %v5005_v17 }
 0x484   :  { %3007 = vmatpush1.bf16.msra.mxu1 %v4610_v18  ;;  %4153 = vmatprep.subr.bf16.mxu0 %v5010_v19 }
 0x485   :  { %3008 = vmatprep.subr.bf16.mxu1 %v4619_v20 }
 0x487   :  { %4154 = vmatpush1.bf16.msra.mxu0 %v5008_v22 }
 0x488   :  { %3009 = vmatpush1.bf16.msra.mxu1 %v4618_v23  ;;  %4155 = vmatprep.subr.bf16.mxu0 %v5013_v24 }
 0x489   :  { %3010 = vmatprep.subr.bf16.mxu1 %v4627_v25 }
 0x48b   :  { %4156 = vmatpush1.bf16.msra.mxu0 %v5011_v26 }
 0x48c   :  { %3011 = vmatpush1.bf16.msra.mxu1 %v4626_v46  ;;  %4157 = vmatprep.subr.bf16.mxu0 %v5016_v28 }
 0x48d   :  { %3012 = vmatprep.subr.bf16.mxu1 %v4635_v15 }
 0x48f   :  { %4158 = vmatpush1.bf16.msra.mxu0 %v5014_v29 }
 0x490   :  { %3013 = vmatpush1.bf16.msra.mxu1 %v4634_v40  ;;  %4159 = vmatprep.subr.bf16.mxu0 %v5019_v30 }
 0x491   :  { %3014 = vmatprep.subr.bf16.mxu1 %v4643_v31 }
 0x493   :  { %4160 = vmatpush1.bf16.msra.mxu0 %v5017_v47 }
 0x494   :  { %3015 = vmatpush1.bf16.msra.mxu1 %v4642_v34  ;;  %4161 = vmatprep.subr.bf16.mxu0 %v5022_v35 }
 0x495   :  { %3016 = vmatprep.subr.bf16.mxu1 %v4651_v36  ;;  %v5817_v36 = vld [vmem:[%s5952_s13] sm:$0xff] }
 0x497   :  { %4162 = vmatpush1.bf16.msra.mxu0 %v5020_v43  ;;  %v3210_v43 = vrot.slane %v5817_v36, %v5679_v2 }
 0x498   :  { %3017 = vmatpush1.bf16.msra.mxu1 %v4650_v60  ;;  %4163 = vmatprep.subr.bf16.mxu0 %v5025_v44 }
 0x499   :  { %3018 = vmatprep.subr.bf16.mxu1 %v4659_v48  ;;  %v3214_v48 = vrot.slane %v5817_v36, %v5682_v4 }
 0x49b   :  { %4164 = vmatpush1.bf16.msra.mxu0 %v5023_v52 }
 0x49c   :  { %3019 = vmatpush1.bf16.msra.mxu1 %v4658_v54  ;;  %4174 = vmatprep.subr.bf16.mxu0 %v5028_v55  ;;  %v3260_v55 = vrot.slane %v5822_v38, %v5679_v2 }
 0x49f   :  { %3021 = vmatmul.mubr.bf16.vlgmr.msra.gmra.mrb[20].mxu1 %v5781_v42 }
 0x4b1   :  { %v2776_v6 = vpop.f32.mrb[4].mxu0 }
 0x4b2   :  { %v2777_v56 = vadd.f32 %v2776_v6, %v2736_v63  ;;  %v2778_v57 = vpop.f32.mrb[5].mxu0 }
 0x4b3   :  { %v2779_v59 = vadd.f32 %v2778_v57, %v2738_v3  ;;  %v2780_v42 = vpop.f32.mrb[6].mxu0 }
 0x4b4   :  { %v3029_v7 = vrot.slane %v2777_v56, 4  ;;  %v3085_v0 = vmul.f32 %v2777_v56, %v2777_v56  ;;  %v2781_v8 = vpop.f32.mrb[7].mxu0 }
 0x4b5   :  { %v3035_v9 = vrot.slane %v2779_v59, 4  ;;  %v3086_v5 = vmul.f32 %v2779_v59, %v2779_v59  ;;  %v5026_v8 = vld [vmem:[#allocation17 + $0x100] ss:$8 sps:$4 sm:$0xff]  }
 0x4b6   :  { %v3030_v10 = vadd.f32 %v3029_v7, %v2777_v56  ;;  %v3093_v11 = vrot.slane %v3085_v0, 4 }
 0x4b7   :  { %v3036_v12 = vadd.f32 %v3035_v9, %v2779_v59  ;;  %v3099_v13 = vrot.slane %v3086_v5, 4 }
 0x4b8   :  { %v3031_v16 = vrot.slane %v3030_v10, 2  ;;  %v3094_v17 = vadd.f32 %v3093_v11, %v3085_v0  ;;  %v5034_v11 = vld [vmem:[#allocation17 + $0x124] ss:$8 sps:$4 sm:$0xff]  }
 0x4b9   :  { %v3037_v18 = vrot.slane %v3036_v12, 2  ;;  %v3100_v45 = vadd.f32 %v3099_v13, %v3086_v5  ;;  %v5031_v5 = vld [vmem:[#allocation17 + $0x114] ss:$8 sps:$4 sm:$0xff]  }
 0x4ba   :  { %v3032_v19 = vadd.f32 %v3031_v16, %v3030_v10  ;;  %v3095_v49 = vrot.slane %v3094_v17, 2  ;;  %v5029_v10 = vld [vmem:[#allocation17 + $0x110] ss:$8 sps:$4 sm:$0xff]   ;;  %v5037_v13 = vld [vmem:[#allocation17 + $0x134] ss:$8 sps:$4 sm:$0xff]  }
 0x4bb   :  { %v3038_v20 = vadd.f32 %v3037_v18, %v3036_v12  ;;  %v3101_v21 = vrot.slane %v3100_v45, 2  ;;  %v5032_v12 = vld [vmem:[#allocation17 + $0x120] ss:$8 sps:$4 sm:$0xff]   ;;  %v5035_v16 = vld [vmem:[#allocation17 + $0x130] ss:$8 sps:$4 sm:$0xff]   ;;  %v1392_v18 = vrot.slane %v5806_v58, %v5748_v27 }
 0x4bc   :  { %v3033_v37 = vrot.slane %v3032_v19, 1  ;;  %v3096_v22 = vadd.f32 %v3095_v49, %v3094_v17  ;;  %v5040_v17 = vld [vmem:[#allocation17 + $0x144] ss:$8 sps:$4 sm:$0xff]   ;;  %v5043_v49 = vld [vmem:[#allocation17 + $0x154] ss:$8 sps:$4 sm:$0xff]  }
 0x4bd   :  { %v3039_v23 = vrot.slane %v3038_v20, 1  ;;  %v3102_v24 = vadd.f32 %v3101_v21, %v3100_v45  ;;  %v5038_v45 = vld [vmem:[#allocation17 + $0x140] ss:$8 sps:$4 sm:$0xff]  }
 0x4be   :  { %v3034_v25 = vadd.f32 %v3033_v37, %v3032_v19  ;;  %v3097_v14 = vrot.slane %v3096_v22, 1  ;;  %v1396_v19 = vrot.slane %v5806_v58, %v5751_v50 }
 0x4bf   :  { %v3040_v39 = vadd.f32 %v3039_v23, %v3038_v20  ;;  %v3103_v26 = vrot.slane %v3102_v24, 1 }
 0x4c0   :  { %v3077_v46 = vmul.f32 0.125, %v3034_v25  ;;  %v3098_v28 = vadd.f32 %v3097_v14, %v3096_v22 }
 0x4c1   :  { %v3078_v15 = vmul.f32 0.125, %v3040_v39  ;;  %v3104_v51 = vadd.f32 %v3103_v26, %v3102_v24  ;;  %v5041_v24 = vld [vmem:[#allocation17 + $0x150] ss:$8 sps:$4 sm:$0xff]   ;;  %v5046_v26 = vld [vmem:[#allocation17 + $0x164] ss:$8 sps:$4 sm:$0xff]  }
 0x4c2   :  { %v3141_v53 = vmul.f32 0.125, %v3098_v28  ;;  %v3149_v29 = vmul.f32 %v3077_v46, %v3077_v46  ;;  %v3173_v41 = vsub.f32 %v2777_v56, %v3077_v46 }
 0x4c3   :  { %v3142_v40 = vmul.f32 0.125, %v3104_v51  ;;  %v3150_v30 = vmul.f32 %v3078_v15, %v3078_v15  ;;  %v3174_v44 = vsub.f32 %v2779_v59, %v3078_v15 }
 0x4c4   :  { %v3157_v31 = vsub.f32 %v3141_v53, %v3149_v29 }
 0x4c5   :  { %v3158_v32 = vsub.f32 %v3142_v40, %v3150_v30  ;;  %v5044_v40 = vld [vmem:[#allocation17 + $0x160] ss:$8 sps:$4 sm:$0xff]  }
 0x4c6   :  { %v3165_v33 = vmax.f32 %v3157_v31, 0.0 }
 0x4c7   :  { %v3166_v47 = vmax.f32 %v3158_v32, 0.0  ;;  %v5049_v32 = vld [vmem:[#allocation17 + $0x174] ss:$8 sps:$4 sm:$0xff]  }
 0x4c8   :  { %v3181_v34 = vadd.f32 0.8, %v3165_v33 }
 0x4c9   :  { %v3182_v35 = vadd.f32 0.8, %v3166_v47 }
 0x4ca   :  { %5182 = vrsqrt.f32 %v3181_v34 }
 0x4cb   :  { %5184 = vrsqrt.f32 %v3182_v35 }
 0x4d4   :  { %v5183_v60 = vpop.eup %5182 }
 0x4d5   :  { %v5185_v52 = vpop.eup %5184  ;;  %v3197_v54 = vmul.f32 %v5183_v60, %v3173_v41  ;;  %v5047_v60 = vld [vmem:[#allocation17 + $0x170] ss:$8 sps:$4 sm:$0xff]  }
 0x4d6   :  { %v3198_v61 = vmul.f32 %v5185_v52, %v3174_v44  ;;  %v5052_v52 = vld [vmem:[#allocation17 + $0x184] ss:$8 sps:$4 sm:$0xff]  }
 0x4d7   :  { %v3247_v63 = vmul.f32 %v3210_v43, %v3197_v54 }
 0x4d8   :  { %v3248_v3 = vmul.f32 %v3214_v48, %v3198_v61 }
 0x4d9   :  { %v3297_v6 = vadd.f32 %v3260_v55, %v3247_v63 }
 0x4da   :  { %v3298_v56 = vadd.f32 %v3264_v62, %v3248_v3 }
 0x4db   :  { %vm3305_vm9 = vcmp.gt.f32.partialorder %v3297_v6, 0.0  ;;  %v3313_v57 = vmul.f32 0.2, %v3297_v6 }
 0x4dc   :  { %vm3306_vm10 = vcmp.gt.f32.partialorder %v3298_v56, 0.0  ;;  %v3314_v59 = vmul.f32 0.2, %v3298_v56 }
 0x4dd   :  { %v3321_v42 = vsel %vm3305_vm9, %v3297_v6, %v3313_v57  ;;  %v5050_v6 = vld [vmem:[#allocation17 + $0x180] ss:$8 sps:$4 sm:$0xff]  }
 0x4de   :  { %v3322_v7 = vsel %vm3306_vm10, %v3298_v56, %v3314_v59  ;;  %v3345_v9 = vpack.c.bf16 %v3321_v42, %v3321_v42  ;;  %v5055_v59 = vld [vmem:[#allocation17 + $0x194] ss:$8 sps:$4 sm:$0xff]  }
 0x4df   :  { %v3346_v0 = vpack.c.bf16 %v3322_v7, %v3322_v7 }
 0x4e1   :  { %4165 = vmatprep.mubr.bf16.mxu0 %v3346_v0 }
 0x4e2   :  { %4166 = vmatmul.mubr.bf16.vlgmr.msra.gmra.mrb[12].mxu0 %v3345_v9 }
 0x4e3   :  { %4175 = vmatpush1.bf16.msra.mxu0 %v5026_v8 }
 0x4e4   :  { %4176 = vmatprep.subr.bf16.mxu0 %v5031_v5 }
 0x4e7   :  { %4177 = vmatpush1.bf16.msra.mxu0 %v5029_v10  ;;  %v5053_v10 = vld [vmem:[#allocation17 + $0x190] ss:$8 sps:$4 sm:$0xff]  }
 0x4e8   :  { %4178 = vmatprep.subr.bf16.mxu0 %v5034_v11 }
 0x4eb   :  { %4179 = vmatpush1.bf16.msra.mxu0 %v5032_v12  ;;  %v5058_v12 = vld [vmem:[#allocation17 + $0x1a4] ss:$8 sps:$4 sm:$0xff]  }
 0x4ec   :  { %4180 = vmatprep.subr.bf16.mxu0 %v5037_v13 }
 0x4ef   :  { %4181 = vmatpush1.bf16.msra.mxu0 %v5035_v16 }
 0x4f0   :  { %4182 = vmatprep.subr.bf16.mxu0 %v5040_v17 }
 0x4f1   :  { %v2858_v20 = vpop.f32.mrb[16].mxu1 }
 0x4f2   :  { %v5836_v21 = vadd.f32 %v2858_v20, %v1392_v18  ;;  %v2860_v37 = vpop.f32.mrb[17].mxu1  ;;  %v5056_v18 = vld [vmem:[#allocation17 + $0x1a0] ss:$8 sps:$4 sm:$0xff]   ;;  %v5059_v20 = vld [vmem:[#allocation17 + $0x1b0] ss:$8 sps:$4 sm:$0xff]  }
 0x4f3   :  { %v5838_v22 = vadd.f32 %v2860_v37, %v1396_v19  ;;  %4183 = vmatpush1.bf16.msra.mxu0 %v5038_v45  ;;  %v2862_v23 = vpop.f32.mrb[18].mxu1  ;;  %v5061_v19 = vld [vmem:[#allocation17 + $0x1b4] ss:$8 sps:$4 sm:$0xff]   ;;  %v5064_v37 = vld [vmem:[#allocation17 + $0x1c4] ss:$8 sps:$4 sm:$0xff]  }
 0x4f4   :  { %v3041_v25 = vrot.slane %v5836_v21, 4  ;;  %v3087_v14 = vmul.f32 %v5836_v21, %v5836_v21  ;;  %v2863_v39 = vpop.f32.mrb[19].mxu1  ;;  %4184 = vmatprep.subr.bf16.mxu0 %v5043_v49  ;;  %v5062_v23 = vld [vmem:[#allocation17 + $0x1c0] ss:$8 sps:$4 sm:$0xff]  }
 0x4f5   :  { %v3047_v46 = vrot.slane %v5838_v22, 4  ;;  %v3088_v28 = vmul.f32 %v5838_v22, %v5838_v22  ;;  %v5065_v39 = vld [vmem:[#allocation17 + $0x1d0] ss:$8 sps:$4 sm:$0xff]  }
 0x4f6   :  { %v3042_v15 = vadd.f32 %v5836_v21, %v3041_v25  ;;  %v3105_v51 = vrot.slane %v3087_v14, 4 }
 0x4f7   :  { %v3048_v53 = vadd.f32 %v5838_v22, %v3047_v46  ;;  %v3111_v29 = vrot.slane %v3088_v28, 4  ;;  %4185 = vmatpush1.bf16.msra.mxu0 %v5041_v24  ;;  %v5067_v24 = vld [vmem:[#allocation17 + $0x1d4] ss:$8 sps:$4 sm:$0xff]  }
 0x4f8   :  { %v3043_v30 = vrot.slane %v3042_v15, 2  ;;  %v3106_v31 = vadd.f32 %v3105_v51, %v3087_v14  ;;  %4186 = vmatprep.subr.bf16.mxu0 %v5046_v26  ;;  %v3218_v14 = vrot.slane %v5817_v36, %v5748_v27 }
 0x4f9   :  { %v3049_v33 = vrot.slane %v3048_v53, 2  ;;  %v3112_v47 = vadd.f32 %v3111_v29, %v3088_v28  ;;  %v5070_v28 = vld [vmem:[#allocation17 + $0x1e4] ss:$8 sps:$4 sm:$0xff]   ;;  %v3268_v29 = vrot.slane %v5822_v38, %v5748_v27 }
 0x4fa   :  { %v3044_v34 = vadd.f32 %v3043_v30, %v3042_v15  ;;  %v3107_v35 = vrot.slane %v3106_v31, 2  ;;  %v3222_v15 = vrot.slane %v5817_v36, %v5751_v50  ;;  %v5076_v27 = vld [vmem:[#allocation17 + $0x204] ss:$8 sps:$4 sm:$0xff]  }
 0x4fb   :  { %v3050_v41 = vadd.f32 %v3049_v33, %v3048_v53  ;;  %v3113_v43 = vrot.slane %v3112_v47, 2  ;;  %4187 = vmatpush1.bf16.msra.mxu0 %v5044_v40 }
 0x4fc   :  { %v3045_v44 = vrot.slane %v3044_v34, 1  ;;  %v3108_v48 = vadd.f32 %v3107_v35, %v3106_v31  ;;  %4188 = vmatprep.subr.bf16.mxu0 %v5049_v32  ;;  %v5068_v31 = vld [vmem:[#allocation17 + $0x1e0] ss:$8 sps:$4 sm:$0xff]   ;;  %v5073_v32 = vld [vmem:[#allocation17 + $0x1f4] ss:$8 sps:$4 sm:$0xff]  }
 0x4fd   :  { %v3051_v54 = vrot.slane %v3050_v41, 1  ;;  %v3114_v55 = vadd.f32 %v3113_v43, %v3112_v47 }
 0x4fe   :  { %v3046_v61 = vadd.f32 %v3045_v44, %v3044_v34  ;;  %v3109_v62 = vrot.slane %v3108_v48, 1  ;;  %v5071_v34 = vld [vmem:[#allocation17 + $0x1f0] ss:$8 sps:$4 sm:$0xff]   ;;  %v5074_v44 = vld [vmem:[#allocation17 + $0x200] ss:$8 sps:$4 sm:$0xff]  }
 0x4ff   :  { %v3052_v63 = vadd.f32 %v3051_v54, %v3050_v41  ;;  %v3115_v3 = vrot.slane %v3114_v55, 1  ;;  %4189 = vmatpush1.bf16.msra.mxu0 %v5047_v60  ;;  %v5077_v54 = vld [vmem:[#allocation17 + $0x210] ss:$8 sps:$4 sm:$0xff]  }
 0x500   :  { %v3079_v56 = vmul.f32 0.125, %v3046_v61  ;;  %v3110_v57 = vadd.f32 %v3109_v62, %v3108_v48  ;;  %4190 = vmatprep.subr.bf16.mxu0 %v5052_v52  ;;  %v5079_v52 = vld [vmem:[#allocation17 + $0x214] ss:$8 sps:$4 sm:$0xff]   ;;  %v5080_v61 = vld [vmem:[#allocation17 + $0x220] ss:$8 sps:$4 sm:$0xff]  }
 0x501   :  { %v3080_v42 = vmul.f32 0.125, %v3052_v63  ;;  %v3116_v7 = vadd.f32 %v3115_v3, %v3114_v55  ;;  %v5082_v55 = vld [vmem:[#allocation17 + $0x224] ss:$8 sps:$4 sm:$0xff]   ;;  %v5085_v62 = vld [vmem:[#allocation17 + $0x234] ss:$8 sps:$4 sm:$0xff]   ;;  %v5859_v63 = vsub.s32 4, %v5676_v1 }
 0x502   :  { %v3143_v0 = vmul.f32 0.125, %v3110_v57  ;;  %v3151_v8 = vmul.f32 %v3079_v56, %v3079_v56  ;;  %v3175_v25 = vsub.f32 %v5836_v21, %v3079_v56  ;;  %v3272_v21 = vrot.slane %v5822_v38, %v5751_v50  ;;  %v5083_v3 = vld [vmem:[#allocation17 + $0x230] ss:$8 sps:$4 sm:$0xff]   ;;  %v5088_v56 = vld [vmem:[#allocation17 + $0x244] ss:$8 sps:$4 sm:$0xff]  }
 0x503   :  { %v3144_v9 = vmul.f32 0.125, %v3116_v7  ;;  %v3152_v5 = vmul.f32 %v3080_v42, %v3080_v42  ;;  %4191 = vmatpush1.bf16.msra.mxu0 %v5050_v6  ;;  %v3176_v46 = vsub.f32 %v5838_v22, %v3080_v42  ;;  %v5862_v6 = vsub.s32 5, %v5676_v1  ;;  %v5086_v42 = vld [vmem:[#allocation17 + $0x240] ss:$8 sps:$4 sm:$0xff]   ;;  %v5091_v7 = vld [vmem:[#allocation17 + $0x254] ss:$8 sps:$4 sm:$0xff]  }
 0x504   :  { %v3159_v11 = vsub.f32 %v3143_v0, %v3151_v8  ;;  %4192 = vmatprep.subr.bf16.mxu0 %v5055_v59  ;;  %v1400_v57 = vrot.slane %v5806_v58, %v5859_v63 }
 0x505   :  { %v3160_v13 = vsub.f32 %v3144_v9, %v3152_v5  ;;  %v1404_v59 = vrot.slane %v5806_v58, %v5862_v6 }
 0x506   :  { %v3167_v16 = vmax.f32 %v3159_v11, 0.0  ;;  %v5089_v11 = vld [vmem:[#allocation17 + $0x250] ss:$8 sps:$4 sm:$0xff]  }
 0x507   :  { %v3168_v17 = vmax.f32 %v3160_v13, 0.0  ;;  %4193 = vmatpush1.bf16.msra.mxu0 %v5053_v10 }
 0x508   :  { %v3183_v45 = vadd.f32 0.8, %v3167_v16  ;;  %4194 = vmatprep.subr.bf16.mxu0 %v5058_v12 }
 0x509   :  { %v3184_v49 = vadd.f32 0.8, %v3168_v17  ;;  %v5094_v17 = vld [vmem:[#allocation17 + $0x264] ss:$8 sps:$4 sm:$0xff]  }
 0x50a   :  { %5186 = vrsqrt.f32 %v3183_v45 }
 0x50b   :  { %5188 = vrsqrt.f32 %v3184_v49  ;;  %4195 = vmatpush1.bf16.msra.mxu0 %v5056_v18 }
 0x50c   :  { %4196 = vmatprep.subr.bf16.mxu0 %v5061_v19 }
 0x50f   :  { %4197 = vmatpush1.bf16.msra.mxu0 %v5059_v20 }
 0x510   :  { %4198 = vmatprep.subr.bf16.mxu0 %v5064_v37 }
 0x513   :  { %4199 = vmatpush1.bf16.msra.mxu0 %v5062_v23  ;;  %v5092_v23 = vld [vmem:[#allocation17 + $0x260] ss:$8 sps:$4 sm:$0xff]  }
 0x514   :  { %v5187_v26 = vpop.eup %5186  ;;  %4200 = vmatprep.subr.bf16.mxu0 %v5067_v24 }
 0x515   :  { %v5189_v51 = vpop.eup %5188  ;;  %v3199_v53 = vmul.f32 %v5187_v26, %v3175_v25 }
 0x516   :  { %v3200_v40 = vmul.f32 %v5189_v51, %v3176_v46 }
 0x517   :  { %v3249_v30 = vmul.f32 %v3218_v14, %v3199_v53  ;;  %4201 = vmatpush1.bf16.msra.mxu0 %v5065_v39  ;;  %v5097_v14 = vld [vmem:[#allocation17 + $0x274] ss:$8 sps:$4 sm:$0xff]   ;;  %v5095_v53 = vld [vmem:[#allocation17 + $0x270] ss:$8 sps:$4 sm:$0xff]  }
 0x518   :  { %4202 = vmatprep.subr.bf16.mxu0 %v5070_v28  ;;  %v3250_v22 = vmul.f32 %v3222_v15, %v3200_v40 }
 0x519   :  { %v3299_v33 = vadd.f32 %v3268_v29, %v3249_v30 }
 0x51a   :  { %v3300_v47 = vadd.f32 %v3272_v21, %v3250_v22  ;;  %v5100_v21 = vld [vmem:[#allocation17 + $0x284] ss:$8 sps:$4 sm:$0xff]  }
 0x51b   :  { %4203 = vmatpush1.bf16.msra.mxu0 %v5068_v31  ;;  %vm3307_vm11 = vcmp.gt.f32.partialorder %v3299_v33, 0.0  ;;  %v3315_v35 = vmul.f32 0.2, %v3299_v33 }
 0x51c   :  { %4204 = vmatprep.subr.bf16.mxu0 %v5073_v32  ;;  %vm3308_vm12 = vcmp.gt.f32.partialorder %v3300_v47, 0.0  ;;  %v3316_v41 = vmul.f32 0.2, %v3300_v47 }
 0x51d   :  { %v3323_v43 = vsel %vm3307_vm11, %v3299_v33, %v3315_v35 }
 0x51e   :  { %v3324_v60 = vsel %vm3308_vm12, %v3300_v47, %v3316_v41  ;;  %v3347_v48 = vpack.c.bf16 %v3323_v43, %v3323_v43 }
 0x51f   :  { %4205 = vmatpush1.bf16.msra.mxu0 %v5071_v34  ;;  %v3348_v50 = vpack.c.bf16 %v3324_v60, %v3324_v60  ;;  %v5098_v34 = vld [vmem:[#allocation17 + $0x280] ss:$8 sps:$4 sm:$0xff]  }
 0x520   :  { %4215 = vmatprep.subr.bf16.mxu0 %v5076_v27  ;;  %v5103_v27 = vld [vmem:[#allocation17 + $0x294] ss:$8 sps:$4 sm:$0xff]  }
 0x521   :  { %4206 = vmatprep.mubr.bf16.mxu0 %v3348_v50 }
 0x522   :  { %4207 = vmatmul.mubr.bf16.vlgmr.msra.gmra.mrb[12].mxu0 %v3347_v48 }
 0x523   :  { %4216 = vmatpush1.bf16.msra.mxu0 %v5074_v44 }
 0x524   :  { %4217 = vmatprep.subr.bf16.mxu0 %v5079_v52 }
 0x527   :  { %4218 = vmatpush1.bf16.msra.mxu0 %v5077_v54  ;;  %v5101_v54 = vld [vmem:[#allocation17 + $0x290] ss:$8 sps:$4 sm:$0xff]  }
 0x528   :  { %4219 = vmatprep.subr.bf16.mxu0 %v5082_v55 }
 0x52b   :  { %4220 = vmatpush1.bf16.msra.mxu0 %v5080_v61  ;;  %v5106_v61 = vld [vmem:[#allocation17 + $0x2a4] ss:$8 sps:$4 sm:$0xff]  }
 0x52c   :  { %4221 = vmatprep.subr.bf16.mxu0 %v5085_v62 }
 0x52f   :  { %4222 = vmatpush1.bf16.msra.mxu0 %v5083_v3 }
 0x530   :  { %4223 = vmatprep.subr.bf16.mxu0 %v5088_v56 }
 0x531   :  { %v2940_v0 = vpop.f32.mrb[8].mxu0 }
 0x532   :  { %v5868_v8 = vadd.f32 %v2940_v0, %v1400_v57  ;;  %v2942_v9 = vpop.f32.mrb[9].mxu0  ;;  %v5104_v57 = vld [vmem:[#allocation17 + $0x2a0] ss:$8 sps:$4 sm:$0xff]   ;;  %v5107_v0 = vld [vmem:[#allocation17 + $0x2b0] ss:$8 sps:$4 sm:$0xff]  }
 0x533   :  { %v5870_v5 = vadd.f32 %v2942_v9, %v1404_v59  ;;  %v2944_v10 = vpop.f32.mrb[10].mxu0  ;;  %4224 = vmatpush1.bf16.msra.mxu0 %v5086_v42  ;;  %v5109_v42 = vld [vmem:[#allocation17 + $0x2b4] ss:$8 sps:$4 sm:$0xff]   ;;  %v5112_v9 = vld [vmem:[#allocation17 + $0x2c4] ss:$8 sps:$4 sm:$0xff]  }
 0x534   :  { %v3053_v12 = vrot.slane %v5868_v8, 4  ;;  %v3089_v13 = vmul.f32 %v5868_v8, %v5868_v8  ;;  %v2945_v16 = vpop.f32.mrb[11].mxu0  ;;  %4225 = vmatprep.subr.bf16.mxu0 %v5091_v7  ;;  %v5110_v10 = vld [vmem:[#allocation17 + $0x2c0] ss:$8 sps:$4 sm:$0xff]  }
 0x535   :  { %v3059_v18 = vrot.slane %v5870_v5, 4  ;;  %v3090_v45 = vmul.f32 %v5870_v5, %v5870_v5  ;;  %v5113_v16 = vld [vmem:[#allocation17 + $0x2d0] ss:$8 sps:$4 sm:$0xff]  }
 0x536   :  { %v3054_v19 = vadd.f32 %v5868_v8, %v3053_v12  ;;  %v3117_v49 = vrot.slane %v3089_v13, 4 }
 0x537   :  { %v3060_v20 = vadd.f32 %v5870_v5, %v3059_v18  ;;  %v3123_v37 = vrot.slane %v3090_v45, 4  ;;  %4226 = vmatpush1.bf16.msra.mxu0 %v5089_v11  ;;  %v5115_v11 = vld [vmem:[#allocation17 + $0x2d4] ss:$8 sps:$4 sm:$0xff]  }
 0x538   :  { %v3055_v24 = vrot.slane %v3054_v19, 2  ;;  %v3118_v25 = vadd.f32 %v3117_v49, %v3089_v13  ;;  %4227 = vmatprep.subr.bf16.mxu0 %v5094_v17  ;;  %v3226_v13 = vrot.slane %v5817_v36, %v5859_v63 }
 0x539   :  { %v3061_v39 = vrot.slane %v3060_v20, 2  ;;  %v3124_v26 = vadd.f32 %v3123_v37, %v3090_v45  ;;  %v3230_v45 = vrot.slane %v5817_v36, %v5862_v6  ;;  %v3276_v37 = vrot.slane %v5822_v38, %v5859_v63  ;;  %v5124_v63 = vld [vmem:[#allocation17 + $0x304] ss:$8 sps:$4 sm:$0xff]  }
 0x53a   :  { %v3056_v46 = vadd.f32 %v3055_v24, %v3054_v19  ;;  %v3119_v28 = vrot.slane %v3118_v25, 2  ;;  %v5118_v19 = vld [vmem:[#allocation17 + $0x2e4] ss:$8 sps:$4 sm:$0xff]  }
 0x53b   :  { %v3062_v15 = vadd.f32 %v3061_v39, %v3060_v20  ;;  %v3125_v51 = vrot.slane %v3124_v26, 2  ;;  %4228 = vmatpush1.bf16.msra.mxu0 %v5092_v23 }
 0x53c   :  { %v3057_v29 = vrot.slane %v3056_v46, 1  ;;  %v3120_v40 = vadd.f32 %v3119_v28, %v3118_v25  ;;  %4229 = vmatprep.subr.bf16.mxu0 %v5097_v14  ;;  %v5116_v25 = vld [vmem:[#allocation17 + $0x2e0] ss:$8 sps:$4 sm:$0xff]   ;;  %v5121_v14 = vld [vmem:[#allocation17 + $0x2f4] ss:$8 sps:$4 sm:$0xff]  }
 0x53d   :  { %v3063_v30 = vrot.slane %v3062_v15, 1  ;;  %v3126_v31 = vadd.f32 %v3125_v51, %v3124_v26 }
 0x53e   :  { %v3058_v32 = vadd.f32 %v3057_v29, %v3056_v46  ;;  %v3121_v22 = vrot.slane %v3120_v40, 1  ;;  %v5119_v46 = vld [vmem:[#allocation17 + $0x2f0] ss:$8 sps:$4 sm:$0xff]   ;;  %v5122_v29 = vld [vmem:[#allocation17 + $0x300] ss:$8 sps:$4 sm:$0xff]  }
 0x53f   :  { %v3064_v33 = vadd.f32 %v3063_v30, %v3062_v15  ;;  %v3127_v47 = vrot.slane %v3126_v31, 1  ;;  %4230 = vmatpush1.bf16.msra.mxu0 %v5095_v53  ;;  %v5125_v30 = vld [vmem:[#allocation17 + $0x310] ss:$8 sps:$4 sm:$0xff]  }
 0x540   :  { %v3081_v35 = vmul.f32 0.125, %v3058_v32  ;;  %v3122_v41 = vadd.f32 %v3121_v22, %v3120_v40  ;;  %4231 = vmatprep.subr.bf16.mxu0 %v5100_v21  ;;  %v5127_v21 = vld [vmem:[#allocation17 + $0x314] ss:$8 sps:$4 sm:$0xff]   ;;  %v5128_v32 = vld [vmem:[#allocation17 + $0x320] ss:$8 sps:$4 sm:$0xff]  }
 0x541   :  { %v3082_v43 = vmul.f32 0.125, %v3064_v33  ;;  %v3128_v60 = vadd.f32 %v3127_v47, %v3126_v31  ;;  %v5130_v31 = vld [vmem:[#allocation17 + $0x324] ss:$8 sps:$4 sm:$0xff]   ;;  %v5133_v22 = vld [vmem:[#allocation17 + $0x334] ss:$8 sps:$4 sm:$0xff]   ;;  %v5891_v47 = vsub.s32 6, %v5676_v1 }
 0x542   :  { %v3145_v50 = vmul.f32 0.125, %v3122_v41  ;;  %v3153_v44 = vmul.f32 %v3081_v35, %v3081_v35  ;;  %v3177_v12 = vsub.f32 %v5868_v8, %v3081_v35  ;;  %v3280_v8 = vrot.slane %v5822_v38, %v5862_v6  ;;  %v5131_v33 = vld [vmem:[#allocation17 + $0x330] ss:$8 sps:$4 sm:$0xff]   ;;  %v5136_v35 = vld [vmem:[#allocation17 + $0x344] ss:$8 sps:$4 sm:$0xff]  }
 0x543   :  { %v3146_v48 = vmul.f32 0.125, %v3128_v60  ;;  %v3154_v52 = vmul.f32 %v3082_v43, %v3082_v43  ;;  %4232 = vmatpush1.bf16.msra.mxu0 %v5098_v34  ;;  %v3178_v18 = vsub.f32 %v5870_v5, %v3082_v43  ;;  %v5894_v34 = vsub.s32 7, %v5676_v1  ;;  %v5139_v60 = vld [vmem:[#allocation17 + $0x354] ss:$8 sps:$4 sm:$0xff]  }
 0x544   :  { %v3161_v55 = vsub.f32 %v3145_v50, %v3153_v44  ;;  %4233 = vmatprep.subr.bf16.mxu0 %v5103_v27  ;;  %v1408_v41 = vrot.slane %v5806_v58, %v5891_v47  ;;  %v5134_v27 = vld [vmem:[#allocation17 + $0x340] ss:$8 sps:$4 sm:$0xff]  }
 0x545   :  { %v3162_v62 = vsub.f32 %v3146_v48, %v3154_v52  ;;  %v1412_v43 = vrot.slane %v5806_v58, %v5894_v34  ;;  %v5137_v52 = vld [vmem:[#allocation17 + $0x350] ss:$8 sps:$4 sm:$0xff]  }
 0x546   :  { %v3169_v3 = vmax.f32 %v3161_v55, 0.0  ;;  %v5142_v55 = vld [vmem:[#allocation17 + $0x364] ss:$8 sps:$4 sm:$0xff]  }
 0x547   :  { %v3170_v56 = vmax.f32 %v3162_v62, 0.0  ;;  %4234 = vmatpush1.bf16.msra.mxu0 %v5101_v54 }
 0x548   :  { %v3185_v59 = vadd.f32 0.8, %v3169_v3  ;;  %4235 = vmatprep.subr.bf16.mxu0 %v5106_v61 }
 0x549   :  { %v3186_v7 = vadd.f32 0.8, %v3170_v56 }
 0x54a   :  { %5190 = vrsqrt.f32 %v3185_v59 }
 0x54b   :  { %5192 = vrsqrt.f32 %v3186_v7  ;;  %4236 = vmatpush1.bf16.msra.mxu0 %v5104_v57 }
 0x54c   :  { %4237 = vmatprep.subr.bf16.mxu0 %v5109_v42  ;;  %v5140_v42 = vld [vmem:[#allocation17 + $0x360] ss:$8 sps:$4 sm:$0xff]  }
 0x54f   :  { %4238 = vmatpush1.bf16.msra.mxu0 %v5107_v0 }
 0x550   :  { %4239 = vmatprep.subr.bf16.mxu0 %v5112_v9  ;;  %v5145_v9 = vld [vmem:[#allocation17 + $0x374] ss:$8 sps:$4 sm:$0xff]  }
 0x553   :  { %4240 = vmatpush1.bf16.msra.mxu0 %v5110_v10 }
 0x554   :  { %v5191_v17 = vpop.eup %5190  ;;  %4241 = vmatprep.subr.bf16.mxu0 %v5115_v11 }
 0x555   :  { %v5193_v49 = vpop.eup %5192  ;;  %v3201_v20 = vmul.f32 %v5191_v17, %v3177_v12 }
 0x556   :  { %v3202_v23 = vmul.f32 %v5193_v49, %v3178_v18  ;;  %v5143_v18 = vld [vmem:[#allocation17 + $0x370] ss:$8 sps:$4 sm:$0xff]   ;;  %v5148_v49 = vld [vmem:[#allocation17 + $0x384] ss:$8 sps:$4 sm:$0xff]  }
 0x557   :  { %v3251_v24 = vmul.f32 %v3226_v13, %v3201_v20  ;;  %4242 = vmatpush1.bf16.msra.mxu0 %v5113_v16 }
 0x558   :  { %4243 = vmatprep.subr.bf16.mxu0 %v5118_v19  ;;  %v3252_v5 = vmul.f32 %v3230_v45, %v3202_v23 }
 0x559   :  { %v3301_v39 = vadd.f32 %v3276_v37, %v3251_v24 }
 0x55a   :  { %v3302_v26 = vadd.f32 %v3280_v8, %v3252_v5 }
 0x55b   :  { %4244 = vmatpush1.bf16.msra.mxu0 %v5116_v25  ;;  %vm3309_vm13 = vcmp.gt.f32.partialorder %v3301_v39, 0.0  ;;  %v3317_v28 = vmul.f32 0.2, %v3301_v39 }
 0x55c   :  { %4245 = vmatprep.subr.bf16.mxu0 %v5121_v14  ;;  %vm3310_vm14 = vcmp.gt.f32.partialorder %v3302_v26, 0.0  ;;  %v3318_v15 = vmul.f32 0.2, %v3302_v26  ;;  %v5146_v14 = vld [vmem:[#allocation17 + $0x380] ss:$8 sps:$4 sm:$0xff]  }
 0x55d   :  { %v3325_v51 = vsel %vm3309_vm13, %v3301_v39, %v3317_v28 }
 0x55e   :  { %v3326_v53 = vsel %vm3310_vm14, %v3302_v26, %v3318_v15  ;;  %v3349_v40 = vpack.c.bf16 %v3325_v51, %v3325_v51  ;;  %v5151_v26 = vld [vmem:[#allocation17 + $0x394] ss:$8 sps:$4 sm:$0xff]  }
 0x55f   :  { %4246 = vmatpush1.bf16.msra.mxu0 %v5119_v46  ;;  %v3350_v6 = vpack.c.bf16 %v3326_v53, %v3326_v53 }
 0x560   :  { %4256 = vmatprep.subr.bf16.mxu0 %v5124_v63 }
 0x561   :  { %4247 = vmatprep.mubr.bf16.mxu0 %v3350_v6  ;;  %v5149_v6 = vld [vmem:[#allocation17 + $0x390] ss:$8 sps:$4 sm:$0xff]  }
 0x562   :  { %4248 = vmatmul.mubr.bf16.vlgmr.msra.gmra.mrb[12].mxu0 %v3349_v40 }
 0x563   :  { %4257 = vmatpush1.bf16.msra.mxu0 %v5122_v29 }
 0x564   :  { %4258 = vmatprep.subr.bf16.mxu0 %v5127_v21  ;;  %v5154_v21 = vld [vmem:[#allocation17 + $0x3a4] ss:$8 sps:$4 sm:$0xff]  }
 0x567   :  { %4259 = vmatpush1.bf16.msra.mxu0 %v5125_v30 }
 0x568   :  { %4260 = vmatprep.subr.bf16.mxu0 %v5130_v31 }
 0x56b   :  { %4261 = vmatpush1.bf16.msra.mxu0 %v5128_v32 }
 0x56c   :  { %4262 = vmatprep.subr.bf16.mxu0 %v5133_v22  ;;  %v5152_v22 = vld [vmem:[#allocation17 + $0x3a0] ss:$8 sps:$4 sm:$0xff]  }
 0x56f   :  { %4263 = vmatpush1.bf16.msra.mxu0 %v5131_v33 }
 0x570   :  { %4264 = vmatprep.subr.bf16.mxu0 %v5136_v35  ;;  %v5157_v35 = vld [vmem:[#allocation17 + $0x3b4] ss:$8 sps:$4 sm:$0xff]  }
 0x572   :  { %v3022_v50 = vpop.f32.mrb[20].mxu1 }
 0x573   :  { %v5900_v44 = vadd.f32 %v3022_v50, %v1408_v41  ;;  %v3024_v48 = vpop.f32.mrb[21].mxu1  ;;  %4265 = vmatpush1.bf16.msra.mxu0 %v5134_v27  ;;  %v5158_v50 = vld [vmem:[#allocation17 + $0x3c0] ss:$8 sps:$4 sm:$0xff]  }
 0x574   :  { %v5902_v54 = vadd.f32 %v3024_v48, %v1412_v43  ;;  %v3026_v1 = vpop.f32.mrb[22].mxu1  ;;  %4266 = vmatprep.subr.bf16.mxu0 %v5139_v60  ;;  %v5155_v43 = vld [vmem:[#allocation17 + $0x3b0] ss:$8 sps:$4 sm:$0xff]   ;;  %v5160_v60 = vld [vmem:[#allocation17 + $0x3c4] ss:$8 sps:$4 sm:$0xff]  }
 0x575   :  { %v3065_v61 = vrot.slane %v5900_v44, 4  ;;  %v3091_v62 = vmul.f32 %v5900_v44, %v5900_v44  ;;  %v3027_v3 = vpop.f32.mrb[23].mxu1  ;;  %v5163_v48 = vld [vmem:[#allocation17 + $0x3d4] ss:$8 sps:$4 sm:$0xff]  }
 0x576   :  { %v3071_v58 = vrot.slane %v5902_v54, 4  ;;  %v3092_v56 = vmul.f32 %v5902_v54, %v5902_v54 }
 0x577   :  { %v3066_v57 = vadd.f32 %v5900_v44, %v3065_v61  ;;  %v3129_v59 = vrot.slane %v3091_v62, 4  ;;  %4267 = vmatpush1.bf16.msra.mxu0 %v5137_v52  ;;  %v5161_v52 = vld [vmem:[#allocation17 + $0x3d0] ss:$8 sps:$4 sm:$0xff]   ;;  %v5166_v61 = vld [vmem:[#allocation17 + $0x3e4] ss:$8 sps:$4 sm:$0xff]  }
 0x578   :  { %v3072_v7 = vadd.f32 %v5902_v54, %v3071_v58  ;;  %v3135_v0 = vrot.slane %v3092_v56, 4  ;;  %4268 = vmatprep.subr.bf16.mxu0 %v5142_v55  ;;  %v3234_v55 = vrot.slane %v5817_v36, %v5891_v47  ;;  %v3238_v58 = vrot.slane %v5817_v36, %v5894_v34 }
 0x579   :  { %v3067_v10 = vrot.slane %v3066_v57, 2  ;;  %v3130_v11 = vadd.f32 %v3129_v59, %v3091_v62  ;;  %v3284_v59 = vrot.slane %v5822_v38, %v5891_v47 }
 0x57a   :  { %v3073_v12 = vrot.slane %v3072_v7, 2  ;;  %v3136_v13 = vadd.f32 %v3135_v0, %v3092_v56 }
 0x57b   :  { %v3068_v16 = vadd.f32 %v3067_v10, %v3066_v57  ;;  %v3131_v17 = vrot.slane %v3130_v11, 2  ;;  %4269 = vmatpush1.bf16.msra.mxu0 %v5140_v42 }
 0x57c   :  { %v3074_v45 = vadd.f32 %v3073_v12, %v3072_v7  ;;  %v3137_v19 = vrot.slane %v3136_v13, 2  ;;  %4270 = vmatprep.subr.bf16.mxu0 %v5145_v9  ;;  %v5164_v7 = vld [vmem:[#allocation17 + $0x3e0] ss:$8 sps:$4 sm:$0xff]   ;;  %v5169_v9 = vld [vmem:[#allocation17 + $0x3f4] ss:$8 sps:$4 sm:$0xff]  }
 0x57d   :  { %v3069_v20 = vrot.slane %v3068_v16, 1  ;;  %v3132_v37 = vadd.f32 %v3131_v17, %v3130_v11 }
 0x57e   :  { %v3075_v23 = vrot.slane %v3074_v45, 1  ;;  %v3138_v8 = vadd.f32 %v3137_v19, %v3136_v13 }
 0x57f   :  { %v3070_v24 = vadd.f32 %v3069_v20, %v3068_v16  ;;  %v3133_v25 = vrot.slane %v3132_v37, 1  ;;  %4271 = vmatpush1.bf16.msra.mxu0 %v5143_v18 }
 0x580   :  { %v3076_v5 = vadd.f32 %v3075_v23, %v3074_v45  ;;  %v3139_v39 = vrot.slane %v3138_v8, 1  ;;  %4272 = vmatprep.subr.bf16.mxu0 %v5148_v49 }
 0x581   :  { %v3083_v46 = vmul.f32 0.125, %v3070_v24  ;;  %v3134_v28 = vadd.f32 %v3133_v25, %v3132_v37 }
 0x582   :  { %v3084_v15 = vmul.f32 0.125, %v3076_v5  ;;  %v3140_v63 = vadd.f32 %v3139_v39, %v3138_v8 }
 0x583   :  { %v3147_v51 = vmul.f32 0.125, %v3134_v28  ;;  %v3155_v53 = vmul.f32 %v3083_v46, %v3083_v46  ;;  %4273 = vmatpush1.bf16.msra.mxu0 %v5146_v14  ;;  %v3179_v1 = vsub.f32 %v5900_v44, %v3083_v46  ;;  %v3288_v44 = vrot.slane %v5822_v38, %v5894_v34  ;;  %v3481_v38 = vld [vmem:[%s5966_s28] sm:$0x3] }
 0x584   :  { %v3148_v29 = vmul.f32 0.125, %v3140_v63  ;;  %v3156_v40 = vmul.f32 %v3084_v15, %v3084_v15  ;;  %4274 = vmatprep.subr.bf16.mxu0 %v5151_v26  ;;  %v3180_v3 = vsub.f32 %v5902_v54, %v3084_v15  ;;  %v5167_v54 = vld [vmem:[#allocation17 + $0x3f0] ss:$8 sps:$4 sm:$0xff]   ;;  %v3486_v34 = vrot.slane %v3481_v38, %v5679_v2 }
 0x585   :  { %v3163_v30 = vsub.f32 %v3147_v51, %v3155_v53  ;;  %v3490_v45 = vrot.slane %v3481_v38, %v5682_v4 }
 0x586   :  { %v3164_v31 = vsub.f32 %v3148_v29, %v3156_v40 }
 0x587   :  { %v3171_v32 = vmax.f32 %v3163_v30, 0.0  ;;  %4275 = vmatpush1.bf16.msra.mxu0 %v5149_v6 }
 0x588   :  { %v3172_v33 = vmax.f32 %v3164_v31, 0.0  ;;  %4276 = vmatprep.subr.bf16.mxu0 %v5154_v21 }
 0x589   :  { %v3187_v41 = vadd.f32 0.8, %v3171_v32 }
 0x58a   :  { %v3188_v27 = vadd.f32 0.8, %v3172_v33 }
 0x58b   :  { %5194 = vrsqrt.f32 %v3187_v41  ;;  %4277 = vmatpush1.bf16.msra.mxu0 %v5152_v22 }
 0x58c   :  { %5196 = vrsqrt.f32 %v3188_v27  ;;  %4278 = vmatprep.subr.bf16.mxu0 %v5157_v35 }
 0x58f   :  { %4279 = vmatpush1.bf16.msra.mxu0 %v5155_v43 }
 0x590   :  { %4280 = vmatprep.subr.bf16.mxu0 %v5160_v60 }
 0x593   :  { %4281 = vmatpush1.bf16.msra.mxu0 %v5158_v50 }
 0x594   :  { %4282 = vmatprep.subr.bf16.mxu0 %v5163_v48 }
 0x595   :  { %v5195_v62 = vpop.eup %5194 }
 0x596   :  { %v5197_v56 = vpop.eup %5196  ;;  %v3203_v57 = vmul.f32 %v5195_v62, %v3179_v1 }
 0x597   :  { %v3204_v42 = vmul.f32 %v5197_v56, %v3180_v3  ;;  %4283 = vmatpush1.bf16.msra.mxu0 %v5161_v52 }
 0x598   :  { %v3253_v0 = vmul.f32 %v3234_v55, %v3203_v57  ;;  %4284 = vmatprep.subr.bf16.mxu0 %v5166_v61 }
 0x599   :  { %v3254_v10 = vmul.f32 %v3238_v58, %v3204_v42 }
 0x59a   :  { %v3303_v11 = vadd.f32 %v3284_v59, %v3253_v0 }
 0x59b   :  { %4285 = vmatpush1.bf16.msra.mxu0 %v5164_v7  ;;  %v3304_v12 = vadd.f32 %v3288_v44, %v3254_v10 }
 0x59c   :  { %4286 = vmatprep.subr.bf16.mxu0 %v5169_v9  ;;  %vm3311_vm15 = vcmp.gt.f32.partialorder %v3303_v11, 0.0  ;;  %v3319_v36 = vmul.f32 0.2, %v3303_v11 }
 0x59d   :  { %vm3312_vm0 = vcmp.gt.f32.partialorder %v3304_v12, 0.0  ;;  %v3320_v13 = vmul.f32 0.2, %v3304_v12 }
 0x59e   :  { %v3327_v47 = vsel %vm3311_vm15, %v3303_v11, %v3319_v36 }
 0x59f   :  { %4287 = vmatpush1.bf16.msra.mxu0 %v5167_v54  ;;  %v3328_v16 = vsel %vm3312_vm0, %v3304_v12, %v3320_v13  ;;  %v3351_v18 = vpack.c.bf16 %v3327_v47, %v3327_v47 }
 0x5a0   :  { %v3352_v17 = vpack.c.bf16 %v3328_v16, %v3328_v16 }
 0x5a2   :  { %4288 = vmatprep.mubr.bf16.mxu0 %v3352_v17 }
 0x5a3   :  { %4289 = vmatmul.mubr.bf16.vlgmr.msra.gmra.mrb[12].mxu0 %v3351_v18 }
 0x676   :  { %v4290_v19 = vpop.f32.mrb[12].mxu0 }
 0x677   :  { %v4809_v49 = vadd.f32 %v4290_v19, %v3486_v34  ;;  %v4292_v20 = vpop.f32.mrb[13].mxu0 }
 0x678   :  { %v4810_v37 = vadd.f32 %v4292_v20, %v3490_v45  ;;  %v4294_v23 = vpop.f32.mrb[14].mxu0 }
 0x679   :  { %5198 = vtanh.f32 %v4809_v49  ;;  %v4295_v8 = vpop.f32.mrb[15].mxu0 }
 0x67a   :  { %5200 = vtanh.f32 %v4810_v37 }
 0x683   :  { %v5199_v24 = vpop.eup %5198 }
 0x684   :  { %v5201_v25 = vpop.eup %5200  ;;  %4299 = vst [vmem:[#allocation18] sm:$0xff] %v5199_v24 }
 0x685   :  { %4300 = vst [vmem:[#allocation18 + $0x8] sm:$0xff] %v5201_v25 }
 0x686   :  { %5411 = shalt.err (!%p5408_p6)
}
 0x687   :  { %s5967_s16 = sld [smem:[#allocation28_spill]] }
 0x68d   :  { %s5412_s3 = scalar_lea.hbm %s5967_s16, 256 }
 0x68e   :  { %p5413_p7 = scmp.ne.s32.totalorder %s5967_s16, %s5412_s3  ;;  %p5416_p8 = scmp.lt.u32.totalorder %s5412_s3, %s5967_s16 }
 0x690   :  { %p5418_p9 = pnand %p5416_p8, %p5413_p7 }
 0x692   :  { %5421 = shalt.err (!%p5418_p9)
}
 0x693   :  { %4310 = dma.vmem_to_hbm [thread:$0]  %s4308_s22, 256, %s5967_s16, [#allocation5]  }
 0x694   :  { %5432 = dma.done.wait [#allocation5], 256  }
 0x695   :  { %5433 = vsyncadd [#allocation5], 4294967040 }
 0x696   :  { %4314 = vsyncpa [#allocation4], 1 }
 0x697   :  { %4315 = vsyncpa [#allocation7], 1 }
 0x698   :  { %4316 = vsyncpa [#allocation10], 1 }
 0x699   :  { %4317 = vsyncpa [#allocation13], 1 }
 0x69a   :  { %4318 = vsyncpa [#allocation16], 1 }
 0x69b   :  { %4319 = vsyncpa [#allocation5], 1 }

</bundles_post_ra>
